<compile_context>
chip_gen: v7x
topology: tpu7x:2x2x1
jax: 0.10.0
libtpu: 0.0.40
codegen_flags: <defaults>
</compile_context>

<pallas_src>
import jax
import jax.numpy as jnp
import numpy as np
from jax.experimental import pallas as pl
from jax.experimental.pallas import tpu as pltpu


# ----------------------------- config ---------------------------------------
D_IN = 3
MULTIRES = 2
FREQS = tuple(float(2 ** i) for i in range(MULTIRES))
EMBED_DIM = D_IN + D_IN * 2 * MULTIRES          # 15
N_KPS = 4
COND_DIM = N_KPS * 3                            # 12
HIDDEN = 64
D_OUT = 1
FEATURE_VEC = 15
OUT_DIM = D_OUT + FEATURE_VEC                   # 16
DIMS = [EMBED_DIM, HIDDEN, HIDDEN, HIDDEN, HIDDEN, OUT_DIM]
SKIP_IN = (3,)
GEOM_BIAS = 0.6

# per-layer (in_features, out_features); torch weight layout is (out, in)
LAYER_SHAPES = []
for _l in range(len(DIMS) - 1):
    _out = DIMS[_l + 1] - DIMS[0] if (_l + 1) in SKIP_IN else DIMS[_l + 1]
    _in = DIMS[_l] + COND_DIM if _l == 0 else DIMS[_l]
    LAYER_SHAPES.append((_in, _out))
# -> [(27, 64), (64, 64), (64, 49), (64, 64), (64, 16)]
H2_OUT = LAYER_SHAPES[2][1]                     # 49


def _round_up(a: int, b: int) -> int:
    return ((a + b - 1) // b) * b


def _cdiv(a: int, b: int) -> int:
    return (a + b - 1) // b


def _softplus100(x):
    # torch.nn.Softplus(beta=100): (1/beta)*log(1+exp(beta*x)); linear past beta*x > 20.
    z = 100.0 * x
    sp = jnp.log1p(jnp.exp(jnp.minimum(z, 20.0))) / 100.0
    return jnp.where(z > 20.0, x, sp)


def _embed_rows(x):
    # NeRF positional embedding (include_input); points on rows, features on last dim.
    parts = [x]
    for f in FREQS:
        parts.append(jnp.sin(f * x))
        parts.append(jnp.cos(f * x))
    return jnp.concatenate(parts, axis=-1)       # (..., 15)


# ----------------------------- hardware probes --------------------------------
def _num_tensorcores() -> int:
    """Best-effort per-chip TensorCore count (2 on v7x / megacore, else 1)."""
    try:
        info = pltpu.get_tpu_info()
        for attr in ("num_cores", "core_count", "num_tensorcores", "tensorcore_count"):
            v = getattr(info, attr, None)
            if isinstance(v, int) and v > 0:
                return v
    except Exception:
        pass
    try:
        d = jax.devices()[0]
        v = getattr(d, "num_cores", None)
        if isinstance(v, int) and v > 0:
            return v
        kind = d.device_kind.lower()
        if ("v7" in kind) or ("v4" in kind) or ("v5p" in kind):
            return 2
    except Exception:
        pass
    return 1


def _default_bf16_matmul() -> bool:
    """bf16 MXU operands by default on v6e/v7x; f32 elsewhere (v5e has no bf16 VPU)."""
    try:
        kind = jax.devices()[0].device_kind.lower()
    except Exception:
        return False
    return ("v6" in kind) or ("v7" in kind)


def _vmem_limit_bytes() -> int:
    """Explicit scoped-VMEM request: above v5e's 16 MiB default, below every
    generation's physical capacity (v7x is 64 MiB per TensorCore)."""
    try:
        cap = int(pltpu.get_tpu_info().vmem_capacity_bytes)
    except Exception:
        cap = 64 * 1024 * 1024
    if cap <= 0:
        cap = 64 * 1024 * 1024
    return int(min(64 * 1024 * 1024, max(32 * 1024 * 1024, cap // 2)))


# ----------------------------- kernel ----------------------------------------
def implicit_net_kernel(x_ref, c0_ref,
                        w0e_ref,
                        w1_ref, b1_ref,
                        w2_ref, b2_ref,
                        w3h_ref, w3e_ref, b3_ref,
                        w4_ref, b4_ref,
                        o_ref):
    # Feature-major: x is (3, tm), points on lanes.
    x = x_ref[...]

    parts = [x]
    for f in FREQS:
        parts.append(jnp.sin(f * x))
        parts.append(jnp.cos(f * x))
    emb = jnp.concatenate(parts, axis=0)                     # (15, tm) f32

    mxu_dtype = w0e_ref.dtype                                # f32 or bf16 (pre-cast weights)
    emb_m = emb.astype(mxu_dtype)

    def mm(w_ref, h):
        return jnp.dot(w_ref[...], h.astype(mxu_dtype),
                       preferred_element_type=jnp.float32)

    # l=0: cond concat + b0 pre-folded into the per-batch c0 table (64, 1).
    h = _softplus100(jnp.dot(w0e_ref[...], emb_m, preferred_element_type=jnp.float32)
                     + c0_ref[...])
    # l=1
    h = _softplus100(mm(w1_ref, h) + b1_ref[...])
    # l=2 (49-wide output kept as-is; padding would only add EUP work)
    h = _softplus100(mm(w2_ref, h) + b2_ref[...])
    # l=3: skip concat + 1/sqrt(2) folded into pre-scaled split weights.
    h = _softplus100(mm(w3h_ref, h)
                     + jnp.dot(w3e_ref[...], emb_m, preferred_element_type=jnp.float32)
                     + b3_ref[...])
    # l=4: no activation, always f32.  (16, tm) lane-dense store.
    o_ref[...] = (jnp.dot(w4_ref[...], h, preferred_element_type=jnp.float32)
                  + b4_ref[...]).astype(o_ref.dtype)


# ----------------------------- param prep -------------------------------------
def prepare_kernel_params(params, matmul_dtype=jnp.float32):
    """params: list of (W (out,in), b (out,)) in torch layout -> kernel arrays.
    MXU-operand weights are pre-cast to `matmul_dtype` once (no per-step casts);
    biases and the last layer stay f32."""
    (w0, b0), (w1, b1), (w2, b2), (w3, b3), (w4, b4) = [
        (jnp.asarray(w, jnp.float32), jnp.asarray(b, jnp.float32)) for (w, b) in params]

    inv_sqrt2 = np.float32(1.0 / np.sqrt(2.0))
    w0e = w0[:, :EMBED_DIM]                                  # (64, 15)
    w3h = w3[:, :H2_OUT] * inv_sqrt2                         # (64, 49)
    w3e = w3[:, H2_OUT:] * inv_sqrt2                         # (64, 15)

    def mx(w):
        return w.astype(matmul_dtype)

    def col(b):
        return b.reshape(-1, 1)

    return [mx(w0e),
            mx(w1), col(b1),
            mx(w2), col(b2),
            mx(w3h), mx(w3e), col(b3),
            w4, col(b4)]


def prepare_cond_table(params, cond_kps):
    """c0 = cond @ W0[:, 15:].T + b0  ->  (B, 64, 1) f32 (folds layer-0 cond matmul + b0)."""
    w0 = jnp.asarray(params[0][0], jnp.float32)
    b0 = jnp.asarray(params[0][1], jnp.float32)
    w0c = w0[:, EMBED_DIM:]                                  # (64, 12)
    c0 = cond_kps.astype(jnp.float32) @ w0c.T + b0[None, :]  # (B, 64)
    return c0[:, :, None]                                    # (B, 64, 1)


# ----------------------------- wrapper ----------------------------------------
def implicit_net_forward(x, cond_kps, params, *, tm=8192, use_bf16_matmul=None,
                         feature_major_output=False):
    """x: (B, N, 3) or (N, 3); cond_kps: (B, 12).
    Returns (B, N, 16) (torch layout), or (B, 16, N) if feature_major_output."""
    if x.ndim == 2:
        x = x[None]
    B, N, D = x.shape
    if B * N == 0:
        # Matches the PyTorch early-return (returns the raw (B, 0, d_in) input).
        return x

    if use_bf16_matmul is None:
        use_bf16_matmul = _default_bf16_matmul()
    matmul_dtype = jnp.bfloat16 if use_bf16_matmul else jnp.float32

    # Effective point tile: multiple of 128 lanes, as large as requested but not
    # over-padding small N.  Only on multi-TensorCore chips (v7x / megacore) do
    # we shrink it so every core gets at least one grid step.
    tm_req = _round_up(max(int(tm), 128), 128)
    tm_eff = min(tm_req, _round_up(N, 128))
    ncores = _num_tensorcores()
    if ncores > 1 and N >= 256:
        while B * _cdiv(N, tm_eff) < ncores and tm_eff > 128:
            tm_eff = _round_up(tm_eff // 2, 128)
    n_tiles = _cdiv(N, tm_eff)
    Npad = n_tiles * tm_eff

    # Feature-major x stream: (B, 3, Npad).  This 12 B/point transpose is the
    # only wrapper-side HBM pass on the input side.
    x_t = jnp.transpose(x.astype(jnp.float32), (0, 2, 1))
    if Npad != N:
        x_t = jnp.pad(x_t, ((0, 0), (0, 0), (0, Npad - N)))

    c0 = prepare_cond_table(params, cond_kps)                # (B, 64, 1)
    kparams = prepare_kernel_params(params, matmul_dtype)

    x_spec = pl.BlockSpec((None, D_IN, tm_eff), lambda b, i: (b, 0, i))
    c0_spec = pl.BlockSpec((None, HIDDEN, 1), lambda b, i: (b, 0, 0))

    def const_spec(shape):
        return pl.BlockSpec(shape, lambda b, i: (0,) * len(shape))

    in_specs = [x_spec, c0_spec] + [const_spec(tuple(p.shape)) for p in kparams]
    out_spec = pl.BlockSpec((None, OUT_DIM, tm_eff), lambda b, i: (b, 0, i))

    out_fm = pl.pallas_call(
        implicit_net_kernel,
        out_shape=jax.ShapeDtypeStruct((B, OUT_DIM, Npad), jnp.float32),
        grid_spec=pltpu.PrefetchScalarGridSpec(
            num_scalar_prefetch=0,
            grid=(B, n_tiles),
            in_specs=in_specs,
            out_specs=out_spec,
        ),
        compiler_params=pltpu.CompilerParams(
            dimension_semantics=("parallel", "parallel"),
            vmem_limit_bytes=_vmem_limit_bytes()),
    )(x_t, c0, *kparams)

    if feature_major_output:
        return out_fm[:, :, :N]                              # (B, 16, N), no extra transpose
    return jnp.transpose(out_fm[:, :, :N], (0, 2, 1))        # (B, N, 16), torch layout

# TODO(synk): ImplicitNet.gradient (autograd double-backward through forward) is not
# implemented here; only the forward pass is translated to Pallas.


# ----------------------------- param init (deterministic) ---------------------
def init_params(key):
    """'geometry' init mirroring the torch __init__; weights in torch (out, in) layout."""
    params = []
    num_layers = len(DIMS)
    for l, (in_dim, out_dim) in enumerate(LAYER_SHAPES):
        key, k1 = jax.random.split(key)
        if l == num_layers - 2:                               # last layer
            w = jax.random.normal(k1, (out_dim, in_dim)) * 1e-4 \
                + np.sqrt(np.pi) / np.sqrt(DIMS[l])
            b = jnp.full((out_dim,), -GEOM_BIAS)
        elif l == 0:                                          # multires > 0, first layer
            w = jnp.zeros((out_dim, in_dim))
            w = w.at[:, :3].set(jax.random.normal(k1, (out_dim, 3))
                                * np.sqrt(2.0) / np.sqrt(out_dim))
            b = jnp.zeros((out_dim,))
        elif l in SKIP_IN:                                    # skip layer
            w = jax.random.normal(k1, (out_dim, in_dim)) * np.sqrt(2.0) / np.sqrt(out_dim)
            w = w.at[:, -(DIMS[0] - 3):].set(0.0)
            b = jnp.zeros((out_dim,))
        else:
            w = jax.random.normal(k1, (out_dim, in_dim)) * np.sqrt(2.0) / np.sqrt(out_dim)
            b = jnp.zeros((out_dim,))
        params.append((jnp.asarray(w, jnp.float32), jnp.asarray(b, jnp.float32)))
    return params


def random_dense_params(key):
    """Dense random params (exercise cond / skip paths that geometry-init zeroes)."""
    params = []
    for (in_dim, out_dim) in LAYER_SHAPES:
        key, kw, kb = jax.random.split(key, 3)
        w = jax.random.normal(kw, (out_dim, in_dim), jnp.float32) / np.sqrt(in_dim)
        b = 0.1 * jax.random.normal(kb, (out_dim,), jnp.float32)
        params.append((w, b))
    return params


# ----------------------------- pure-JAX reference ------------------------------
def reference_forward(x, cond_kps, params):
    if x.ndim == 2:
        x = x[None]
    B, N, D = x.shape
    xf = x.reshape(B * N, D).astype(jnp.float32)
    cf = jnp.broadcast_to(cond_kps[:, None, :].astype(jnp.float32),
                          (B, N, COND_DIM)).reshape(B * N, COND_DIM)
    emb = _embed_rows(xf)
    h = emb
    for l, (w, b) in enumerate(params):
        if l == 0:
            h = jnp.concatenate([h, cf], axis=-1)
        if l in SKIP_IN:
            h = jnp.concatenate([h, emb], axis=-1) / np.sqrt(2.0)
        h = h @ jnp.asarray(w, jnp.float32).T + jnp.asarray(b, jnp.float32)
        if l < len(params) - 1:
            h = _softplus100(h)
    return h.reshape(B, N, OUT_DIM)


# ----------------------------- main -------------------------------------------
if __name__ == "__main__":
    key = jax.random.PRNGKey(0)
    kp, kq, kx, kc = jax.random.split(key, 4)

    B, N = 2, 200
    x = jax.random.normal(kx, (B, N, D_IN), dtype=jnp.float32)
    cond_kps = jax.random.normal(kc, (B, COND_DIM), dtype=jnp.float32)

    # 0) empty-input early return (matches the torch forward)
    out_e = implicit_net_forward(jnp.zeros((B, 0, D_IN), jnp.float32), cond_kps,
                                 random_dense_params(kq))
    assert out_e.shape == (B, 0, D_IN)

    # 1) faithful geometry init, f32 matmuls (tight parity with the f32 reference)
    params_geo = init_params(kp)
    out = implicit_net_forward(x, cond_kps, params_geo, use_bf16_matmul=False)
    out = jax.block_until_ready(out)
    ref = reference_forward(x, cond_kps, params_geo)
    np.testing.assert_allclose(np.asarray(out), np.asarray(ref), atol=2e-3, rtol=2e-3)
    assert out.shape == (B, N, OUT_DIM)

    # 2) dense random params, small tile -> multi-tile grid (2 batches x 2 tiles)
    params_rnd = random_dense_params(kq)
    out2 = implicit_net_forward(x, cond_kps, params_rnd, tm=128, use_bf16_matmul=False)
    out2 = jax.block_until_ready(out2)
    ref2 = reference_forward(x, cond_kps, params_rnd)
    np.testing.assert_allclose(np.asarray(out2), np.asarray(ref2), atol=2e-3, rtol=2e-3)

    # 3) bf16-MXU fast path (default on v6e/v7x) -- smoke test with loose tolerance
    out3 = implicit_net_forward(x, cond_kps, params_rnd, use_bf16_matmul=True)
    out3 = jax.block_until_ready(out3)
    out3_np = np.asarray(out3)
    assert np.isfinite(out3_np).all()
    err = float(np.max(np.abs(out3_np - np.asarray(ref2))))
    assert err < 0.25, f"bf16 MXU path deviates too much from f32 reference: {err}"

    print("KERNEL_OK")
</pallas_src>

<mosaic_0001>
module attributes {stable_mosaic.version = 11 : i64} {
  func.func @implicit_net_kernel(%arg0: i32, %arg1: i32, %arg2: memref<1x3x256xf32, #tpu.memory_space<vmem>>, %arg3: memref<1x64x1xf32, #tpu.memory_space<vmem>>, %arg4: memref<64x15xf32, #tpu.memory_space<vmem>>, %arg5: memref<64x64xf32, #tpu.memory_space<vmem>>, %arg6: memref<64x1xf32, #tpu.memory_space<vmem>>, %arg7: memref<49x64xf32, #tpu.memory_space<vmem>>, %arg8: memref<49x1xf32, #tpu.memory_space<vmem>>, %arg9: memref<64x49xf32, #tpu.memory_space<vmem>>, %arg10: memref<64x15xf32, #tpu.memory_space<vmem>>, %arg11: memref<64x1xf32, #tpu.memory_space<vmem>>, %arg12: memref<16x64xf32, #tpu.memory_space<vmem>>, %arg13: memref<16x1xf32, #tpu.memory_space<vmem>>, %arg14: memref<1x16x256xf32, #tpu.memory_space<vmem>>) attributes {dimension_semantics = [#tpu.dimension_semantics<parallel>, #tpu.dimension_semantics<parallel>], iteration_bounds = array<i64: 2, 1>, scalar_prefetch = 0 : i64, scratch_operands = 0 : i64, tpu.core_type = #tpu.core_type<tc>, window_params = [{transform_indices = @transform_0, window_bounds = array<i64: 1, 3, 256>}, {transform_indices = @transform_1, window_bounds = array<i64: 1, 64, 1>}, {pipeline_mode = #tpu.pipeline_mode<synchronous>, transform_indices = @transform_2, window_bounds = array<i64: 64, 15>}, {pipeline_mode = #tpu.pipeline_mode<synchronous>, transform_indices = @transform_3, window_bounds = array<i64: 64, 64>}, {pipeline_mode = #tpu.pipeline_mode<synchronous>, transform_indices = @transform_4, window_bounds = array<i64: 64, 1>}, {pipeline_mode = #tpu.pipeline_mode<synchronous>, transform_indices = @transform_5, window_bounds = array<i64: 49, 64>}, {pipeline_mode = #tpu.pipeline_mode<synchronous>, transform_indices = @transform_6, window_bounds = array<i64: 49, 1>}, {pipeline_mode = #tpu.pipeline_mode<synchronous>, transform_indices = @transform_7, window_bounds = array<i64: 64, 49>}, {pipeline_mode = #tpu.pipeline_mode<synchronous>, transform_indices = @transform_8, window_bounds = array<i64: 64, 15>}, {pipeline_mode = #tpu.pipeline_mode<synchronous>, transform_indices = @transform_9, window_bounds = array<i64: 64, 1>}, {pipeline_mode = #tpu.pipeline_mode<synchronous>, transform_indices = @transform_10, window_bounds = array<i64: 16, 64>}, {pipeline_mode = #tpu.pipeline_mode<synchronous>, transform_indices = @transform_11, window_bounds = array<i64: 16, 1>}, {transform_indices = @transform_12, window_bounds = array<i64: 1, 16, 256>}]} {
    %c0 = arith.constant 0 : index
    %c0_0 = arith.constant 0 : index
    %c0_1 = arith.constant 0 : index
    %0 = vector.load %arg2[%c0, %c0_0, %c0_1] : memref<1x3x256xf32, #tpu.memory_space<vmem>>, vector<1x3x256xf32>
    %1 = vector.shape_cast %0 : vector<1x3x256xf32> to vector<3x256xf32>
    %cst = arith.constant 1.000000e+00 : f32
    %2 = vector.broadcast %cst : f32 to vector<3x256xf32>
    %3 = arith.mulf %2, %1 : vector<3x256xf32>
    %4 = math.sin %3 : vector<3x256xf32>
    %cst_2 = arith.constant 1.000000e+00 : f32
    %5 = vector.broadcast %cst_2 : f32 to vector<3x256xf32>
    %6 = arith.mulf %5, %1 : vector<3x256xf32>
    %7 = math.cos %6 : vector<3x256xf32>
    %cst_3 = arith.constant 2.000000e+00 : f32
    %8 = vector.broadcast %cst_3 : f32 to vector<3x256xf32>
    %9 = arith.mulf %8, %1 : vector<3x256xf32>
    %10 = math.sin %9 : vector<3x256xf32>
    %cst_4 = arith.constant 2.000000e+00 : f32
    %11 = vector.broadcast %cst_4 : f32 to vector<3x256xf32>
    %12 = arith.mulf %11, %1 : vector<3x256xf32>
    %13 = math.cos %12 : vector<3x256xf32>
    %14 = tpu.concatenate %1, %4, %7, %10, %13 in 0 : vector<3x256xf32>, vector<3x256xf32>, vector<3x256xf32>, vector<3x256xf32>, vector<3x256xf32> -> vector<15x256xf32>
    %c0_5 = arith.constant 0 : index
    %c0_6 = arith.constant 0 : index
    %15 = vector.load %arg4[%c0_5, %c0_6] : memref<64x15xf32, #tpu.memory_space<vmem>>, vector<64x15xf32>
    %cst_7 = arith.constant dense<0.000000e+00> : vector<64x256xf32>
    %16 = tpu.matmul %15, %14, %cst_7 {dimension_numbers = #tpu.dot_dimension_numbers<[1], [0], [0], [1], [0, 0, 1, 1], [], []>} : vector<64x15xf32>, vector<15x256xf32>, vector<64x256xf32> -> vector<64x256xf32>
    %c0_8 = arith.constant 0 : index
    %c0_9 = arith.constant 0 : index
    %c0_10 = arith.constant 0 : index
    %17 = vector.load %arg3[%c0_8, %c0_9, %c0_10] : memref<1x64x1xf32, #tpu.memory_space<vmem>>, vector<1x64x1xf32>
    %18 = vector.shape_cast %17 : vector<1x64x1xf32> to vector<64x1xf32>
    %19 = vector.broadcast %18 : vector<64x1xf32> to vector<64x256xf32>
    %20 = arith.addf %16, %19 : vector<64x256xf32>
    %cst_11 = arith.constant 1.000000e+02 : f32
    %21 = vector.broadcast %cst_11 : f32 to vector<64x256xf32>
    %22 = arith.mulf %21, %20 : vector<64x256xf32>
    %cst_12 = arith.constant 2.000000e+01 : f32
    %23 = vector.broadcast %cst_12 : f32 to vector<64x256xf32>
    %24 = arith.minimumf %22, %23 : vector<64x256xf32>
    %25 = math.exp %24 : vector<64x256xf32>
    %26 = math.log1p %25 : vector<64x256xf32>
    %cst_13 = arith.constant 1.000000e+02 : f32
    %27 = vector.broadcast %cst_13 : f32 to vector<64x256xf32>
    %28 = arith.divf %26, %27 : vector<64x256xf32>
    %cst_14 = arith.constant 2.000000e+01 : f32
    %29 = vector.broadcast %cst_14 : f32 to vector<64x256xf32>
    %30 = arith.cmpf ogt, %22, %29 : vector<64x256xf32>
    %31 = arith.select %30, %20, %28 : vector<64x256xi1>, vector<64x256xf32>
    %c0_15 = arith.constant 0 : index
    %c0_16 = arith.constant 0 : index
    %32 = vector.load %arg5[%c0_15, %c0_16] : memref<64x64xf32, #tpu.memory_space<vmem>>, vector<64x64xf32>
    %cst_17 = arith.constant dense<0.000000e+00> : vector<64x256xf32>
    %33 = tpu.matmul %32, %31, %cst_17 {dimension_numbers = #tpu.dot_dimension_numbers<[1], [0], [0], [1], [0, 0, 1, 1], [], []>} : vector<64x64xf32>, vector<64x256xf32>, vector<64x256xf32> -> vector<64x256xf32>
    %c0_18 = arith.constant 0 : index
    %c0_19 = arith.constant 0 : index
    %34 = vector.load %arg6[%c0_18, %c0_19] : memref<64x1xf32, #tpu.memory_space<vmem>>, vector<64x1xf32>
    %35 = vector.broadcast %34 : vector<64x1xf32> to vector<64x256xf32>
    %36 = arith.addf %33, %35 : vector<64x256xf32>
    %cst_20 = arith.constant 1.000000e+02 : f32
    %37 = vector.broadcast %cst_20 : f32 to vector<64x256xf32>
    %38 = arith.mulf %37, %36 : vector<64x256xf32>
    %cst_21 = arith.constant 2.000000e+01 : f32
    %39 = vector.broadcast %cst_21 : f32 to vector<64x256xf32>
    %40 = arith.minimumf %38, %39 : vector<64x256xf32>
    %41 = math.exp %40 : vector<64x256xf32>
    %42 = math.log1p %41 : vector<64x256xf32>
    %cst_22 = arith.constant 1.000000e+02 : f32
    %43 = vector.broadcast %cst_22 : f32 to vector<64x256xf32>
    %44 = arith.divf %42, %43 : vector<64x256xf32>
    %cst_23 = arith.constant 2.000000e+01 : f32
    %45 = vector.broadcast %cst_23 : f32 to vector<64x256xf32>
    %46 = arith.cmpf ogt, %38, %45 : vector<64x256xf32>
    %47 = arith.select %46, %36, %44 : vector<64x256xi1>, vector<64x256xf32>
    %c0_24 = arith.constant 0 : index
    %c0_25 = arith.constant 0 : index
    %48 = vector.load %arg7[%c0_24, %c0_25] : memref<49x64xf32, #tpu.memory_space<vmem>>, vector<49x64xf32>
    %cst_26 = arith.constant dense<0.000000e+00> : vector<49x256xf32>
    %49 = tpu.matmul %48, %47, %cst_26 {dimension_numbers = #tpu.dot_dimension_numbers<[1], [0], [0], [1], [0, 0, 1, 1], [], []>} : vector<49x64xf32>, vector<64x256xf32>, vector<49x256xf32> -> vector<49x256xf32>
    %c0_27 = arith.constant 0 : index
    %c0_28 = arith.constant 0 : index
    %50 = vector.load %arg8[%c0_27, %c0_28] : memref<49x1xf32, #tpu.memory_space<vmem>>, vector<49x1xf32>
    %51 = vector.broadcast %50 : vector<49x1xf32> to vector<49x256xf32>
    %52 = arith.addf %49, %51 : vector<49x256xf32>
    %cst_29 = arith.constant 1.000000e+02 : f32
    %53 = vector.broadcast %cst_29 : f32 to vector<49x256xf32>
    %54 = arith.mulf %53, %52 : vector<49x256xf32>
    %cst_30 = arith.constant 2.000000e+01 : f32
    %55 = vector.broadcast %cst_30 : f32 to vector<49x256xf32>
    %56 = arith.minimumf %54, %55 : vector<49x256xf32>
    %57 = math.exp %56 : vector<49x256xf32>
    %58 = math.log1p %57 : vector<49x256xf32>
    %cst_31 = arith.constant 1.000000e+02 : f32
    %59 = vector.broadcast %cst_31 : f32 to vector<49x256xf32>
    %60 = arith.divf %58, %59 : vector<49x256xf32>
    %cst_32 = arith.constant 2.000000e+01 : f32
    %61 = vector.broadcast %cst_32 : f32 to vector<49x256xf32>
    %62 = arith.cmpf ogt, %54, %61 : vector<49x256xf32>
    %63 = arith.select %62, %52, %60 : vector<49x256xi1>, vector<49x256xf32>
    %c0_33 = arith.constant 0 : index
    %c0_34 = arith.constant 0 : index
    %64 = vector.load %arg9[%c0_33, %c0_34] : memref<64x49xf32, #tpu.memory_space<vmem>>, vector<64x49xf32>
    %cst_35 = arith.constant dense<0.000000e+00> : vector<64x256xf32>
    %65 = tpu.matmul %64, %63, %cst_35 {dimension_numbers = #tpu.dot_dimension_numbers<[1], [0], [0], [1], [0, 0, 1, 1], [], []>} : vector<64x49xf32>, vector<49x256xf32>, vector<64x256xf32> -> vector<64x256xf32>
    %c0_36 = arith.constant 0 : index
    %c0_37 = arith.constant 0 : index
    %66 = vector.load %arg10[%c0_36, %c0_37] : memref<64x15xf32, #tpu.memory_space<vmem>>, vector<64x15xf32>
    %cst_38 = arith.constant dense<0.000000e+00> : vector<64x256xf32>
    %67 = tpu.matmul %66, %14, %cst_38 {dimension_numbers = #tpu.dot_dimension_numbers<[1], [0], [0], [1], [0, 0, 1, 1], [], []>} : vector<64x15xf32>, vector<15x256xf32>, vector<64x256xf32> -> vector<64x256xf32>
    %68 = arith.addf %65, %67 : vector<64x256xf32>
    %c0_39 = arith.constant 0 : index
    %c0_40 = arith.constant 0 : index
    %69 = vector.load %arg11[%c0_39, %c0_40] : memref<64x1xf32, #tpu.memory_space<vmem>>, vector<64x1xf32>
    %70 = vector.broadcast %69 : vector<64x1xf32> to vector<64x256xf32>
    %71 = arith.addf %68, %70 : vector<64x256xf32>
    %cst_41 = arith.constant 1.000000e+02 : f32
    %72 = vector.broadcast %cst_41 : f32 to vector<64x256xf32>
    %73 = arith.mulf %72, %71 : vector<64x256xf32>
    %cst_42 = arith.constant 2.000000e+01 : f32
    %74 = vector.broadcast %cst_42 : f32 to vector<64x256xf32>
    %75 = arith.minimumf %73, %74 : vector<64x256xf32>
    %76 = math.exp %75 : vector<64x256xf32>
    %77 = math.log1p %76 : vector<64x256xf32>
    %cst_43 = arith.constant 1.000000e+02 : f32
    %78 = vector.broadcast %cst_43 : f32 to vector<64x256xf32>
    %79 = arith.divf %77, %78 : vector<64x256xf32>
    %cst_44 = arith.constant 2.000000e+01 : f32
    %80 = vector.broadcast %cst_44 : f32 to vector<64x256xf32>
    %81 = arith.cmpf ogt, %73, %80 : vector<64x256xf32>
    %82 = arith.select %81, %71, %79 : vector<64x256xi1>, vector<64x256xf32>
    %c0_45 = arith.constant 0 : index
    %c0_46 = arith.constant 0 : index
    %83 = vector.load %arg12[%c0_45, %c0_46] : memref<16x64xf32, #tpu.memory_space<vmem>>, vector<16x64xf32>
    %cst_47 = arith.constant dense<0.000000e+00> : vector<16x256xf32>
    %84 = tpu.matmul %83, %82, %cst_47 {dimension_numbers = #tpu.dot_dimension_numbers<[1], [0], [0], [1], [0, 0, 1, 1], [], []>} : vector<16x64xf32>, vector<64x256xf32>, vector<16x256xf32> -> vector<16x256xf32>
    %c0_48 = arith.constant 0 : index
    %c0_49 = arith.constant 0 : index
    %85 = vector.load %arg13[%c0_48, %c0_49] : memref<16x1xf32, #tpu.memory_space<vmem>>, vector<16x1xf32>
    %86 = vector.broadcast %85 : vector<16x1xf32> to vector<16x256xf32>
    %87 = arith.addf %84, %86 : vector<16x256xf32>
    %c0_50 = arith.constant 0 : index
    %c0_51 = arith.constant 0 : index
    %c0_52 = arith.constant 0 : index
    %88 = vector.load %arg14[%c0_50, %c0_51, %c0_52] : memref<1x16x256xf32, #tpu.memory_space<vmem>>, vector<1x16x256xf32>
    %89 = vector.shape_cast %88 : vector<1x16x256xf32> to vector<16x256xf32>
    %90 = vector.shape_cast %87 : vector<16x256xf32> to vector<1x16x256xf32>
    tpu.vector_store %arg14[%c0_50, %c0_51, %c0_52], %90 {strides = array<i32>} : memref<1x16x256xf32, #tpu.memory_space<vmem>>, vector<1x16x256xf32>,
    return
  }
  func.func @transform_0(%arg0: i32, %arg1: i32) -> (i32, i32, i32) {
    %c0_i32 = arith.constant 0 : i32
    %c0_i32_0 = arith.constant 0 : i32
    return %arg0, %c0_i32, %arg1 : i32, i32, i32
  }
  func.func @transform_1(%arg0: i32, %arg1: i32) -> (i32, i32, i32) {
    %c0_i32 = arith.constant 0 : i32
    %c0_i32_0 = arith.constant 0 : i32
    %c0_i32_1 = arith.constant 0 : i32
    return %arg0, %c0_i32, %c0_i32_0 : i32, i32, i32
  }
  func.func @transform_2(%arg0: i32, %arg1: i32) -> (i32, i32) {
    %c0_i32 = arith.constant 0 : i32
    %c0_i32_0 = arith.constant 0 : i32
    %c0_i32_1 = arith.constant 0 : i32
    return %c0_i32, %c0_i32_0 : i32, i32
  }
  func.func @transform_3(%arg0: i32, %arg1: i32) -> (i32, i32) {
    %c0_i32 = arith.constant 0 : i32
    %c0_i32_0 = arith.constant 0 : i32
    %c0_i32_1 = arith.constant 0 : i32
    return %c0_i32, %c0_i32_0 : i32, i32
  }
  func.func @transform_4(%arg0: i32, %arg1: i32) -> (i32, i32) {
    %c0_i32 = arith.constant 0 : i32
    %c0_i32_0 = arith.constant 0 : i32
    %c0_i32_1 = arith.constant 0 : i32
    return %c0_i32, %c0_i32_0 : i32, i32
  }
  func.func @transform_5(%arg0: i32, %arg1: i32) -> (i32, i32) {
    %c0_i32 = arith.constant 0 : i32
    %c0_i32_0 = arith.constant 0 : i32
    %c0_i32_1 = arith.constant 0 : i32
    return %c0_i32, %c0_i32_0 : i32, i32
  }
  func.func @transform_6(%arg0: i32, %arg1: i32) -> (i32, i32) {
    %c0_i32 = arith.constant 0 : i32
    %c0_i32_0 = arith.constant 0 : i32
    %c0_i32_1 = arith.constant 0 : i32
    return %c0_i32, %c0_i32_0 : i32, i32
  }
  func.func @transform_7(%arg0: i32, %arg1: i32) -> (i32, i32) {
    %c0_i32 = arith.constant 0 : i32
    %c0_i32_0 = arith.constant 0 : i32
    %c0_i32_1 = arith.constant 0 : i32
    return %c0_i32, %c0_i32_0 : i32, i32
  }
  func.func @transform_8(%arg0: i32, %arg1: i32) -> (i32, i32) {
    %c0_i32 = arith.constant 0 : i32
    %c0_i32_0 = arith.constant 0 : i32
    %c0_i32_1 = arith.constant 0 : i32
    return %c0_i32, %c0_i32_0 : i32, i32
  }
  func.func @transform_9(%arg0: i32, %arg1: i32) -> (i32, i32) {
    %c0_i32 = arith.constant 0 : i32
    %c0_i32_0 = arith.constant 0 : i32
    %c0_i32_1 = arith.constant 0 : i32
    return %c0_i32, %c0_i32_0 : i32, i32
  }
  func.func @transform_10(%arg0: i32, %arg1: i32) -> (i32, i32) {
    %c0_i32 = arith.constant 0 : i32
    %c0_i32_0 = arith.constant 0 : i32
    %c0_i32_1 = arith.constant 0 : i32
    return %c0_i32, %c0_i32_0 : i32, i32
  }
  func.func @transform_11(%arg0: i32, %arg1: i32) -> (i32, i32) {
    %c0_i32 = arith.constant 0 : i32
    %c0_i32_0 = arith.constant 0 : i32
    %c0_i32_1 = arith.constant 0 : i32
    return %c0_i32, %c0_i32_0 : i32, i32
  }
  func.func @transform_12(%arg0: i32, %arg1: i32) -> (i32, i32, i32) {
    %c0_i32 = arith.constant 0 : i32
    %c0_i32_0 = arith.constant 0 : i32
    return %arg0, %c0_i32, %arg1 : i32, i32, i32
  }
}

</mosaic_0001>

<bundles_post_ra>
// kernel: tpu_custom_call.1
= control target key start
LH: loop header
LB: loop body
LE: loop exit
PB: predicated region body
PF: predicated region fallthrough
CT: control target
= control target key end

     0   :  { %s5479_s0 = inlined_call_operand.vmem [shape: f32[2,3,256], index: 0, kind: input, shape index: {}]   ;;  %s5480_s1 = inlined_call_operand.vmem [shape: f32[2,64,1], index: 1, kind: input, shape index: {}]   ;;  %s5481_s2 = inlined_call_operand.vmem [shape: f32[64,15], index: 2, kind: input, shape index: {}]   ;;  %s5482_s3 = inlined_call_operand.vmem [shape: f32[64,64], index: 3, kind: input, shape index: {}]   ;;  %s5483_s4 = inlined_call_operand.vmem [shape: f32[64,1], index: 4, kind: input, shape index: {}]   ;;  %s5484_s5 = inlined_call_operand.vmem [shape: f32[49,64], index: 5, kind: input, shape index: {}]   ;;  %s5485_s6 = inlined_call_operand.vmem [shape: f32[49,1], index: 6, kind: input, shape index: {}]   ;;  %s5486_s7 = inlined_call_operand.vmem [shape: f32[64,49], index: 7, kind: input, shape index: {}]   ;;  %s5487_s8 = inlined_call_operand.vmem [shape: f32[64,15], index: 8, kind: input, shape index: {}]   ;;  %s5488_s9 = inlined_call_operand.vmem [shape: f32[64,1], index: 9, kind: input, shape index: {}]   ;;  %s5489_s10 = inlined_call_operand.vmem [shape: f32[16,64], index: 10, kind: input, shape index: {}]   ;;  %s5490_s11 = inlined_call_operand.vmem [shape: f32[16,1], index: 11, kind: input, shape index: {}]   ;;  %s5491_s12 = inlined_call_operand.hbm [shape: f32[2,16,256], index: 12, kind: output, shape index: {}]  }
   0x1   :  { %5496 = sst [smem:[#allocation6_spill]] %s5479_s0 }
   0x2   :  { %5497 = sst [smem:[#allocation7_spill]] %s5480_s1 }
   0x3   :  { %17 = vsyncpa [#allocation3], 0 }
   0x4   :  { %19 = vsyncpa [#allocation3 + $0x1], 0  ;;  %s3716_s21 = smov 0   ;;  %s3718_s22 = smov 0  }
   0x5   :  { %s3720_s23 = smov 0   ;;  %s3722_s24 = smov 0  }
   0x6   :  { %s3724_s25 = smov 0   ;;  %s3726_s26 = smov 0  }
   0x7 LB: > { %s3049_s27 = sadd.s32 4294967295, %s3637_s26   ;;  %s3050_s28 = sadd.s32 4294967294, %s3637_s26   ;;  %s3637_s26 = sphi %s3726_s26, %s25_s26   ;;  %s3633_s25 = sphi %s3724_s25, %s5601_s25   ;;  %s3629_s24 = sphi %s3722_s24, %s5600_s24   ;;  %s3625_s23 = sphi %s3720_s23, %s5599_s23   ;;  %s3621_s22 = sphi %s3718_s22, %s5598_s22   ;;  %s3617_s21 = sphi %s3716_s21, %s5597_s21  }
   0x8   : > { %s37_s29 = sadd.s32 1, %s3633_s25  ;;  %s310_s30 = sadd.s32 1, %s3625_s23 }
   0x9   : > { %p39_p0 = scmp.ge.s32.totalorder %s37_s29, 2  ;;  %p320_p1 = scmp.ne.s32.totalorder %s3625_s23, %s3621_s22 }
   0xa   : > { %p321_p2 = scmp.eq.s32.totalorder %s3049_s27, 1  ;;  %p326_p3 = scmp.ne.s32.totalorder %s3621_s22, %s3617_s21 }
   0xb   : > { %s5603_s29 = smov (%p39_p0, %s37_s29), 0  ;;  %p327_p5 = scmp.eq.s32.totalorder %s3050_s28, 1 }
   0xc   : > { %5498 = sst [smem:[#allocation5_spill]] %s5603_s29  ;;  %p3756_p4 = por %p321_p2, %p320_p1 }
   0xd   : > { %s305_s14 = ssub.s32 %s3633_s25, %s5603_s29  ;;  %p3053_p6 = scmp.ge.s32.totalorder %s3637_s26, 1 }
   0xe   : > { %p308_p7 = scmp.eq.s32.totalorder %s305_s14, 0  ;;  %p3763_p8 = por %p327_p5, %p326_p3 }
   0xf   : > { %p396_p9 = scmp.lt.s32.totalorder %s3637_s26, 3 }
  0x10   : > { %s3769_s16 = scalar_select %p308_p7, %s3625_s23, %s310_s30  }
  0x11   : > { %p397_p10 = pnand %p3053_p6, %p396_p9 }
  0x12   : > { %p448_p11 = scmp.lt.s32.totalorder (!%p397_p10), %s3629_s24, 1  ;;  %v5493_v0 = vmov (!%p397_p10), 0.0   ;;  %s5501_s0 = sld [smem:[#allocation6_spill]] (!%p397_p10)  ;;  %v3640_v6 = vmov (!%p397_p10), 0   ;;  %v3641_v28 = vmov (!%p397_p10), 683565275  }
  0x13   : > { %400 = sbr.rel (%p397_p10) target bundleno = 1560 (0x618), region = 68  ;;  %1067 = vmatprep.mubr.f32.mxu0 (!%p397_p10), %v5493_v0  ;;  %1548 = vmatprep.mubr.f32.mxu1 (!%p397_p10), %v5493_v0  ;;  %s5502_s1 = sld [smem:[#allocation7_spill]] (!%p397_p10)  ;;  %v3642_v30 = vmov (!%p397_p10), 2475754826   ;;  %v3643_v32 = vmov (!%p397_p10), 2131351028  }
  0x14   : > { %3300 = vset.pattern.permute.xlu0 (!%p397_p10), %v3640_v6  ;;  %3301 = vset.pattern.permute.xlu1 (!%p397_p10), %v3640_v6  ;;  %v3644_v35 = vmov (!%p397_p10), 2102212464   ;;  %v3645_v37 = vmov (!%p397_p10), 920167782   ;;  %v3646_v45 = vmov (!%p397_p10), 1326507024  }
  0x15   : > { %v1381_v56 = vld [vmem:[%s5483_s4] sm:$0xff] (!%p397_p10) }
  0x1a   : > { %s449_s17 = scalar_select %p448_p11, %s3629_s24, 1 }
  0x1c   : > { %s3127_s18 = sshll.u32 %s449_s17, 3  ;;  %s3128_s28 = sshll.u32 %s449_s17, 6 }
  0x1d   : > { %s455_s27 = scalar_lea.vmem %s5501_s0, %s3127_s18  ;;  %s3788_s29 = scalar_lea.vmem %s5502_s1, %s3128_s28 }
  0x1e   : > { %v3778_v1 = vld [vmem:[%s455_s27] sm:$0x77]  ;;  %v924_v13 = vld [vmem:[%s3788_s29 + $0x8] sm:$0xff]  ;;  %v925_v15 = vld [vmem:[%s3788_s29 + $0x10] sm:$0xff]  ;;  %s444_s28 = sand.u32 1, %s3621_s22   ;;  %s3129_s18 = sshll.u32 %s3629_s24, 9 }
  0x1f   : > { %v464_v2 = vand.u32 2147483647, %v3778_v1  ;;  %v467_v3 = vand.u32 2139095040, %v3778_v1  ;;  %v3783_v4 = vmul.f32 2.0, %v3778_v1  ;;  %v923_v10 = vld [vmem:[%s3788_s29] sm:$0xff]  ;;  %943 = vperm.xlu1 %3301, %v925_v15   ;;  %v926_v19 = vld [vmem:[%s3788_s29 + $0x18] sm:$0xff]  ;;  %s5431_s20 = scalar_lea.hbm %s5491_s12, %s3129_s18 }
  0x20   : > { %933 = vperm.xlu0 %3300, %v923_v10   ;;  %v927_v22 = vld [vmem:[%s3788_s29 + $0x20] sm:$0xff]  ;;  %v928_v34 = vld [vmem:[%s3788_s29 + $0x28] sm:$0xff]  ;;  %v929_v39 = vld [vmem:[%s3788_s29 + $0x30] sm:$0xff]  ;;  %vm466_vm14 = vcmp.lt.s32.totalorder %v3778_v1, 0  ;;  %s3054_s30 = sshll.u32 %s444_s28, 5  ;;  %s5433_s27 = scalar_lea.sflag [#allocation3], %s444_s28 }
  0x21   : > { %v468_v5 = vshrl.u32 %v467_v3, 23  ;;  %v471_v7 = vand.u32 8388607, %v464_v2  ;;  %v672_v8 = vand.u32 2147483647, %v3783_v4  ;;  %v675_v9 = vand.u32 2139095040, %v3783_v4 }
  0x22   : > { %v930_v51 = vld [vmem:[%s3788_s29 + $0x38] sm:$0xff]  ;;  %v1382_v10 = vld [vmem:[%s5483_s4 + $0x8] sm:$0xff]  ;;  %v1383_v15 = vld [vmem:[%s5483_s4 + $0x10] sm:$0xff]  ;;  %vm465_vm15 = vcmp.le.f32.partialorder %v464_v2, 0.7853982  ;;  %s446_s14 = scalar_lea.vmem [#allocation2], %s3054_s30 }
  0x23   : > { %v3059_v11 = vadd.s32 4294967169, %v468_v5  ;;  %v676_v12 = vshrl.u32 %v675_v9, 23  ;;  %v472_v16 = vor.u32 8388608, %v471_v7  ;;  %v3799_v18 = vand.u32 8388607, %v672_v8  ;;  %948 = vperm.xlu1 %3301, %v926_v19   ;;  %v2843_v2 = vld [vmem:[%s5490_s11] sm:$0xff] }
  0x24   : > { %938 = vperm.xlu0 %3300, %v924_v13   ;;  %s2958_s17 = sshll.u32 %s446_s14, 4  ;;  %s3648_s30 = smov [#allocation2]   ;;  %s5426_s17 = int_to_ptr.vmem [resolvable:$true] %s2958_s17 }
  0x25   : > { %v474_v14 = vadd.s32 1, %v3059_v11  ;;  %v3067_v17 = vadd.s32 4294967169, %v676_v12  ;;  %v3803_v25 = vshll.u32 %v472_v16, 8  ;;  %v680_v26 = vor.u32 8388608, %v3799_v18  ;;  %v1386_v18 = vld [vmem:[%s5483_s4 + $0x28] sm:$0xff]  ;;  %s3559_s24 = scalar_lea.vmem %s5426_s17, 512 }
  0x26   : > { %p3560_p12 = scmp.ne.s32.totalorder %s5426_s17, %s3559_s24  ;;  %s3563_s0 = sshll.u32 %s3648_s30, 4  ;;  %s3564_s0 = int_to_ptr.vmem [resolvable:$false] %s3563_s0 }
  0x27   : > { %vm475_vm0 = vcmp.gt.s32.totalorder %v474_v14, 0  ;;  %v682_v21 = vadd.s32 1, %v3067_v17  ;;  %958 = vperm.xlu1 %3301, %v928_v34   ;;  %s3565_s1 = scalar_lea.vmem %s3564_s0, 1024  ;;  %p3566_p1 = scmp.lt.s32.totalorder %s5426_s17, %s3564_s0 }
  0x28   : > { %v476_v20 = vsel %vm475_vm0, %v474_v14, 0  ;;  %953 = vperm.xlu0 %3300, %v927_v22   ;;  %vm674_vm0 = vcmp.lt.s32.totalorder %v3783_v4, 0  ;;  %p3561_p13 = pnand %p3560_p12, %p3756_p4  ;;  %p3567_p2 = scmp.lt.s32.totalorder %s3565_s1, %s3559_s24 }
  0x29   : > { %v477_v23 = vshrl.u32 %v476_v20, 5  ;;  %v478_v24 = vand.u32 31, %v476_v20  ;;  %vm683_vm1 = vcmp.gt.s32.totalorder %v682_v21, 0 }
  0x2a   : > { %v684_v50 = vsel %vm683_vm1, %v682_v21, 0  ;;  %vm673_vm1 = vcmp.le.f32.partialorder %v672_v8, 0.7853982  ;;  %p3562_p0 = pneg %p3561_p13  ;;  %p3568_p3 = por %p3567_p2, %p3566_p1 }
  0x2b   : > { %v479_v27 = vsub.s32 32, %v478_v24  ;;  %v481_v29 = vshll.u32 %v3641_v28, %v478_v24  ;;  %v484_v31 = vshll.u32 %v3642_v30, %v478_v24  ;;  %v487_v33 = vshll.u32 %v3643_v32, %v478_v24  ;;  %968 = vperm.xlu1 %3301, %v930_v51  }
  0x2c   : > { %v490_v36 = vshll.u32 %v3644_v35, %v478_v24  ;;  %v493_v38 = vshll.u32 %v3645_v37, %v478_v24  ;;  %vm496_vm2 = vcmp.lt.s32.totalorder %v477_v23, 1  ;;  %vm497_vm3 = vcmp.lt.s32.totalorder %v477_v23, 2  ;;  %963 = vperm.xlu0 %3300, %v929_v39   ;;  %p3569_p5 = pnand %p3568_p3, %p3562_p0 }
  0x2d   : > { %v480_v40 = vshrl.u32 %v3641_v28, %v479_v27  ;;  %v482_v41 = vshrl.u32 %v3642_v30, %v479_v27  ;;  %v485_v42 = vshrl.u32 %v3643_v32, %v479_v27  ;;  %v488_v43 = vshrl.u32 %v3644_v35, %v479_v27 }
  0x2e   : > { %v491_v44 = vshrl.u32 %v3645_v37, %v479_v27  ;;  %v494_v46 = vshrl.u32 %v3646_v45, %v479_v27  ;;  %vm498_vm4 = vcmp.lt.s32.totalorder %v477_v23, 3  ;;  %vm499_vm5 = vcmp.lt.s32.totalorder %v477_v23, 4 }
  0x2f   : > { %v483_v47 = vor.u32 %v482_v41, %v481_v29  ;;  %v486_v48 = vor.u32 %v485_v42, %v484_v31  ;;  %v489_v49 = vor.u32 %v488_v43, %v487_v33  ;;  %v3810_v54 = vshrl.u32 %v684_v50, 5  ;;  %1396 = vperm.xlu1 %3301, %v1382_v10   ;;  %v1384_v33 = vld [vmem:[%s5483_s4 + $0x18] sm:$0xff] }
  0x30   : > { %v492_v52 = vor.u32 %v491_v44, %v490_v36  ;;  %v495_v53 = vor.u32 %v494_v46, %v493_v38  ;;  %v686_v55 = vand.u32 31, %v684_v50  ;;  %1391 = vperm.xlu0 %3300, %v1381_v56   ;;  %v1387_v46 = vld [vmem:[%s5483_s4 + $0x30] sm:$0xff] }
  0x31   : > { %v500_v57 = vsel %vm496_vm2, %v480_v40, %v483_v47  ;;  %v501_v58 = vsel %vm499_vm5, %v489_v49, 2102212464  ;;  %v504_v59 = vsel %vm496_vm2, %v483_v47, %v486_v48  ;;  %v508_v60 = vsel %vm496_vm2, %v486_v48, %v489_v49 }
  0x32   : > { %v502_v61 = vsel %vm498_vm4, %v486_v48, %v501_v58  ;;  %v505_v62 = vsel %vm499_vm5, %v492_v52, 920167782  ;;  %v509_v63 = vsel %vm499_vm5, %v495_v53, 1326507024  ;;  %v687_v3 = vsub.s32 32, %v686_v55  ;;  %v1388_v58 = vld [vmem:[%s5483_s4 + $0x38] sm:$0xff] }
  0x33   : > { %v503_v5 = vsel %vm497_vm3, %v500_v57, %v502_v61  ;;  %v506_v6 = vsel %vm498_vm4, %v489_v49, %v505_v62  ;;  %v510_v7 = vsel %vm498_vm4, %v492_v52, %v509_v63  ;;  %v689_v9 = vshll.u32 %v3641_v28, %v686_v55  ;;  %1406 = vperm.xlu1 %3301, %v1384_v33   ;;  %v1830_v62 = vld [vmem:[%s5485_s6] sm:$0xff] }
  0x34   : > { %v507_v11 = vsel %vm497_vm3, %v504_v59, %v506_v6  ;;  %v511_v12 = vsel %vm497_vm3, %v508_v60, %v510_v7  ;;  %v519_v13 = vmul.u32 %v3803_v25, %v503_v5  ;;  %v688_v14 = vshrl.u32 %v3641_v28, %v687_v3  ;;  %1401 = vperm.xlu0 %3300, %v1383_v15   ;;  %v1831_v5 = vld [vmem:[%s5485_s6 + $0x8] sm:$0xff]  ;;  %v1832_v7 = vld [vmem:[%s5485_s6 + $0x10] sm:$0xff] }
  0x35   : > { %v3835_v16 = vmul.u32.u64.low %v3803_v25, %v511_v12  ;;  %v3836_v17 = vmul.u32.u64.high %v3803_v25, %v511_v12, %v3835_v16  ;;  %v3839_v19 = vmul.u32.u64.low %v3803_v25, %v507_v11  ;;  %v3840_v20 = vmul.u32.u64.high %v3803_v25, %v507_v11, %v3839_v19  ;;  %v1385_v25 = vld [vmem:[%s5483_s4 + $0x20] sm:$0xff]  ;;  %v1833_v12 = vld [vmem:[%s5485_s6 + $0x18] sm:$0xff] }
  0x36   : > { %v690_v21 = vshrl.u32 %v3642_v30, %v687_v3  ;;  %v692_v22 = vshll.u32 %v3642_v30, %v686_v55  ;;  %v693_v23 = vshrl.u32 %v3643_v32, %v687_v3  ;;  %v695_v24 = vshll.u32 %v3643_v32, %v686_v55 }
  0x37   : > { %v696_v27 = vshrl.u32 %v3644_v35, %v687_v3  ;;  %v698_v28 = vshll.u32 %v3644_v35, %v686_v55  ;;  %v699_v29 = vshrl.u32 %v3645_v37, %v687_v3  ;;  %v701_v31 = vshll.u32 %v3645_v37, %v686_v55  ;;  %1416 = vperm.xlu1 %3301, %v1386_v18  }
  0x38   : > { %v691_v34 = vor.u32 %v690_v21, %v689_v9  ;;  %v694_v36 = vor.u32 %v693_v23, %v692_v22  ;;  %v702_v38 = vshrl.u32 %v3646_v45, %v687_v3  ;;  %vm704_vm6 = vcmp.lt.s32.totalorder %v3810_v54, 1  ;;  %1411 = vperm.xlu0 %3300, %v1385_v25   ;;  %v1835_v21 = vld [vmem:[%s5485_s6 + $0x28] sm:$0xff]  ;;  %v1836_v23 = vld [vmem:[%s5485_s6 + $0x30] sm:$0x1] }
  0x39   : > { %vm521_vm7 = vc.u32 %v3836_v17, %v3839_v19  ;;  %v522_v30 = vadd.s32 1, %v3840_v20  ;;  %v697_v32 = vor.u32 %v696_v27, %v695_v24  ;;  %v720_v35 = vshll.u32 %v680_v26, 8 }
  0x3a   : > { %v700_v37 = vor.u32 %v699_v29, %v698_v28  ;;  %v703_v39 = vor.u32 %v702_v38, %v701_v31  ;;  %vm705_vm8 = vcmp.lt.s32.totalorder %v3810_v54, 2  ;;  %vm706_vm9 = vcmp.lt.s32.totalorder %v3810_v54, 3  ;;  %v2521_v31 = vld [vmem:[%s5488_s9] sm:$0xff]  ;;  %v2522_v38 = vld [vmem:[%s5488_s9 + $0x8] sm:$0xff] }
  0x3b   : > { %v523_v40 = vsel %vm521_vm7, %v522_v30, %v3840_v20  ;;  %vm707_vm10 = vcmp.lt.s32.totalorder %v3810_v54, 4  ;;  %v708_v41 = vsel %vm704_vm6, %v688_v14, %v691_v34  ;;  %v712_v42 = vsel %vm704_vm6, %v691_v34, %v694_v36  ;;  %1426 = vperm.xlu1 %3301, %v1388_v58   ;;  %v1834_v14 = vld [vmem:[%s5485_s6 + $0x20] sm:$0xff] }
  0x3c   : > { %v524_v26 = vadd.s32 %v523_v40, %v519_v13  ;;  %v709_v43 = vsel %vm707_vm10, %v697_v32, 2102212464  ;;  %v713_v44 = vsel %vm707_vm10, %v700_v37, 920167782  ;;  %v716_v45 = vsel %vm704_vm6, %v694_v36, %v697_v32  ;;  %1421 = vperm.xlu0 %3300, %v1387_v46  }
  0x3d   : > { %v710_v47 = vsel %vm706_vm9, %v694_v36, %v709_v43  ;;  %v714_v48 = vsel %vm706_vm9, %v697_v32, %v713_v44  ;;  %v717_v49 = vsel %vm707_vm10, %v703_v39, 1326507024  ;;  %v520_v27 = vadd.s32 %v3839_v19, %v3836_v17  ;;  %v2523_v19 = vld [vmem:[%s5488_s9 + $0x10] sm:$0xff]  ;;  %v2524_v39 = vld [vmem:[%s5488_s9 + $0x18] sm:$0xff] }
  0x3e   : > { %v525_v50 = vadd.s32 536870912, %v524_v26  ;;  %v715_v51 = vsel %vm705_vm8, %v712_v42, %v714_v48  ;;  %v718_v52 = vsel %vm706_vm9, %v700_v37, %v717_v49  ;;  %v711_v53 = vsel %vm705_vm8, %v708_v41, %v710_v47 }
  0x3f   : > { %v719_v55 = vsel %vm705_vm8, %v716_v45, %v718_v52  ;;  %v3883_v56 = vmul.u32.u64.low %v720_v35, %v715_v51  ;;  %v3884_v57 = vmul.u32.u64.high %v720_v35, %v715_v51, %v3883_v56  ;;  %v727_v63 = vmul.u32 %v720_v35, %v711_v53  ;;  %1844 = vperm.xlu1 %3301, %v1831_v5   ;;  %v2526_v45 = vld [vmem:[%s5488_s9 + $0x28] sm:$0xff]  ;;  %v2527_v52 = vld [vmem:[%s5488_s9 + $0x30] sm:$0xff] }
  0x40   : > { %v3890_v59 = vshrl.u32 %v525_v50, 30  ;;  %v3892_v60 = vmul.u32.u64.low %v720_v35, %v719_v55  ;;  %v3893_v61 = vmul.u32.u64.high %v720_v35, %v719_v55, %v3892_v60  ;;  %1839 = vperm.xlu0 %3300, %v1830_v62   ;;  %vm556_vm7 = vweird.f32 %v3778_v1 }
  0x41   : > { %v730_v3 = vadd.s32 1, %v3884_v57 }
  0x42   : > { %v527_v54 = vshll.u32 %v3890_v59, 30  ;;  %vm729_vm11 = vc.u32 %v3893_v61, %v3883_v56  ;;  %v550_v44 = vsub.s32 4, %v3890_v59  ;;  %v728_v46 = vadd.s32 %v3883_v56, %v3893_v61  ;;  %v2528_v56 = vld [vmem:[%s5488_s9 + $0x38] sm:$0xff] }
  0x43   : > { %v731_v9 = vsel %vm729_vm11, %v730_v3, %v3884_v57  ;;  %1854 = vperm.xlu1 %3301, %v1833_v12   ;;  %vm903_vm11 = vcmask 1042432  }
  0x44   : > { %v528_v6 = vsub.s32 %v524_v26, %v527_v54  ;;  %v732_v11 = vadd.s32 %v731_v9, %v727_v63  ;;  %1849 = vperm.xlu0 %3300, %v1832_v7   ;;  %v2525_v26 = vld [vmem:[%s5488_s9 + $0x20] sm:$0xff]  ;;  %v551_v55 = vsel %vm466_vm14, %v550_v44, %v3890_v59  ;;  %v2844_v59 = vld [vmem:[%s5490_s11 + $0x8] sm:$0xff] }
  0x45   : > { %v553_v62 = vsel %vm465_vm15, 0, %v551_v55 }
  0x46   : > { %v530_v10 = vsub.s32 0, %v528_v6  ;;  %v733_v15 = vadd.s32 536870912, %v732_v11  ;;  %v661_v12 = vand.u32 3, %v553_v62 }
  0x47   : > { %1864 = vperm.xlu1 %3301, %v1835_v21  }
  0x48   : > { %v3060_v13 = vmin.u32 %v530_v10, %v528_v6  ;;  %v3915_v20 = vshrl.u32 %v733_v15, 30  ;;  %1859 = vperm.xlu0 %3300, %v1834_v14   ;;  %vm663_vm3 = vcmp.eq.s32.totalorder %v661_v12, 0  ;;  %vm666_vm5 = vcmp.eq.s32.totalorder %v661_v12, 2 }
  0x49   : > { %vm662_vm8 = vcmp.lt.s32.totalorder %v661_v12, 2 }
  0x4a   : > { %v532_v16 = vclz %v3060_v13  ;;  %v735_v24 = vshll.u32 %v3915_v20, 30  ;;  %v758_v9 = vsub.s32 4, %v3915_v20 }
  0x4b   : > { %2531 = vperm.xlu1 %3301, %v2521_v31  }
  0x4c   : > { %v3061_v22 = vadd.s32 4294967294, %v532_v16  ;;  %v736_v29 = vsub.s32 %v732_v11, %v735_v24  ;;  %1869 = vperm.xlu0 %3300, %v1836_v23   ;;  %v759_v14 = vsel %vm674_vm0, %v758_v9, %v3915_v20  ;;  %v920_v9 = vld [vmem:[%s5481_s2 + $0x28] sm:$0xff] }
  0x4e   : > { %vm3062_vm12 = vcmp.lt.s32.totalorder %v3061_v22, 0  ;;  %v738_v25 = vsub.s32 0, %v736_v29 }
  0x4f   : > { %v535_v28 = vsel %vm3062_vm12, 0, %v3061_v22  ;;  %2541 = vperm.xlu1 %3301, %v2523_v19   ;;  %v761_v22 = vsel %vm673_vm1, 0, %v759_v14  ;;  %v880_v19 = vcombine.high %v3778_v1, %v3778_v1 }
  0x50   : > { %v536_v33 = vsub.s32 32, %v535_v28  ;;  %v537_v34 = vshll.u32 %v528_v6, %v535_v28  ;;  %v540_v36 = vsub.s32 4294967266, %v535_v28  ;;  %v3068_v17 = vmin.u32 %v738_v25, %v736_v29  ;;  %2536 = vperm.xlu0 %3300, %v2522_v38  }
  0x51   : > { %v557_v6 = vadd.s32 3, %v553_v62  ;;  %v765_v28 = vadd.s32 3, %v761_v22  ;;  %v869_v25 = vand.u32 3, %v761_v22 }
  0x52   : > { %v538_v30 = vshrl.u32 %v520_v27, %v536_v33  ;;  %v541_v32 = vadd.s32 127, %v540_v36  ;;  %v740_v40 = vclz %v3068_v17 }
  0x53   : > { %2551 = vperm.xlu1 %3301, %v2525_v26   ;;  %v558_v11 = vand.u32 3, %v557_v6  ;;  %v766_v38 = vand.u32 3, %v765_v28  ;;  %vm874_vm10 = vcmp.eq.s32.totalorder %v869_v25, 2  ;;  %v918_v6 = vld [vmem:[%s5481_s2 + $0x18] sm:$0xff] }
  0x54   : > { %v539_v35 = vor.u32 %v538_v30, %v537_v34  ;;  %v542_v37 = vshll.u32 %v541_v32, 23  ;;  %v3069_v18 = vadd.s32 4294967294, %v740_v40  ;;  %2546 = vperm.xlu0 %3300, %v2524_v39  }
  0x55   : > { %vm563_vm2 = vcmp.eq.s32.totalorder %v558_v11, 2  ;;  %vm560_vm4 = vcmp.eq.s32.totalorder %v558_v11, 0  ;;  %vm559_vm6 = vcmp.lt.s32.totalorder %v558_v11, 2  ;;  %vm771_vm9 = vcmp.eq.s32.totalorder %v766_v38, 2  ;;  %v922_v11 = vld [vmem:[%s5481_s2 + $0x38] sm:$0xff] }
  0x56   : > { %v543_v41 = vor.u32 4788187, %v542_v37  ;;  %v546_v42 = vcvt.s32.f32 %v539_v35  ;;  %vm3070_vm13 = vcmp.lt.s32.totalorder %v3069_v18, 0  ;;  %vm768_vm12 = vcmp.eq.s32.totalorder %v766_v38, 0 }
  0x57   : > { %v743_v48 = vsel %vm3070_vm13, 0, %v3069_v18  ;;  %2561 = vperm.xlu1 %3301, %v2527_v52   ;;  %vm870_vm13 = vcmp.lt.s32.totalorder %v869_v25, 2 }
  0x58   : > { %v544_v43 = vand.u32 2147483647, %v543_v41  ;;  %v744_v49 = vsub.s32 32, %v743_v48  ;;  %v745_v50 = vshll.u32 %v736_v29, %v743_v48  ;;  %v748_v51 = vsub.s32 4294967266, %v743_v48  ;;  %2556 = vperm.xlu0 %3300, %v2526_v45  }
  0x5a   : > { %v547_v47 = vmul.f32 %v546_v42, %v544_v43  ;;  %v746_v57 = vshrl.u32 %v728_v46, %v744_v49  ;;  %v749_v58 = vadd.s32 127, %v748_v51 }
  0x5b   : > { %2847 = vperm.xlu1 %3301, %v2843_v2  }
  0x5c   : > { %v548_v53 = vxor.u32 2147483648, %v547_v47  ;;  %v747_v54 = vor.u32 %v746_v57, %v745_v50  ;;  %v750_v63 = vshll.u32 %v749_v58, 23  ;;  %2566 = vperm.xlu0 %3300, %v2528_v56  }
  0x5e   : > { %v549_v60 = vsel %vm466_vm14, %v548_v53, %v547_v47  ;;  %v751_v3 = vor.u32 4788187, %v750_v63  ;;  %v754_v5 = vcvt.s32.f32 %v747_v54  ;;  %vm871_vm14 = vcmp.eq.s32.totalorder %v869_v25, 0 }
  0x5f   : > { %v552_v61 = vsel %vm465_vm15, %v3778_v1, %v549_v60  ;;  %vm767_vm15 = vcmp.lt.s32.totalorder %v766_v38, 2 }
  0x60   : > { %3303 = vcosq.f32 %v552_v61  ;;  %v752_v7 = vand.u32 2147483647, %v751_v3  ;;  %2852 = vperm.xlu0 %3300, %v2844_v59   ;;  %v915_v59 = vld [vmem:[%s5481_s2] sm:$0xff]  ;;  %v916_v3 = vld [vmem:[%s5481_s2 + $0x8] sm:$0xff] }
  0x61   : > { %3305 = vsinq.f32 %v552_v61 }
  0x62   : > { %v755_v10 = vmul.f32 %v754_v5, %v752_v7  ;;  %v917_v5 = vld [vmem:[%s5481_s2 + $0x10] sm:$0xff]  ;;  %v919_v7 = vld [vmem:[%s5481_s2 + $0x20] sm:$0xff] }
  0x64   : > { %v756_v13 = vxor.u32 2147483648, %v755_v10 }
  0x66   : > { %v757_v15 = vsel %vm674_vm0, %v756_v13, %v755_v10  ;;  %vm764_vm0 = vweird.f32 %v3783_v4  ;;  %v921_v10 = vld [vmem:[%s5481_s2 + $0x30] sm:$0xff] }
  0x67   : > { %v760_v21 = vsel %vm673_vm1, %v3783_v4, %v757_v15  ;;  %vm906_vm1 = vcmask 1045504  }
  0x68   : > { %3307 = vcosq.f32 %v760_v21 }
  0x69   : > { %3309 = vsinq.f32 %v760_v21 }
  0x6a   : > { %v3304_v16 = vpop.eup %3303 }
  0x6b   : > { %v3306_v23 = vpop.eup %3305  ;;  %v564_v24 = vxor.u32 2147483648, %v3304_v16 }
  0x6c   : > { %v561_v27 = vxor.u32 2147483648, %v3306_v23 }
  0x6d   : > { %v565_v8 = vsel %vm563_vm2, %v564_v24, %v3306_v23  ;;  %v668_v31 = vsel %vm666_vm5, %v564_v24, %v3306_v23  ;;  %vm909_vm2 = vcmask 1040384   ;;  %vm3647_vm5 = vmmov 1  }
  0x6e   : > { %v562_v20 = vsel %vm560_vm4, %v3304_v16, %v561_v27  ;;  %v665_v29 = vsel %vm663_vm3, %v3304_v16, %v561_v27  ;;  %vm912_vm3 = vcmask 1043456   ;;  %vm996_vm4 = vcmask 1046528  }
  0x6f   : > { %v566_v33 = vsel %vm559_vm6, %v562_v20, %v565_v8  ;;  %v669_v36 = vsel %vm662_vm8, %v665_v29, %v668_v31  ;;  %vm3984_vm6 = vmpackc.low %vm996_vm4, %vm3647_vm5 }
  0x70   : > { %v567_v34 = vsel %vm556_vm7, nan, %v566_v33  ;;  %v670_v30 = vsel %vm556_vm7, nan, %v669_v36  ;;  %vm971_vm7 = vcmask 121856  }
  0x71   : > { %v883_v32 = vcombine.high %v567_v34, %v567_v34  ;;  %v884_v40 = vrot.slane %v567_v34, 5  ;;  %v889_v41 = vcombine.high %v670_v30, %v670_v30  ;;  %v890_v47 = vrot.slane %v670_v30, 2 }
  0x72   : > { %v3308_v17 = vpop.eup %3307 }
  0x73   : > { %v3310_v35 = vpop.eup %3309  ;;  %v772_v37 = vxor.u32 2147483648, %v3308_v17  ;;  %v885_v26 = vrot.slane %v883_v32, 5  ;;  %v891_v50 = vrot.slane %v889_v41, 2  ;;  %v904_v51 = vsel %vm903_vm11, %v3778_v1, %v884_v40  ;;  %v1376_v1 = vld [vmem:[%s5482_s3 + $0x18] sm:$0xff] }
  0x74   : > { %v769_v39 = vxor.u32 2147483648, %v3310_v35  ;;  %v907_v57 = vsel %vm906_vm1, %v904_v51, %v890_v47 }
  0x75   : > { %v773_v42 = vsel %vm771_vm9, %v772_v37, %v3310_v35  ;;  %v876_v18 = vsel %vm874_vm10, %v772_v37, %v3310_v35  ;;  %v905_v55 = vsel %vm903_vm11, %v880_v19, %v885_v26 }
  0x76   : > { %v770_v43 = vsel %vm768_vm12, %v3308_v17, %v769_v39  ;;  %v873_v44 = vsel %vm871_vm14, %v3308_v17, %v769_v39  ;;  %v908_v60 = vsel %vm906_vm1, %v905_v55, %v891_v50 }
  0x77   : > { %v774_v45 = vsel %vm767_vm15, %v770_v43, %v773_v42  ;;  %v877_v46 = vsel %vm870_vm13, %v873_v44, %v876_v18 }
  0x78   : > { %v775_v48 = vsel %vm764_vm0, nan, %v774_v45  ;;  %v878_v49 = vsel %vm764_vm0, nan, %v877_v46 }
  0x79   : > { %v895_v52 = vcombine.high %v775_v48, %v775_v48  ;;  %v896_v53 = vrot.slane %v775_v48, 7  ;;  %v901_v4 = vcombine.low %v878_v49, %v878_v49 }
  0x7b   : > { %v897_v56 = vrot.slane %v895_v52, 7  ;;  %v910_v58 = vsel %vm909_vm2, %v890_v47, %v896_v53 }
  0x7c   : > { %v913_v61 = vsel %vm912_vm3, %v910_v58, %v901_v4 }
  0x7d   : > { %v911_v62 = vsel %vm909_vm2, %v891_v50, %v897_v56  ;;  %v3988_v63 = vpack.c.bf16 %v913_v61, %v907_v57 }
  0x7e   : > { %v914_v54 = vsel %vm912_vm3, %v911_v62, %v878_v49 }
  0x7f   : > { %v3990_v2 = vpack.c.bf16 %v914_v54, %v908_v60 }
  0x81   : > { %3132 = vmatprep.subr.msk.bf16.mxu0 %vm3984_vm6, %v3990_v2 }
  0x82   : > { %3135 = vmatpush1.bf16.msk.msra.mxu0 %vm3984_vm6, %v3988_v63 }
  0x85   : > { %3077 = vmatmul.mubr.msk.f32.vlgmr.msra.gmra.mrb[0].mxu0 %vm971_vm7, %v915_v59 }
  0x86   : > { %1073 = vmatprep.mubr.f32.mxu0 %v5493_v0 }
  0x89   : > { %3078 = vmatmul.mubr.msk.f32.gmra.mrb[2].mxu0 %vm971_vm7, %v916_v3 }
  0x8a   : > { %1079 = vmatprep.mubr.f32.mxu0 %v5493_v0 }
  0x8d   : > { %3079 = vmatmul.mubr.msk.f32.gmra.mrb[4].mxu0 %vm971_vm7, %v917_v5 }
  0x8e   : > { %1085 = vmatprep.mubr.f32.mxu0 %v5493_v0 }
  0x91   : > { %3080 = vmatmul.mubr.msk.f32.gmra.mrb[6].mxu0 %vm971_vm7, %v918_v6 }
  0x92   : > { %1091 = vmatprep.mubr.f32.mxu0 %v5493_v0 }
  0x95   : > { %3081 = vmatmul.mubr.msk.f32.gmra.mrb[8].mxu0 %vm971_vm7, %v919_v7 }
  0x96   : > { %1097 = vmatprep.mubr.f32.mxu0 %v5493_v0 }
  0x99   : > { %3082 = vmatmul.mubr.msk.f32.gmra.mrb[10].mxu0 %vm971_vm7, %v920_v9 }
  0x9a   : > { %1103 = vmatprep.mubr.f32.mxu0 %v5493_v0 }
  0x9d   : > { %3083 = vmatmul.mubr.msk.f32.gmra.mrb[12].mxu0 %vm971_vm7, %v921_v10 }
  0x9e   : > { %1109 = vmatprep.mubr.f32.mxu0 %v5493_v0  ;;  %v944_v8 = vpop.permute.xlu1 %943 }
  0x9f   : > { %v934_v12 = vpop.permute.xlu0 %933 }
  0xa1   : > { %3084 = vmatmul.mubr.msk.f32.gmra.mrb[14].mxu0 %vm971_vm7, %v922_v11 }
  0xa2   : > { %1518 = vmatprep.mubr.f32.mxu0 %v5493_v0  ;;  %v949_v19 = vpop.permute.xlu1 %948 }
  0xa3   : > { %v939_v21 = vpop.permute.xlu0 %938 }
  0xa6   : > { %v959_v61 = vpop.permute.xlu1 %958 }
  0xa7   : > { %v954_v45 = vpop.permute.xlu0 %953 }
 0x158   : > { %v1069_v13 = vpop.f32.mrb[0].mxu0 }
 0x159   : > { %v4038_v14 = vadd.f32 %v1069_v13, %v934_v12  ;;  %v1071_v15 = vpop.f32.mrb[1].mxu0 }
 0x15a   : > { %v4046_v20 = vadd.f32 %v1071_v15, %v934_v12  ;;  %v964_v15 = vpop.permute.xlu0 %963 }
 0x15b   : > { %v4041_v16 = vmul.f32 100.0, %v4038_v14 }
 0x15c   : > { %v1075_v22 = vpop.f32.mrb[2].mxu0  ;;  %v4057_v25 = vmul.f32 100.0, %v4046_v20 }
 0x15d   : > { %v1132_v23 = vmin.f32 %v4041_v16, 20.0  ;;  %v4044_v24 = vadd.f32 %v1075_v22, %v939_v21  ;;  %v1077_v27 = vpop.f32.mrb[3].mxu0  ;;  %vm1341_vm8 = vcmp.gt.f32.partialorder %v4041_v16, 20.0 }
 0x15e   : > { %v4051_v31 = vadd.f32 %v1077_v27, %v939_v21  ;;  %v1133_v18 = vmin.f32 %v4057_v25, 20.0 }
 0x15f   : > { %v1148_v28 = vmul.f32 1.442695, %v1132_v23  ;;  %v4049_v29 = vmul.f32 100.0, %v4044_v24 }
 0x160   : > { %v1081_v33 = vpop.f32.mrb[4].mxu0  ;;  %v4065_v35 = vmul.f32 100.0, %v4051_v31  ;;  %v1150_v53 = vmul.f32 1.442695, %v1133_v18 }
 0x161   : > { %3311 = vpow2.f32 %v1148_v28  ;;  %v1134_v34 = vmin.f32 %v4049_v29, 20.0  ;;  %v4054_v36 = vadd.f32 %v1081_v33, %v944_v8  ;;  %v1083_v38 = vpop.f32.mrb[5].mxu0  ;;  %vm1343_vm9 = vcmp.gt.f32.partialorder %v4049_v29, 20.0 }
 0x162   : > { %v4062_v17 = vadd.f32 %v1083_v38, %v944_v8  ;;  %v1135_v46 = vmin.f32 %v4065_v35, 20.0 }
 0x163   : > { %v1152_v30 = vmul.f32 1.442695, %v1134_v34  ;;  %v4060_v32 = vmul.f32 100.0, %v4054_v36 }
 0x164   : > { %v1087_v37 = vpop.f32.mrb[6].mxu0  ;;  %v4074_v43 = vmul.f32 100.0, %v4062_v17  ;;  %v1154_v58 = vmul.f32 1.442695, %v1135_v46 }
 0x165   : > { %3313 = vpow2.f32 %v1152_v30  ;;  %v1136_v39 = vmin.f32 %v4060_v32, 20.0  ;;  %v4068_v40 = vadd.f32 %v1087_v37, %v949_v19  ;;  %v1089_v41 = vpop.f32.mrb[7].mxu0  ;;  %vm1345_vm13 = vcmp.gt.f32.partialorder %v4060_v32, 20.0 }
 0x166   : > { %v4070_v42 = vadd.f32 %v1089_v41, %v949_v19  ;;  %v1137_v4 = vmin.f32 %v4074_v43, 20.0 }
 0x167   : > { %v1156_v26 = vmul.f32 1.442695, %v1136_v39  ;;  %v4077_v44 = vmul.f32 100.0, %v4068_v40 }
 0x168   : > { %v1093_v47 = vpop.f32.mrb[8].mxu0  ;;  %v4082_v49 = vmul.f32 100.0, %v4070_v42  ;;  %v1158_v7 = vmul.f32 1.442695, %v1137_v4 }
 0x169   : > { %3315 = vpow2.f32 %v1156_v26  ;;  %v1138_v48 = vmin.f32 %v4077_v44, 20.0  ;;  %v4084_v50 = vadd.f32 %v1093_v47, %v954_v45  ;;  %v1095_v51 = vpop.f32.mrb[9].mxu0  ;;  %vm1347_vm14 = vcmp.gt.f32.partialorder %v4077_v44, 20.0 }
 0x16a   : > { %v4093_v60 = vadd.f32 %v1095_v51, %v954_v45  ;;  %v1139_v62 = vmin.f32 %v4082_v49, 20.0 }
 0x16b   : > { %v4086_v52 = vpop.eup %3311  ;;  %v1160_v55 = vmul.f32 1.442695, %v1138_v48  ;;  %v4090_v56 = vmul.f32 100.0, %v4084_v50 }
 0x16c   : > { %v1180_v57 = vadd.f32 1.0, %v4086_v52  ;;  %v1099_v59 = vpop.f32.mrb[10].mxu0  ;;  %v1183_v10 = vmul.f32 -0.5, %v4086_v52  ;;  %v4101_v12 = vmul.f32 100.0, %v4093_v60  ;;  %v1162_v21 = vmul.f32 1.442695, %v1139_v62  ;;  %v969_v62 = vpop.permute.xlu1 %968 }
 0x16d   : > { %3317 = vpow2.f32 %v1160_v55  ;;  %v1140_v54 = vmin.f32 %v4090_v56, 20.0  ;;  %v4097_v3 = vadd.f32 %v1099_v59, %v959_v61  ;;  %v1101_v5 = vpop.f32.mrb[11].mxu0  ;;  %v1186_v45 = vand.u32 2147483647, %v4086_v52 }
 0x16e   : > { %3319 = vlog2.f32 %v1180_v57  ;;  %v4106_v23 = vadd.f32 %v1101_v5, %v959_v61  ;;  %v1184_v34 = vadd.f32 1.0, %v1183_v10  ;;  %v1141_v19 = vmin.f32 %v4101_v12, 20.0 }
 0x16f   : > { %v3314_v6 = vpop.eup %3313  ;;  %3321 = vpow2.f32 %v1150_v53  ;;  %v1164_v9 = vmul.f32 1.442695, %v1140_v54  ;;  %v4104_v22 = vmul.f32 100.0, %v4097_v3  ;;  %vm4137_vm10 = vcmp.lt.f32.partialorder %v1186_v45, 0.0004427343 }
 0x170   : > { %v1198_v11 = vadd.f32 1.0, %v3314_v6  ;;  %3323 = vpow2.f32 %v1154_v58  ;;  %v1105_v13 = vpop.f32.mrb[12].mxu0  ;;  %v1201_v38 = vmul.f32 -0.5, %v3314_v6  ;;  %v4116_v41 = vmul.f32 100.0, %v4106_v23 }
 0x171   : > { %3325 = vpow2.f32 %v1164_v9  ;;  %v1107_v27 = vpop.f32.mrb[13].mxu0  ;;  %v4108_v8 = vadd.f32 %v1105_v13, %v964_v15  ;;  %v1142_v33 = vmin.f32 %v4104_v22, 20.0  ;;  %v1204_v48 = vand.u32 2147483647, %v3314_v6 }
 0x172   : > { %3327 = vlog2.f32 %v1198_v11  ;;  %v4122_v46 = vadd.f32 %v1107_v27, %v964_v15  ;;  %v1185_v4 = vmul.f32 %v4086_v52, %v1184_v34  ;;  %v1202_v55 = vadd.f32 1.0, %v1201_v38 }
 0x173   : > { %v4110_v28 = vpop.eup %3315  ;;  %3329 = vpow2.f32 %v1158_v7  ;;  %v1168_v39 = vmul.f32 1.442695, %v1142_v33  ;;  %v4119_v18 = vmul.f32 100.0, %v4108_v8  ;;  %v1166_v58 = vmul.f32 1.442695, %v1141_v19 }
 0x174   : > { %v1216_v30 = vadd.f32 1.0, %v4110_v28  ;;  %v1111_v37 = vpop.f32.mrb[14].mxu0  ;;  %3331 = vpow2.f32 %v1162_v21  ;;  %v1219_v59 = vmul.f32 -0.5, %v4110_v28  ;;  %v1143_v5 = vmin.f32 %v4116_v41, 20.0 }
 0x175   : > { %v1113_v26 = vpop.f32.mrb[15].mxu0  ;;  %v1144_v51 = vmin.f32 %v4119_v18, 20.0  ;;  %v4142_v10 = vmul.f32 100.0, %v4122_v46  ;;  %v4144_v11 = vadd.f32 %v1111_v37, %v969_v62  ;;  %vm4148_vm11 = vcmp.lt.f32.partialorder %v1204_v48, 0.0004427343 }
 0x176   : > { %3333 = vlog2.f32 %v1216_v30  ;;  %v1222_v27 = vand.u32 2147483647, %v4110_v28  ;;  %v1203_v34 = vmul.f32 %v3314_v6, %v1202_v55  ;;  %v1170_v45 = vmul.f32 1.442695, %v1143_v5 }
 0x177   : > { %v4124_v47 = vpop.eup %3317  ;;  %3335 = vpow2.f32 %v1168_v39  ;;  %v1172_v7 = vmul.f32 1.442695, %v1144_v51  ;;  %v1220_v39 = vadd.f32 1.0, %v1219_v59  ;;  %v4156_v51 = vadd.f32 %v1113_v26, %v969_v62 }
 0x178   : > { %v3320_v53 = vpop.eup %3319  ;;  %v1234_v57 = vadd.f32 1.0, %v4124_v47  ;;  %v1237_v38 = vmul.f32 -0.5, %v4124_v47  ;;  %vm4166_vm12 = vcmp.lt.f32.partialorder %v1222_v27, 0.0004427343  ;;  %vm1349_vm1 = vcmp.gt.f32.partialorder %v4090_v56, 20.0 }
 0x179   : > { %v4129_v61 = vpop.eup %3321  ;;  %v1182_v54 = vmul.f32 0.6931472, %v3320_v53  ;;  %v1145_v53 = vmin.f32 %v4142_v10, 20.0  ;;  %v1221_v21 = vmul.f32 %v4110_v28, %v1220_v39  ;;  %vm1351_vm3 = vcmp.gt.f32.partialorder %v4104_v22, 20.0 }
 0x17a   : > { %v4135_v9 = vpop.eup %3323  ;;  %3337 = vlog2.f32 %v1234_v57  ;;  %v1238_v59 = vadd.f32 1.0, %v1237_v38 }
 0x17b   : > { %v3326_v13 = vpop.eup %3325  ;;  %v1188_v15 = vsel %vm4137_vm10, %v1185_v4, %v1182_v54  ;;  %3339 = vpow2.f32 %v1172_v7  ;;  %v4160_v4 = vmul.f32 100.0, %v4144_v11  ;;  %v4173_v7 = vmul.f32 100.0, %v4156_v51 }
 0x17c   : > { %v3328_v33 = vpop.eup %3327  ;;  %v1252_v30 = vadd.f32 1.0, %v3326_v13  ;;  %3341 = vpow2.f32 %v1166_v58  ;;  %v1325_v48 = vmul.f32 0.01, %v1188_v15  ;;  %v1240_v58 = vand.u32 2147483647, %v4124_v47 }
 0x17d   : > { %v4154_v19 = vpop.eup %3329  ;;  %v1200_v37 = vmul.f32 0.6931472, %v3328_v33  ;;  %v1255_v26 = vmul.f32 -0.5, %v3326_v13  ;;  %v1146_v5 = vmin.f32 %v4160_v4, 20.0  ;;  %v1258_v27 = vand.u32 2147483647, %v3326_v13 }
 0x17e   : > { %3343 = vlog2.f32 %v1252_v30  ;;  %v4162_v57 = vpop.eup %3331  ;;  %v1357_v33 = vsel %vm1341_vm8, %v4038_v14, %v1325_v48  ;;  %v1174_v30 = vmul.f32 1.442695, %v1145_v53  ;;  %vm4189_vm15 = vcmp.lt.f32.partialorder %v1240_v58, 0.0004427343 }
 0x17f   : > { %v1206_v6 = vsel %vm4148_vm11, %v1203_v34, %v1200_v37  ;;  %3345 = vpow2.f32 %v1170_v45  ;;  %v1256_v39 = vadd.f32 1.0, %v1255_v26  ;;  %v1239_v45 = vmul.f32 %v4124_v47, %v1238_v59 }
 0x180   : > { %v3334_v62 = vpop.eup %3333  ;;  %v1327_v54 = vmul.f32 0.01, %v1206_v6  ;;  %v1176_v6 = vmul.f32 1.442695, %v1146_v5  ;;  %v1147_v14 = vmin.f32 %v4173_v7, 20.0  ;;  %v1189_v48 = vadd.f32 1.0, %v4129_v61 }
 0x181   : > { %v3336_v52 = vpop.eup %3335  ;;  %v1218_v15 = vmul.f32 0.6931472, %v3334_v62  ;;  %vm4197_vm0 = vcmp.lt.f32.partialorder %v1258_v27, 0.0004427343  ;;  %v1192_v58 = vmul.f32 -0.5, %v4129_v61  ;;  %v1257_v59 = vmul.f32 %v3326_v13, %v1256_v39 }
 0x182   : > { %v1359_v34 = vsel %vm1343_vm9, %v4044_v24, %v1327_v54  ;;  %v1270_v38 = vadd.f32 1.0, %v3336_v52  ;;  %v1273_v29 = vmul.f32 -0.5, %v3336_v52  ;;  %v1276_v5 = vand.u32 2147483647, %v3336_v52 }
 0x183   : > { %v4184_v37 = vpack.c.bf16 %v1359_v34, %v1357_v33  ;;  %v1224_v28 = vsel %vm4166_vm12, %v1221_v21, %v1218_v15  ;;  %v1178_v34 = vmul.f32 1.442695, %v1147_v14  ;;  %v1195_v27 = vand.u32 2147483647, %v4129_v61 }
 0x184   : > { %v3338_v62 = vpop.eup %3337  ;;  %3347 = vlog2.f32 %v1270_v38  ;;  %v1329_v55 = vmul.f32 0.01, %v1224_v28  ;;  %v1274_v28 = vadd.f32 1.0, %v1273_v29  ;;  %v1193_v13 = vadd.f32 1.0, %v1192_v58 }
 0x185   : > { %v3340_v16 = vpop.eup %3339  ;;  %v1236_v24 = vmul.f32 0.6931472, %v3338_v62  ;;  %3349 = vpow2.f32 %v1176_v6  ;;  %v1210_v14 = vmul.f32 -0.5, %v4135_v9  ;;  %v1213_v44 = vand.u32 2147483647, %v4135_v9 }
 0x186   : > { %v4195_v53 = vpop.eup %3341  ;;  %v1288_v47 = vadd.f32 1.0, %v3340_v16  ;;  %3351 = vpow2.f32 %v1174_v30  ;;  %v1291_v33 = vmul.f32 -0.5, %v3340_v16  ;;  %v1361_v6 = vsel %vm1345_vm13, %v4054_v36, %v1329_v55 }
 0x187   : > { %v1242_v54 = vsel %vm4189_vm15, %v1239_v45, %v1236_v24  ;;  %v1207_v30 = vadd.f32 1.0, %v4135_v9  ;;  %v1294_v45 = vand.u32 2147483647, %v3340_v16  ;;  %v1225_v36 = vadd.f32 1.0, %v4154_v19 }
 0x188   : > { %v3344_v15 = vpop.eup %3343  ;;  %v1331_v21 = vmul.f32 0.01, %v1242_v54  ;;  %3353 = vlog2.f32 %v1288_v47  ;;  %v1275_v24 = vmul.f32 %v3336_v52, %v1274_v28  ;;  %vm4223_vm4 = vcmp.lt.f32.partialorder %v1276_v5, 0.0004427343 }
 0x189   : > { %v1254_v38 = vmul.f32 0.6931472, %v3344_v15  ;;  %3355 = vlog2.f32 %v1189_v48  ;;  %v4213_v39 = vpop.eup %3345  ;;  %v1243_v48 = vadd.f32 1.0, %v4162_v57  ;;  %v1194_v47 = vmul.f32 %v4129_v61, %v1193_v13 }
 0x18a   : > { %v1363_v0 = vsel %vm1347_vm14, %v4068_v40, %v1331_v21  ;;  %v1292_v40 = vadd.f32 1.0, %v1291_v33  ;;  %3357 = vlog2.f32 %v1207_v30  ;;  %vm4229_vm5 = vcmp.lt.f32.partialorder %v1195_v27, 0.0004427343 }
 0x18b   : > { %v4215_v62 = vpack.c.bf16 %v1363_v0, %v1361_v6  ;;  %v1260_v32 = vsel %vm4197_vm0, %v1257_v59, %v1254_v38  ;;  %3359 = vlog2.f32 %v1225_v36  ;;  %v1228_v26 = vmul.f32 -0.5, %v4154_v19 }
 0x18c   : > { %3361 = vpow2.f32 %v1178_v34  ;;  %v1333_v59 = vmul.f32 0.01, %v1260_v32  ;;  %vm4234_vm8 = vcmp.lt.f32.partialorder %v1294_v45, 0.0004427343  ;;  %v1211_v15 = vadd.f32 1.0, %v1210_v14 }
 0x18d   : > { %3363 = vlog2.f32 %v1243_v48  ;;  %v1293_v21 = vmul.f32 %v3340_v16, %v1292_v40  ;;  %vm4238_vm9 = vcmp.lt.f32.partialorder %v1213_v44, 0.0004427343  ;;  %v1246_v61 = vmul.f32 -0.5, %v4162_v57 }
 0x18e   : > { %v3348_v55 = vpop.eup %3347  ;;  %v1231_v6 = vand.u32 2147483647, %v4154_v19  ;;  %v1261_v0 = vadd.f32 1.0, %v4195_v53  ;;  %v1229_v16 = vadd.f32 1.0, %v1228_v26  ;;  %v1249_v45 = vand.u32 2147483647, %v4162_v57 }
 0x18f   : > { %v3350_v54 = vpop.eup %3349  ;;  %v1272_v52 = vmul.f32 0.6931472, %v3348_v55  ;;  %vm1342_vm10 = vcmp.gt.f32.partialorder %v4057_v25, 20.0  ;;  %vm1344_vm11 = vcmp.gt.f32.partialorder %v4065_v35, 20.0  ;;  %v1365_v36 = vsel %vm1349_vm1, %v4084_v50, %v1333_v59 }
 0x190   : > { %v1306_v33 = vadd.f32 1.0, %v3350_v54  ;;  %v4243_v38 = vpop.eup %3351  ;;  %v1309_v27 = vmul.f32 -0.5, %v3350_v54  ;;  %v1312_v32 = vand.u32 2147483647, %v3350_v54  ;;  %v1212_v40 = vmul.f32 %v4135_v9, %v1211_v15 }
 0x191   : > { %v1278_v28 = vsel %vm4223_vm4, %v1275_v24, %v1272_v52  ;;  %v1247_v48 = vadd.f32 1.0, %v1246_v61  ;;  %v1264_v52 = vmul.f32 -0.5, %v4195_v53  ;;  %vm1346_vm12 = vcmp.gt.f32.partialorder %v4074_v43, 20.0 }
 0x192   : > { %v3354_v13 = vpop.eup %3353  ;;  %v1335_v30 = vmul.f32 0.01, %v1278_v28  ;;  %3365 = vlog2.f32 %v1306_v33  ;;  %v1310_v26 = vadd.f32 1.0, %v1309_v27  ;;  %v1279_v33 = vadd.f32 1.0, %v4213_v39 }
 0x193   : > { %v3356_v14 = vpop.eup %3355  ;;  %3367 = vlog2.f32 %v1261_v0  ;;  %v1290_v24 = vmul.f32 0.6931472, %v3354_v13  ;;  %vm1348_vm13 = vcmp.gt.f32.partialorder %v4082_v49, 20.0  ;;  %vm4268_vm14 = vcmp.lt.f32.partialorder %v1231_v6, 0.0004427343 }
 0x194   : > { %v1367_v44 = vsel %vm1351_vm3, %v4097_v3, %v1335_v30  ;;  %v1191_v29 = vmul.f32 0.6931472, %v3356_v14  ;;  %v3358_v56 = vpop.eup %3357  ;;  %v1230_v3 = vmul.f32 %v4154_v19, %v1229_v16  ;;  %vm4272_vm15 = vcmp.lt.f32.partialorder %v1249_v45, 0.0004427343 }
 0x195   : > { %v4259_v55 = vpack.c.bf16 %v1367_v44, %v1365_v36  ;;  %v3360_v59 = vpop.eup %3359  ;;  %vm4276_vm0 = vcmp.lt.f32.partialorder %v1312_v32, 0.0004427343  ;;  %v1209_v61 = vmul.f32 0.6931472, %v3358_v56  ;;  %v1267_v28 = vand.u32 2147483647, %v4195_v53 }
 0x196   : > { %v1197_v50 = vsel %vm4229_vm5, %v1194_v47, %v1191_v29  ;;  %3369 = vlog2.f32 %v1279_v33  ;;  %v4281_v47 = vpop.eup %3361  ;;  %v1296_v19 = vsel %vm4234_vm8, %v1293_v21, %v1290_v24  ;;  %v1227_v27 = vmul.f32 0.6931472, %v3360_v59 }
 0x197   : > { %v1326_v58 = vmul.f32 0.01, %v1197_v50  ;;  %v1248_v6 = vmul.f32 %v4162_v57, %v1247_v48  ;;  %v3364_v0 = vpop.eup %3363  ;;  %v1311_v13 = vmul.f32 %v3350_v54, %v1310_v26  ;;  %v1215_v30 = vsel %vm4238_vm9, %v1212_v40, %v1209_v61 }
 0x198   : > { %v1265_v16 = vadd.f32 1.0, %v1264_v52  ;;  %v1297_v45 = vadd.f32 1.0, %v4243_v38  ;;  %v1328_v14 = vmul.f32 0.01, %v1215_v30  ;;  %v1233_v36 = vsel %vm4268_vm14, %v1230_v3, %v1227_v27 }
 0x199   : > { %v1245_v32 = vmul.f32 0.6931472, %v3364_v0  ;;  %v1282_v5 = vmul.f32 -0.5, %v4213_v39  ;;  %v1337_v21 = vmul.f32 0.01, %v1296_v19  ;;  %v1358_v54 = vsel %vm1342_vm10, %v4046_v20, %v1326_v58 }
 0x19a   : > { %v1330_v44 = vmul.f32 0.01, %v1233_v36  ;;  %vm4292_vm1 = vcmp.lt.f32.partialorder %v1267_v28, 0.0004427343  ;;  %3371 = vlog2.f32 %v1297_v45  ;;  %v1360_v34 = vsel %vm1344_vm11, %v4051_v31, %v1328_v14 }
 0x19b   : > { %v1251_v40 = vsel %vm4272_vm15, %v1248_v6, %v1245_v32  ;;  %v1315_v29 = vadd.f32 1.0, %v4281_v47  ;;  %v3136_v52 = vpack.c.bf16 %v1360_v34, %v1358_v54  ;;  %v1266_v56 = vmul.f32 %v4195_v53, %v1265_v16  ;;  %v1392_v32 = vpop.permute.xlu0 %1391 }
 0x19c   : > { %v3366_v57 = vpop.eup %3365  ;;  %v1332_v33 = vmul.f32 0.01, %v1251_v40  ;;  %v1283_v3 = vadd.f32 1.0, %v1282_v5  ;;  %v1300_v25 = vmul.f32 -0.5, %v4243_v38  ;;  %v1362_v31 = vsel %vm1346_vm12, %v4062_v17, %v1330_v44  ;;  %v1397_v5 = vpop.permute.xlu1 %1396 }
 0x19d   : > { %v3368_v48 = vpop.eup %3367  ;;  %v1308_v26 = vmul.f32 0.6931472, %v3366_v57  ;;  %3373 = vlog2.f32 %v1315_v29  ;;  %3137 = vmatprep.subr.bf16.mxu0 %v3136_v52  ;;  %3202 = vmatprep.subr.bf16.mxu1 %v3136_v52  ;;  %v1285_v53 = vand.u32 2147483647, %v4213_v39  ;;  %vm1353_vm3 = vcmp.gt.f32.partialorder %v4119_v18, 20.0 }
 0x19e   : > { %v1263_v50 = vmul.f32 0.6931472, %v3368_v48  ;;  %v1364_v35 = vsel %vm1348_vm13, %v4070_v42, %v1332_v33  ;;  %3139 = vmatpush1.bf16.msra.mxu0 %v4184_v37  ;;  %3206 = vmatpush1.bf16.msra.mxu1 %v4184_v37  ;;  %v1369_v17 = vsel %vm1353_vm3, %v4108_v8, %v1337_v21  ;;  %vm1355_vm4 = vcmp.gt.f32.partialorder %v4160_v4, 20.0 }
 0x19f   : > { %v1314_v20 = vsel %vm4276_vm0, %v1311_v13, %v1308_v26  ;;  %v3140_v9 = vpack.c.bf16 %v1364_v35, %v1362_v31  ;;  %v1318_v42 = vmul.f32 -0.5, %v4281_v47  ;;  %v1284_v18 = vmul.f32 %v4213_v39, %v1283_v3  ;;  %v1402_v21 = vpop.permute.xlu0 %1401 }
 0x1a0   : > { %v1339_v22 = vmul.f32 0.01, %v1314_v20  ;;  %v1269_v59 = vsel %vm4292_vm1, %v1266_v56, %v1263_v50  ;;  %v3370_v15 = vpop.eup %3369  ;;  %v1301_v61 = vadd.f32 1.0, %v1300_v25  ;;  %vm1286_vm5 = vcmp.lt.f32.partialorder %v1285_v53, 0.0004427343  ;;  %v4388_v44 = vpop.permute.xlu1 %1406 }
 0x1a1   : > { %3141 = vmatprep.subr.bf16.mxu0 %v3140_v9  ;;  %3203 = vmatprep.subr.bf16.mxu1 %v3140_v9  ;;  %v1281_v49 = vmul.f32 0.6931472, %v3370_v15  ;;  %v1334_v28 = vmul.f32 0.01, %v1269_v59  ;;  %v1303_v19 = vand.u32 2147483647, %v4243_v38 }
 0x1a2   : > { %v1371_v43 = vsel %vm1355_vm4, %v4144_v11, %v1339_v22  ;;  %3143 = vmatpush1.bf16.msra.mxu0 %v4215_v62  ;;  %3207 = vmatpush1.bf16.msra.mxu1 %v4215_v62  ;;  %vm1350_vm8 = vcmp.gt.f32.partialorder %v4101_v12, 20.0  ;;  %v1319_v58 = vadd.f32 1.0, %v1318_v42  ;;  %vm1352_vm9 = vcmp.gt.f32.partialorder %v4116_v41, 20.0 }
 0x1a3   : > { %v3150_v37 = vpack.c.bf16 %v1371_v43, %v1369_v17  ;;  %v1287_v8 = vsel %vm1286_vm5, %v1284_v18, %v1281_v49  ;;  %v1302_v39 = vmul.f32 %v4243_v38, %v1301_v61  ;;  %v1321_v6 = vand.u32 2147483647, %v4281_v47  ;;  %v4390_v24 = vpop.permute.xlu0 %1411 }
 0x1a4   : > { %v3372_v4 = vpop.eup %3371  ;;  %v1336_v11 = vmul.f32 0.01, %v1287_v8  ;;  %v1366_v0 = vsel %vm1350_vm8, %v4093_v60, %v1334_v28  ;;  %vm1304_vm10 = vcmp.lt.f32.partialorder %v1303_v19, 0.0004427343  ;;  %v1320_v12 = vmul.f32 %v4281_v47, %v1319_v58  ;;  %v1373_v47 = vld [vmem:[%s5482_s3] sm:$0xff]  ;;  %v1417_v57 = vpop.permute.xlu1 %1416 }
 0x1a5   : > { %v1299_v27 = vmul.f32 0.6931472, %v3372_v4  ;;  %vm1322_vm11 = vcmp.lt.f32.partialorder %v1321_v6, 0.0004427343  ;;  %vm1354_vm12 = vcmp.gt.f32.partialorder %v4142_v10, 20.0  ;;  %vm1356_vm13 = vcmp.gt.f32.partialorder %v4173_v7, 20.0 }
 0x1a6   : > { %v1368_v13 = vsel %vm1352_vm9, %v4106_v23, %v1336_v11  ;;  %vm1429_vm14 = vcmask 523264   ;;  %v1378_v10 = vld [vmem:[%s5482_s3 + $0x28] sm:$0xff]  ;;  %v1379_v7 = vld [vmem:[%s5482_s3 + $0x30] sm:$0xff] }
 0x1a7   : > { %v3374_v30 = vpop.eup %3373  ;;  %v3144_v62 = vpack.c.bf16 %v1368_v13, %v1366_v0  ;;  %v1305_v16 = vsel %vm1304_vm10, %v1302_v39, %v1299_v27  ;;  %v1422_v35 = vpop.permute.xlu0 %1421 }
 0x1a8   : > { %v1317_v45 = vmul.f32 0.6931472, %v3374_v30  ;;  %v1338_v41 = vmul.f32 0.01, %v1305_v16  ;;  %v1427_v9 = vpop.permute.xlu1 %1426 }
 0x1a9   : > { %3145 = vmatprep.subr.bf16.mxu0 %v3144_v62  ;;  %3204 = vmatprep.subr.bf16.mxu1 %v3144_v62 }
 0x1aa   : > { %3147 = vmatpush1.bf16.msra.mxu0 %v4259_v55  ;;  %3208 = vmatpush1.bf16.msra.mxu1 %v4259_v55  ;;  %v1323_v38 = vsel %vm1322_vm11, %v1320_v12, %v1317_v45  ;;  %v1370_v60 = vsel %vm1354_vm12, %v4122_v46, %v1338_v41  ;;  %v5531_v46 = vmov 0.0   ;;  %v1380_v55 = vld [vmem:[%s5482_s3 + $0x38] sm:$0xff] }
 0x1ab   : > { %v1340_v14 = vmul.f32 0.01, %v1323_v38 }
 0x1ad   : > { %v1372_v23 = vsel %vm1356_vm13, %v4156_v51, %v1340_v14  ;;  %v1374_v51 = vld [vmem:[%s5482_s3 + $0x8] sm:$0xff] }
 0x1ae   : > { %v3148_v36 = vpack.c.bf16 %v1372_v23, %v1370_v60 }
 0x1b0   : > { %3149 = vmatprep.subr.bf16.mxu0 %v3148_v36  ;;  %3205 = vmatprep.subr.bf16.mxu1 %v3148_v36 }
 0x1b1   : > { %3151 = vmatpush1.bf16.msra.mxu0 %v3150_v37  ;;  %3209 = vmatpush1.bf16.msra.mxu1 %v3150_v37 }
 0x1b2   : > { %3170 = vmatprep.subr.msk.bf16.mxu1 %vm3984_vm6, %v3990_v2  ;;  %v1375_v2 = vld [vmem:[%s5482_s3 + $0x10] sm:$0xff] }
 0x1b4   : > { %3085 = vmatmul.mubr.msk.f32.vlgmr.msra.gmra.mrb[16].mxu0 %vm1429_vm14, %v1373_v47  ;;  %3090 = vmatmul.mubr.msk.f32.vlgmr.msra.gmra.mrb[0].mxu1 %vm1429_vm14, %v1378_v10 }
 0x1b5   : > { %1524 = vmatprep.mubr.f32.mxu0 %v5531_v46  ;;  %1554 = vmatprep.mubr.f32.mxu1 %v5531_v46 }
 0x1b6   : > { %3173 = vmatpush1.bf16.msk.msra.mxu1 %vm3984_vm6, %v3988_v63  ;;  %v1377_v63 = vld [vmem:[%s5482_s3 + $0x20] sm:$0xff] }
 0x1b8   : > { %3086 = vmatmul.mubr.msk.f32.gmra.mrb[18].mxu0 %vm1429_vm14, %v1374_v51  ;;  %3091 = vmatmul.mubr.msk.f32.gmra.mrb[2].mxu1 %vm1429_vm14, %v1379_v7 }
 0x1b9   : > { %1530 = vmatprep.mubr.f32.mxu0 %v5531_v46  ;;  %1560 = vmatprep.mubr.f32.mxu1 %v5531_v46 }
 0x1bc   : > { %3087 = vmatmul.mubr.msk.f32.gmra.mrb[20].mxu0 %vm1429_vm14, %v1375_v2  ;;  %3092 = vmatmul.mubr.msk.f32.gmra.mrb[4].mxu1 %vm1429_vm14, %v1380_v55 }
 0x1bd   : > { %1536 = vmatprep.mubr.f32.mxu0 %v5531_v46  ;;  %2328 = vmatprep.mubr.f32.mxu1 %v5531_v46 }
 0x1c0   : > { %3088 = vmatmul.mubr.msk.f32.gmra.mrb[22].mxu0 %vm1429_vm14, %v1376_v1 }
 0x1c1   : > { %1542 = vmatprep.mubr.f32.mxu0 %v5531_v46 }
 0x1c4   : > { %3089 = vmatmul.mubr.msk.f32.gmra.mrb[24].mxu0 %vm1429_vm14, %v1377_v63 }
 0x1c5   : > { %1957 = vmatprep.mubr.f32.mxu0 %v5531_v46 }
 0x287   : > { %v1520_v54 = vpop.f32.mrb[16].mxu0  ;;  %v1550_v34 = vpop.f32.mrb[0].mxu1 }
 0x288   : > { %v4392_v40 = vadd.f32 %v1520_v54, %v1392_v32  ;;  %v4394_v29 = vadd.f32 %v1550_v34, %v1417_v57  ;;  %v1522_v48 = vpop.f32.mrb[17].mxu0  ;;  %v1552_v26 = vpop.f32.mrb[1].mxu1 }
 0x289   : > { %v4404_v53 = vadd.f32 %v1522_v48, %v1392_v32  ;;  %v4406_v22 = vadd.f32 %v1552_v26, %v1417_v57 }
 0x28a   : > { %v4397_v52 = vmul.f32 100.0, %v4392_v40  ;;  %v4400_v33 = vmul.f32 100.0, %v4394_v29 }
 0x28b   : > { %v1526_v56 = vpop.f32.mrb[18].mxu0  ;;  %v1556_v50 = vpop.f32.mrb[2].mxu1  ;;  %v4427_v58 = vmul.f32 100.0, %v4404_v53  ;;  %v4430_v27 = vmul.f32 100.0, %v4406_v22 }
 0x28c   : > { %v1583_v3 = vmin.f32 %v4397_v52, 20.0  ;;  %v1593_v25 = vmin.f32 %v4400_v33, 20.0  ;;  %v1528_v20 = vpop.f32.mrb[19].mxu0  ;;  %v1558_v31 = vpop.f32.mrb[3].mxu1  ;;  %v4408_v17 = vadd.f32 %v1526_v56, %v1397_v5  ;;  %v4410_v42 = vadd.f32 %v1556_v50, %v1422_v35 }
 0x28d   : > { %v4418_v37 = vadd.f32 %v1528_v20, %v1397_v5  ;;  %v4420_v8 = vadd.f32 %v1558_v31, %v1422_v35  ;;  %v1584_v38 = vmin.f32 %v4427_v58, 20.0  ;;  %v1594_v14 = vmin.f32 %v4430_v27, 20.0 }
 0x28e   : > { %v1599_v59 = vmul.f32 1.442695, %v1583_v3  ;;  %v1619_v15 = vmul.f32 1.442695, %v1593_v25  ;;  %v4413_v18 = vmul.f32 100.0, %v4408_v17  ;;  %v4416_v61 = vmul.f32 100.0, %v4410_v42 }
 0x28f   : > { %v1532_v43 = vpop.f32.mrb[20].mxu0  ;;  %v1562_v49 = vpop.f32.mrb[4].mxu1  ;;  %v4435_v62 = vmul.f32 100.0, %v4418_v37  ;;  %v4438_v16 = vmul.f32 100.0, %v4420_v8  ;;  %v1601_v32 = vmul.f32 1.442695, %v1584_v38 }
 0x290   : > { %3375 = vpow2.f32 %v1599_v59  ;;  %v1534_v28 = vpop.f32.mrb[21].mxu0  ;;  %v1564_v19 = vpop.f32.mrb[5].mxu1  ;;  %v4422_v4 = vadd.f32 %v1532_v43, %v1402_v21  ;;  %v4424_v11 = vadd.f32 %v1562_v49, %v1427_v9  ;;  %v1585_v39 = vmin.f32 %v4413_v18, 20.0 }
 0x291   : > { %3377 = vpow2.f32 %v1619_v15  ;;  %v1595_v6 = vmin.f32 %v4416_v61, 20.0  ;;  %v4448_v60 = vadd.f32 %v1534_v28, %v1402_v21  ;;  %v1586_v51 = vmin.f32 %v4435_v62, 20.0 }
 0x292   : > { %v1603_v13 = vmul.f32 1.442695, %v1585_v39  ;;  %v4441_v45 = vmul.f32 100.0, %v4422_v4  ;;  %v4444_v12 = vmul.f32 100.0, %v4424_v11  ;;  %v1596_v2 = vmin.f32 %v4438_v16, 20.0 }
 0x293   : > { %v1538_v0 = vpop.f32.mrb[22].mxu0  ;;  %v1623_v30 = vmul.f32 1.442695, %v1595_v6  ;;  %v1621_v5 = vmul.f32 1.442695, %v1594_v14  ;;  %v4459_v21 = vadd.f32 %v1564_v19, %v1427_v9  ;;  %v4464_v34 = vmul.f32 100.0, %v4448_v60 }
 0x294   : > { %v1540_v41 = vpop.f32.mrb[23].mxu0  ;;  %3379 = vpow2.f32 %v1603_v13  ;;  %v1587_v23 = vmin.f32 %v4441_v45, 20.0  ;;  %v1597_v36 = vmin.f32 %v4444_v12, 20.0  ;;  %v4453_v47 = vadd.f32 %v1538_v0, %v4388_v44 }
 0x295   : > { %3381 = vpow2.f32 %v1623_v30  ;;  %v1605_v26 = vmul.f32 1.442695, %v1586_v51  ;;  %v1625_v56 = vmul.f32 1.442695, %v1596_v2  ;;  %v4471_v3 = vmul.f32 100.0, %v4459_v21 }
 0x296   : > { %v1607_v55 = vmul.f32 1.442695, %v1587_v23  ;;  %v1627_v1 = vmul.f32 1.442695, %v1597_v36  ;;  %v4467_v48 = vmul.f32 100.0, %v4453_v47  ;;  %v1588_v25 = vmin.f32 %v4464_v34, 20.0 }
 0x297   : > { %v1544_v10 = vpop.f32.mrb[24].mxu0  ;;  %v4476_v9 = vadd.f32 %v1540_v41, %v4388_v44  ;;  %v1598_v39 = vmin.f32 %v4471_v3, 20.0  ;;  %vm1791_vm15 = vcmp.gt.f32.partialorder %v4397_v52, 20.0  ;;  %vm1793_vm1 = vcmp.gt.f32.partialorder %v4413_v18, 20.0 }
 0x298   : > { %v4456_v7 = vpop.f32.mrb[25].mxu0  ;;  %3383 = vpow2.f32 %v1607_v55  ;;  %v1589_v20 = vmin.f32 %v4467_v48, 20.0  ;;  %v4479_v59 = vadd.f32 %v1544_v10, %v4390_v24  ;;  %v1609_v44 = vmul.f32 1.442695, %v1588_v25 }
 0x299   : > { %3385 = vpow2.f32 %v1627_v1  ;;  %v4484_v6 = vmul.f32 100.0, %v4476_v9  ;;  %v1629_v1 = vmul.f32 1.442695, %v1598_v39  ;;  %vm1803_vm4 = vcmp.gt.f32.partialorder %v4416_v61, 20.0 }
 0x29a   : > { %v3376_v63 = vpop.eup %3375  ;;  %v1611_v28 = vmul.f32 1.442695, %v1589_v20  ;;  %v4487_v13 = vmul.f32 100.0, %v4479_v59  ;;  %vm1805_vm8 = vcmp.gt.f32.partialorder %v4444_v12, 20.0  ;;  %vm1792_vm11 = vcmp.gt.f32.partialorder %v4427_v58, 20.0 }
 0x29b   : > { %v4461_v57 = vpop.eup %3377  ;;  %v1631_v54 = vadd.f32 1.0, %v3376_v63  ;;  %v1634_v35 = vmul.f32 -0.5, %v3376_v63  ;;  %v1637_v41 = vand.u32 2147483647, %v3376_v63  ;;  %v1590_v10 = vmin.f32 %v4484_v6, 20.0 }
 0x29c   : > { %v1721_v50 = vadd.f32 1.0, %v4461_v57  ;;  %v1724_v43 = vmul.f32 -0.5, %v4461_v57  ;;  %vm1794_vm12 = vcmp.gt.f32.partialorder %v4435_v62, 20.0  ;;  %vm1795_vm13 = vcmp.gt.f32.partialorder %v4441_v45, 20.0 }
 0x29d   : > { %3387 = vlog2.f32 %v1631_v54  ;;  %v1635_v30 = vadd.f32 1.0, %v1634_v35  ;;  %vm4500_vm6 = vcmp.lt.f32.partialorder %v1637_v41, 0.0004427343 }
 0x29e   : > { %3389 = vpow2.f32 %v1601_v32  ;;  %v3380_v31 = vpop.eup %3379  ;;  %v1725_v23 = vadd.f32 1.0, %v1724_v43  ;;  %v1591_v32 = vmin.f32 %v4487_v13, 20.0 }
 0x29f   : > { %3391 = vpow2.f32 %v1621_v5  ;;  %v3382_v15 = vpop.eup %3381  ;;  %v1649_v49 = vadd.f32 1.0, %v3380_v31  ;;  %v1652_v0 = vmul.f32 -0.5, %v3380_v31  ;;  %v1655_v2 = vand.u32 2147483647, %v3380_v31 }
 0x2a0   : > { %3393 = vpow2.f32 %v1605_v26  ;;  %v1739_v19 = vadd.f32 1.0, %v3382_v15  ;;  %v1742_v36 = vmul.f32 -0.5, %v3382_v15  ;;  %v1745_v26 = vand.u32 2147483647, %v3382_v15 }
 0x2a1   : > { %3395 = vpow2.f32 %v1625_v56  ;;  %v1653_v54 = vadd.f32 1.0, %v1652_v0  ;;  %v1636_v20 = vmul.f32 %v3376_v63, %v1635_v30  ;;  %vm4512_vm0 = vcmp.lt.f32.partialorder %v1655_v2, 0.0004427343 }
 0x2a2   : > { %3397 = vlog2.f32 %v1721_v50  ;;  %v4490_v14 = vpop.eup %3383  ;;  %vm4520_vm3 = vcmp.lt.f32.partialorder %v1745_v26, 0.0004427343 }
 0x2a3   : > { %3399 = vlog2.f32 %v1649_v49  ;;  %v4493_v51 = vpop.eup %3385  ;;  %v1667_v55 = vadd.f32 1.0, %v4490_v14  ;;  %v4507_v49 = vmul.f32 %v4461_v57, %v1725_v23  ;;  %v1654_v41 = vmul.f32 %v3380_v31, %v1653_v54 }
 0x2a4   : > { %3401 = vlog2.f32 %v1739_v19  ;;  %v1757_v56 = vadd.f32 1.0, %v4493_v51  ;;  %v1613_v19 = vmul.f32 1.442695, %v1590_v10  ;;  %v1760_v63 = vmul.f32 -0.5, %v4493_v51 }
 0x2a5   : > { %3403 = vpow2.f32 %v1611_v28  ;;  %v1743_v28 = vadd.f32 1.0, %v1742_v36  ;;  %v1670_v36 = vmul.f32 -0.5, %v4490_v14  ;;  %v1673_v10 = vand.u32 2147483647, %v4490_v14 }
 0x2a6   : > { %3405 = vpow2.f32 %v1609_v44  ;;  %v1615_v44 = vmul.f32 1.442695, %v1591_v32  ;;  %v1763_v54 = vand.u32 2147483647, %v4493_v51  ;;  %v1761_v46 = vadd.f32 1.0, %v1760_v63 }
 0x2a7   : > { %v3388_v5 = vpop.eup %3387  ;;  %3407 = vlog2.f32 %v1667_v55  ;;  %vm4544_vm5 = vcmp.lt.f32.partialorder %v1673_v10, 0.0004427343 }
 0x2a8   : > { %v4498_v50 = vpop.eup %3389  ;;  %v1633_v25 = vmul.f32 0.6931472, %v3388_v5  ;;  %3409 = vlog2.f32 %v1757_v56  ;;  %v1744_v5 = vmul.f32 %v3382_v15, %v1743_v28  ;;  %v1671_v28 = vadd.f32 1.0, %v1670_v36 }
 0x2a9   : > { %v4504_v43 = vpop.eup %3391  ;;  %3411 = vpow2.f32 %v1629_v1  ;;  %v4530_v1 = vadd.f32 %v4456_v7, %v4390_v24  ;;  %v1640_v32 = vadd.f32 1.0, %v4498_v50  ;;  %v1643_v15 = vmul.f32 -0.5, %v4498_v50 }
 0x2aa   : > { %v4509_v39 = vpop.eup %3393  ;;  %v1639_v55 = vsel %vm4500_vm6, %v1636_v20, %v1633_v25  ;;  %3413 = vpow2.f32 %v1615_v44  ;;  %v1762_v10 = vmul.f32 %v4493_v51, %v1761_v46  ;;  %vm4564_vm10 = vcmp.lt.f32.partialorder %v1763_v54, 0.0004427343 }
 0x2ab   : > { %v4518_v30 = vpop.eup %3395  ;;  %3415 = vpow2.f32 %v1613_v19  ;;  %v1658_v26 = vadd.f32 1.0, %v4509_v39  ;;  %v4536_v35 = vmul.f32 100.0, %v4530_v1  ;;  %v1775_v24 = vmul.f32 0.01, %v1639_v55 }
 0x2ac   : > { %v3398_v2 = vpop.eup %3397  ;;  %3417 = vlog2.f32 %v1640_v32  ;;  %v1644_v46 = vadd.f32 1.0, %v1643_v15  ;;  %v1661_v52 = vmul.f32 -0.5, %v4509_v39  ;;  %vm1797_vm6 = vcmp.gt.f32.partialorder %v4467_v48, 20.0 }
 0x2ad   : > { %v3400_v31 = vpop.eup %3399  ;;  %3419 = vlog2.f32 %v1658_v26  ;;  %v4552_v55 = vmul.f32 0.6931472, %v3398_v2  ;;  %v1592_v0 = vmin.f32 %v4536_v35, 20.0 }
 0x2ae   : > { %v3402_v56 = vpop.eup %3401  ;;  %v1651_v38 = vmul.f32 0.6931472, %v3400_v31 }
 0x2af   : > { %v4538_v25 = vpop.eup %3403  ;;  %v1741_v7 = vmul.f32 0.6931472, %v3402_v56  ;;  %v1617_v56 = vmul.f32 1.442695, %v1592_v0  ;;  %v1645_v0 = vmul.f32 %v4498_v50, %v1644_v46 }
 0x2b0   : > { %v1657_v20 = vsel %vm4512_vm0, %v1654_v41, %v1651_v38  ;;  %v1685_v63 = vadd.f32 1.0, %v4538_v25  ;;  %v4550_v44 = vpop.eup %3405  ;;  %v5540_v41 = vand.u32 2147483647, %v4461_v57  ;;  %v1688_v2 = vmul.f32 -0.5, %v4538_v25 }
 0x2b1   : > { %v1777_v32 = vmul.f32 0.01, %v1657_v20  ;;  %v1747_v31 = vsel %vm4520_vm3, %v1744_v5, %v1741_v7  ;;  %v3408_v38 = vpop.eup %3407  ;;  %v4572_v5 = vsel %vm1791_vm15, %v4392_v40, %v1775_v24  ;;  %v1646_v40 = vand.u32 2147483647, %v4498_v50 }
 0x2b2   : > { %vm4559_vm9 = vcmp.lt.f32.partialorder %v5540_v41, 0.0004427343  ;;  %3421 = vlog2.f32 %v1685_v63  ;;  %v3410_v23 = vpop.eup %3409  ;;  %v1787_v7 = vmul.f32 0.01, %v1747_v31  ;;  %v1669_v20 = vmul.f32 0.6931472, %v3408_v38 }
 0x2b3   : > { %v4577_v57 = vsel %vm1793_vm1, %v4408_v17, %v1777_v32  ;;  %v4579_v51 = vpop.eup %3411  ;;  %v1759_v63 = vmul.f32 0.6931472, %v3410_v23  ;;  %v1672_v41 = vmul.f32 %v4490_v14, %v1671_v28  ;;  %3423 = vpow2.f32 %v1617_v56 }
 0x2b4   : > { %v3154_v54 = vpack.c.bf16 %v4577_v57, %v4572_v5  ;;  %v4586_v18 = vpop.eup %3413  ;;  %v1689_v24 = vadd.f32 1.0, %v1688_v2  ;;  %v1691_v15 = vand.u32 2147483647, %v4538_v25  ;;  %v1676_v32 = vadd.f32 1.0, %v4550_v44 }
 0x2b5   : > { %v1765_v17 = vsel %vm4564_vm10, %v1762_v10, %v1759_v63  ;;  %v4594_v14 = vpop.eup %3415  ;;  %v1703_v31 = vadd.f32 1.0, %v4586_v18  ;;  %v1664_v38 = vand.u32 2147483647, %v4509_v39  ;;  %v4602_v26 = vsel %vm1803_vm4, %v4410_v42, %v1787_v7 }
 0x2b6   : > { %v1789_v28 = vmul.f32 0.01, %v1765_v17  ;;  %v3418_v23 = vpop.eup %3417  ;;  %v1675_v10 = vsel %vm4544_vm5, %v1672_v41, %v1669_v20  ;;  %v1662_v2 = vadd.f32 1.0, %v1661_v52  ;;  %3425 = vlog2.f32 %v1676_v32 }
 0x2b7   : > { %v3420_v56 = vpop.eup %3419  ;;  %3427 = vlog2.f32 %v1703_v31  ;;  %v1706_v61 = vmul.f32 -0.5, %v4586_v18  ;;  %v1679_v42 = vmul.f32 -0.5, %v4550_v44  ;;  %v1642_v46 = vmul.f32 0.6931472, %v3418_v23 }
 0x2b8   : > { %v4610_v50 = vsel %vm1805_vm8, %v4424_v11, %v1789_v28  ;;  %v1660_v7 = vmul.f32 0.6931472, %v3420_v56  ;;  %v1663_v20 = vmul.f32 %v4509_v39, %v1662_v2  ;;  %v1729_v11 = vsel %vm4559_vm9, %v4507_v49, %v4552_v55 }
 0x2b9   : > { %v3166_v19 = vpack.c.bf16 %v4610_v50, %v4602_v26  ;;  %vm1647_vm15 = vcmp.lt.f32.partialorder %v1646_v40, 0.0004427343  ;;  %vm1665_vm0 = vcmp.lt.f32.partialorder %v1664_v38, 0.0004427343  ;;  %v1694_v12 = vadd.f32 1.0, %v4594_v14  ;;  %v1828_v26 = vld [vmem:[%s5484_s5 + $0x28] sm:$0xff] }
 0x2ba   : > { %v1779_v41 = vmul.f32 0.01, %v1675_v10  ;;  %vm4623_vm1 = vcmp.lt.f32.partialorder %v1691_v15, 0.0004427343  ;;  %v1648_v17 = vsel %vm1647_vm15, %v1645_v0, %v1642_v46  ;;  %v1666_v32 = vsel %vm1665_vm0, %v1663_v20, %v1660_v7  ;;  %v1829_v50 = vld [vmem:[%s5484_s5 + $0x30] sm:$0x1] }
 0x2bb   : > { %v1690_v39 = vmul.f32 %v4538_v25, %v1689_v24  ;;  %v1776_v31 = vmul.f32 0.01, %v1648_v17  ;;  %v1778_v23 = vmul.f32 0.01, %v1666_v32  ;;  %v1707_v2 = vadd.f32 1.0, %v1706_v61 }
 0x2bc   : > { %v3422_v63 = vpop.eup %3421  ;;  %v1709_v49 = vand.u32 2147483647, %v4586_v18  ;;  %v1680_v55 = vadd.f32 1.0, %v1679_v42  ;;  %3429 = vlog2.f32 %v1694_v12  ;;  %v1730_v24 = vadd.f32 1.0, %v4504_v43 }
 0x2bd   : > { %v1687_v28 = vmul.f32 0.6931472, %v3422_v63  ;;  %v4629_v36 = vpop.eup %3423  ;;  %v1808_v15 = vsel %vm1792_vm11, %v4404_v53, %v1776_v31  ;;  %v1810_v25 = vsel %vm1794_vm12, %v4418_v37, %v1778_v23  ;;  %v1697_v10 = vmul.f32 -0.5, %v4594_v14 }
 0x2be   : > { %v3152_v38 = vpack.c.bf16 %v1810_v25, %v1808_v15  ;;  %v1712_v56 = vadd.f32 1.0, %v4629_v36  ;;  %v1785_v61 = vmul.f32 0.01, %v1729_v11  ;;  %v4645_v42 = vsel %vm1795_vm13, %v4422_v4, %v1779_v41 }
 0x2bf   : > { %v1693_v40 = vsel %vm4623_vm1, %v1690_v39, %v1687_v28  ;;  %v1682_v53 = vand.u32 2147483647, %v4550_v44  ;;  %3431 = vlog2.f32 %v1730_v24  ;;  %vm4653_vm3 = vcmp.lt.f32.partialorder %v1709_v49, 0.0004427343 }
 0x2c0   : > { %v1781_v0 = vmul.f32 0.01, %v1693_v40  ;;  %v3426_v58 = vpop.eup %3425  ;;  %3153 = vmatprep.subr.bf16.mxu0 %v3152_v38  ;;  %3433 = vlog2.f32 %v1712_v56  ;;  %v1748_v46 = vadd.f32 1.0, %v4518_v30  ;;  %v1708_v7 = vmul.f32 %v4586_v18, %v1707_v2 }
 0x2c1   : > { %v3428_v45 = vpop.eup %3427  ;;  %3155 = vmatpush1.bf16.msra.mxu0 %v3154_v54  ;;  %v1681_v48 = vmul.f32 %v4550_v44, %v1680_v55  ;;  %v1698_v11 = vadd.f32 1.0, %v1697_v10  ;;  %v1733_v12 = vmul.f32 -0.5, %v4504_v43  ;;  %vm1801_vm4 = vcmp.gt.f32.partialorder %v4400_v33, 20.0 }
 0x2c2   : > { %v4651_v37 = vsel %vm1797_vm6, %v4453_v47, %v1781_v0  ;;  %v1678_v47 = vmul.f32 0.6931472, %v3426_v58  ;;  %v1705_v20 = vmul.f32 0.6931472, %v3428_v45  ;;  %3435 = vlog2.f32 %v1748_v46 }
 0x2c3   : > { %v3158_v4 = vpack.c.bf16 %v4651_v37, %v4645_v42  ;;  %vm4667_vm5 = vcmp.lt.f32.partialorder %v1682_v53, 0.0004427343  ;;  %v1700_v18 = vand.u32 2147483647, %v4594_v14  ;;  %v1715_v41 = vmul.f32 -0.5, %v4629_v36 }
 0x2c4   : > { %v1711_v5 = vsel %vm4653_vm3, %v1708_v7, %v1705_v20  ;;  %v1684_v44 = vsel %vm4667_vm5, %v1681_v48, %v1678_v47  ;;  %v1751_v57 = vmul.f32 -0.5, %v4518_v30  ;;  %v1766_v54 = vadd.f32 1.0, %v4579_v51 }
 0x2c5   : > { %v1817_v33 = vsel %vm1801_vm4, %v4394_v29, %v1785_v61  ;;  %v1783_v52 = vmul.f32 0.01, %v1711_v5  ;;  %vm1799_vm8 = vcmp.gt.f32.partialorder %v4487_v13, 20.0  ;;  %v1718_v17 = vand.u32 2147483647, %v4629_v36  ;;  %v2235_v5 = vld [vmem:[%s5487_s8 + $0x18] sm:$0xff] }
 0x2c6   : > { %v3430_v32 = vpop.eup %3429  ;;  %v1699_v28 = vmul.f32 %v4594_v14, %v1698_v11  ;;  %v1734_v39 = vadd.f32 1.0, %v1733_v12  ;;  %v1736_v31 = vand.u32 2147483647, %v4504_v43  ;;  %3437 = vlog2.f32 %v1766_v54  ;;  %v2238_v54 = vld [vmem:[%s5487_s8 + $0x30] sm:$0xff] }
 0x2c7   : > { %v1815_v23 = vsel %vm1799_vm8, %v4479_v59, %v1783_v52  ;;  %v1696_v2 = vmul.f32 0.6931472, %v3430_v32  ;;  %v1780_v49 = vmul.f32 0.01, %v1684_v44  ;;  %v1716_v55 = vadd.f32 1.0, %v1715_v41  ;;  %v2234_v41 = vld [vmem:[%s5487_s8 + $0x10] sm:$0xff]  ;;  %v1840_v52 = vpop.permute.xlu0 %1839 }
 0x2c8   : > { %v3162_v40 = vpack.c.bf16 %v1817_v33, %v1815_v23  ;;  %vm1701_vm9 = vcmp.lt.f32.partialorder %v1700_v18, 0.0004427343  ;;  %v1752_v29 = vadd.f32 1.0, %v1751_v57  ;;  %v1769_v15 = vmul.f32 -0.5, %v4579_v51  ;;  %v2236_v44 = vld [vmem:[%s5487_s8 + $0x20] sm:$0xff]  ;;  %v2237_v57 = vld [vmem:[%s5487_s8 + $0x28] sm:$0xff]  ;;  %v1845_v23 = vpop.permute.xlu1 %1844 }
 0x2c9   : > { %v3432_v13 = vpop.eup %3431  ;;  %vm1796_vm10 = vcmp.gt.f32.partialorder %v4464_v34, 20.0  ;;  %vm1798_vm11 = vcmp.gt.f32.partialorder %v4484_v6, 20.0  ;;  %v1702_v14 = vsel %vm1701_vm9, %v1699_v28, %v1696_v2  ;;  %vm4688_vm12 = vcmp.lt.f32.partialorder %v1718_v17, 0.0004427343  ;;  %v2239_v33 = vld [vmem:[%s5487_s8 + $0x38] sm:$0xff] }
 0x2ca   : > { %v3434_v24 = vpop.eup %3433  ;;  %v1782_v59 = vmul.f32 0.01, %v1702_v14  ;;  %v1732_v0 = vmul.f32 0.6931472, %v3432_v13  ;;  %v1735_v38 = vmul.f32 %v4504_v43, %v1734_v39  ;;  %v1754_v10 = vand.u32 2147483647, %v4518_v30 }
 0x2cb   : > { %v1812_v56 = vsel %vm1796_vm10, %v4448_v60, %v1780_v49  ;;  %v1714_v61 = vmul.f32 0.6931472, %v3434_v24  ;;  %v1717_v53 = vmul.f32 %v4629_v36, %v1716_v55  ;;  %vm1737_vm13 = vcmp.lt.f32.partialorder %v1736_v31, 0.0004427343  ;;  %v1850_v14 = vpop.permute.xlu0 %1849 }
 0x2cc   : > { %v3436_v34 = vpop.eup %3435  ;;  %v1814_v6 = vsel %vm1798_vm11, %v4476_v9, %v1782_v59  ;;  %v1738_v58 = vsel %vm1737_vm13, %v1735_v38, %v1732_v0  ;;  %v1753_v62 = vmul.f32 %v4518_v30, %v1752_v29  ;;  %v1770_v46 = vadd.f32 1.0, %v1769_v15 }
 0x2cd   : > { %v3156_v45 = vpack.c.bf16 %v1814_v6, %v1812_v56  ;;  %v1720_v7 = vsel %vm4688_vm12, %v1717_v53, %v1714_v61  ;;  %v1786_v43 = vmul.f32 0.01, %v1738_v58  ;;  %v1750_v47 = vmul.f32 0.6931472, %v3436_v34  ;;  %v1855_v34 = vpop.permute.xlu1 %1854 }
 0x2ce   : > { %v1784_v48 = vmul.f32 0.01, %v1720_v7  ;;  %vm1755_vm6 = vcmp.lt.f32.partialorder %v1754_v10, 0.0004427343  ;;  %v1772_v60 = vand.u32 2147483647, %v4579_v51  ;;  %v1771_v63 = vmul.f32 %v4579_v51, %v1770_v46 }
 0x2cf   : > { %vm1802_vm15 = vcmp.gt.f32.partialorder %v4430_v27, 20.0  ;;  %vm1800_vm0 = vcmp.gt.f32.partialorder %v4536_v35, 20.0  ;;  %3157 = vmatprep.subr.bf16.mxu0 %v3156_v45  ;;  %v1756_v9 = vsel %vm1755_vm6, %v1753_v62, %v1750_v47  ;;  %vm1804_vm3 = vcmp.gt.f32.partialorder %v4438_v16, 20.0  ;;  %v1825_v16 = vld [vmem:[%s5484_s5 + $0x10] sm:$0xff] }
 0x2d0   : > { %v3438_v36 = vpop.eup %3437  ;;  %3159 = vmatpush1.bf16.msra.mxu0 %v3158_v4  ;;  %v1816_v30 = vsel %vm1800_vm0, %v4530_v1, %v1784_v48  ;;  %v1818_v20 = vsel %vm1802_vm15, %v4406_v22, %v1786_v43  ;;  %vm1773_vm1 = vcmp.lt.f32.partialorder %v1772_v60, 0.0004427343  ;;  %v1788_v18 = vmul.f32 0.01, %v1756_v9  ;;  %v1823_v22 = vld [vmem:[%s5484_s5] sm:$0xff]  ;;  %v2233_v4 = vld [vmem:[%s5487_s8 + $0x8] sm:$0xff]  ;;  %v1860_v60 = vpop.permute.xlu0 %1859 }
 0x2d1   : > { %v3160_v11 = vpack.c.bf16 %v1818_v20, %v1816_v30  ;;  %v1768_v12 = vmul.f32 0.6931472, %v3438_v36  ;;  %vm1806_vm4 = vcmp.gt.f32.partialorder %v4471_v3, 20.0  ;;  %v5553_v51 = vmov 0.0   ;;  %v1827_v3 = vld [vmem:[%s5484_s5 + $0x20] sm:$0xff] }
 0x2d2   : > { %v1820_v42 = vsel %vm1804_vm3, %v4420_v8, %v1788_v18  ;;  %v1824_v8 = vld [vmem:[%s5484_s5 + $0x8] sm:$0xff] }
 0x2d3   : > { %3161 = vmatprep.subr.bf16.mxu0 %v3160_v11  ;;  %v1774_v27 = vsel %vm1773_vm1, %v1771_v63, %v1768_v12 }
 0x2d4   : > { %3163 = vmatpush1.bf16.msra.mxu0 %v3162_v40  ;;  %v1790_v35 = vmul.f32 0.01, %v1774_v27 }
 0x2d6   : > { %v1822_v1 = vsel %vm1806_vm4, %v4459_v21, %v1790_v35  ;;  %v1826_v21 = vld [vmem:[%s5484_s5 + $0x18] sm:$0xff] }
 0x2d7   : > { %v3164_v37 = vpack.c.bf16 %v1822_v1, %v1820_v42 }
 0x2d9   : > { %3165 = vmatprep.subr.bf16.mxu0 %v3164_v37 }
 0x2da   : > { %3167 = vmatpush1.bf16.msra.mxu0 %v3166_v19  ;;  %v2232_v19 = vld [vmem:[%s5487_s8] sm:$0xff] }
 0x2db   : > { %3102 = vmatmul.mubr.msk.f32.vlgmr.msra.gmra.mrb[6].mxu1 %vm971_vm7, %v2232_v19 }
 0x2dc   : > { %2334 = vmatprep.mubr.f32.mxu1 %v5553_v51 }
 0x2dd   : > { %3093 = vmatmul.mubr.msk.f32.vlgmr.msra.gmra.mrb[26].mxu0 %vm1429_vm14, %v1823_v22 }
 0x2de   : > { %1963 = vmatprep.mubr.f32.mxu0 %v5553_v51 }
 0x2df   : > { %3103 = vmatmul.mubr.msk.f32.gmra.mrb[8].mxu1 %vm971_vm7, %v2233_v4 }
 0x2e0   : > { %2340 = vmatprep.mubr.f32.mxu1 %v5553_v51 }
 0x2e1   : > { %3094 = vmatmul.mubr.msk.f32.gmra.mrb[28].mxu0 %vm1429_vm14, %v1824_v8  ;;  %v1865_v8 = vpop.permute.xlu1 %1864 }
 0x2e2   : > { %1969 = vmatprep.mubr.f32.mxu0 %v5553_v51 }
 0x2e3   : > { %3104 = vmatmul.mubr.msk.f32.gmra.mrb[10].mxu1 %vm971_vm7, %v2234_v41 }
 0x2e4   : > { %2346 = vmatprep.mubr.f32.mxu1 %v5553_v51 }
 0x2e5   : > { %3095 = vmatmul.mubr.msk.f32.gmra.mrb[30].mxu0 %vm1429_vm14, %v1825_v16 }
 0x2e6   : > { %1975 = vmatprep.mubr.f32.mxu0 %v5553_v51 }
 0x2e7   : > { %3105 = vmatmul.mubr.msk.f32.gmra.mrb[12].mxu1 %vm971_vm7, %v2235_v5 }
 0x2e8   : > { %2352 = vmatprep.mubr.f32.mxu1 %v5553_v51 }
 0x2e9   : > { %3096 = vmatmul.mubr.msk.f32.gmra.mrb[32].mxu0 %vm1429_vm14, %v1826_v21 }
 0x2ea   : > { %1981 = vmatprep.mubr.f32.mxu0 %v5553_v51 }
 0x2eb   : > { %3106 = vmatmul.mubr.msk.f32.gmra.mrb[14].mxu1 %vm971_vm7, %v2236_v44 }
 0x2ec   : > { %2358 = vmatprep.mubr.f32.mxu1 %v5553_v51 }
 0x2ed   : > { %3097 = vmatmul.mubr.msk.f32.gmra.mrb[34].mxu0 %vm1429_vm14, %v1827_v3 }
 0x2ee   : > { %1987 = vmatprep.mubr.f32.mxu0 %v5553_v51 }
 0x2ef   : > { %3107 = vmatmul.mubr.msk.f32.gmra.mrb[16].mxu1 %vm971_vm7, %v2237_v57 }
 0x2f0   : > { %2364 = vmatprep.mubr.f32.mxu1 %v5553_v51 }
 0x2f1   : > { %3098 = vmatmul.mubr.msk.f32.gmra.mrb[36].mxu0 %vm1429_vm14, %v1828_v26 }
 0x2f2   : > { %1993 = vmatprep.mubr.f32.mxu0 %v5553_v51 }
 0x2f3   : > { %3108 = vmatmul.mubr.msk.f32.gmra.mrb[18].mxu1 %vm971_vm7, %v2238_v54  ;;  %v1870_v54 = vpop.permute.xlu0 %1869 }
 0x2f4   : > { %2370 = vmatprep.mubr.f32.mxu1 %v5553_v51 }
 0x2f5   : > { %3099 = vmatmul.mubr.msk.f32.gmra.mrb[38].mxu0 %vm1429_vm14, %v1829_v50 }
 0x2f6   : > { %2925 = vmatprep.mubr.f32.mxu0 %v5553_v51 }
 0x2f7   : > { %3109 = vmatmul.mubr.msk.f32.gmra.mrb[20].mxu1 %vm971_vm7, %v2239_v33 }
 0x2f8   : > { %2472 = vmatprep.mubr.f32.mxu1 %v5553_v51 }
 0x3b0   : > { %v1959_v17 = vpop.f32.mrb[26].mxu0 }
 0x3b1   : > { %v4791_v32 = vadd.f32 %v1959_v17, %v1840_v52  ;;  %v1961_v28 = vpop.f32.mrb[27].mxu0 }
 0x3b2   : > { %v4796_v31 = vadd.f32 %v1961_v28, %v1840_v52 }
 0x3b3   : > { %v4794_v39 = vmul.f32 100.0, %v4791_v32 }
 0x3b4   : > { %v1965_v2 = vpop.f32.mrb[28].mxu0  ;;  %v4802_v15 = vmul.f32 100.0, %v4796_v31 }
 0x3b5   : > { %v2014_v49 = vmin.f32 %v4794_v39, 20.0  ;;  %v4799_v55 = vadd.f32 %v1965_v2, %v1845_v23  ;;  %v1967_v40 = vpop.f32.mrb[29].mxu0  ;;  %vm2196_vm5 = vcmp.gt.f32.partialorder %v4794_v39, 20.0 }
 0x3b6   : > { %v4807_v25 = vadd.f32 %v1967_v40, %v1845_v23  ;;  %v2015_v10 = vmin.f32 %v4802_v15, 20.0  ;;  %vm2197_vm6 = vcmp.gt.f32.partialorder %v4802_v15, 20.0 }
 0x3b7   : > { %v2028_v29 = vmul.f32 1.442695, %v2014_v49  ;;  %v4805_v13 = vmul.f32 100.0, %v4799_v55 }
 0x3b8   : > { %v1971_v24 = vpop.f32.mrb[30].mxu0  ;;  %v4819_v6 = vmul.f32 100.0, %v4807_v25  ;;  %v2030_v7 = vmul.f32 1.442695, %v2015_v10 }
 0x3b9   : > { %3439 = vpow2.f32 %v2028_v29  ;;  %v2016_v59 = vmin.f32 %v4805_v13, 20.0  ;;  %v4810_v0 = vadd.f32 %v1971_v24, %v1850_v14  ;;  %v1973_v38 = vpop.f32.mrb[31].mxu0  ;;  %vm2198_vm8 = vcmp.gt.f32.partialorder %v4805_v13, 20.0 }
 0x3ba   : > { %v4816_v53 = vadd.f32 %v1973_v38, %v1850_v14  ;;  %v2017_v9 = vmin.f32 %v4819_v6, 20.0  ;;  %vm2199_vm15 = vcmp.gt.f32.partialorder %v4819_v6, 20.0 }
 0x3bb   : > { %v2032_v56 = vmul.f32 1.442695, %v2016_v59  ;;  %v4814_v61 = vmul.f32 100.0, %v4810_v0 }
 0x3bc   : > { %v1977_v58 = vpop.f32.mrb[32].mxu0  ;;  %v4825_v47 = vmul.f32 100.0, %v4816_v53  ;;  %v2034_v1 = vmul.f32 1.442695, %v2017_v9 }
 0x3bd   : > { %3441 = vpow2.f32 %v2032_v56  ;;  %v2018_v62 = vmin.f32 %v4814_v61, 20.0  ;;  %v4822_v46 = vadd.f32 %v1977_v58, %v1855_v34  ;;  %v1979_v45 = vpop.f32.mrb[33].mxu0  ;;  %vm2200_vm11 = vcmp.gt.f32.partialorder %v4814_v61, 20.0 }
 0x3be   : > { %v4831_v36 = vadd.f32 %v1979_v45, %v1855_v34  ;;  %v2019_v18 = vmin.f32 %v4825_v47, 20.0 }
 0x3bf   : > { %v2036_v43 = vmul.f32 1.442695, %v2018_v62  ;;  %v4828_v48 = vmul.f32 100.0, %v4822_v46 }
 0x3c0   : > { %v1983_v30 = vpop.f32.mrb[34].mxu0  ;;  %v4841_v37 = vmul.f32 100.0, %v4831_v36  ;;  %v2038_v19 = vmul.f32 1.442695, %v2019_v18 }
 0x3c1   : > { %3443 = vpow2.f32 %v2036_v43  ;;  %v2020_v20 = vmin.f32 %v4828_v48, 20.0  ;;  %v4834_v11 = vadd.f32 %v1983_v30, %v1860_v60  ;;  %v1985_v12 = vpop.f32.mrb[35].mxu0  ;;  %vm2202_vm13 = vcmp.gt.f32.partialorder %v4828_v48, 20.0 }
 0x3c2   : > { %3445 = vpow2.f32 %v2030_v7  ;;  %v4843_v22 = vadd.f32 %v1985_v12, %v1860_v60  ;;  %v2021_v5 = vmin.f32 %v4841_v37, 20.0 }
 0x3c3   : > { %v3440_v63 = vpop.eup %3439  ;;  %v2040_v27 = vmul.f32 1.442695, %v2020_v20  ;;  %v4838_v35 = vmul.f32 100.0, %v4834_v11 }
 0x3c4   : > { %v2056_v42 = vadd.f32 1.0, %v3440_v63  ;;  %v1989_v21 = vpop.f32.mrb[36].mxu0  ;;  %v4853_v44 = vmul.f32 100.0, %v4843_v22  ;;  %v2059_v33 = vmul.f32 -0.5, %v3440_v63  ;;  %v2062_v49 = vand.u32 2147483647, %v3440_v63 }
 0x3c5   : > { %3447 = vpow2.f32 %v2040_v27  ;;  %v2022_v16 = vmin.f32 %v4838_v35, 20.0  ;;  %v4846_v3 = vadd.f32 %v1989_v21, %v1865_v8  ;;  %v1991_v26 = vpop.f32.mrb[37].mxu0  ;;  %v2042_v24 = vmul.f32 1.442695, %v2021_v5 }
 0x3c6   : > { %3449 = vlog2.f32 %v2056_v42  ;;  %v4858_v17 = vadd.f32 %v1991_v26, %v1865_v8  ;;  %v2023_v59 = vmin.f32 %v4853_v44, 20.0  ;;  %v2060_v10 = vadd.f32 1.0, %v2059_v33 }
 0x3c7   : > { %v4848_v50 = vpop.eup %3441  ;;  %v2044_v4 = vmul.f32 1.442695, %v2022_v16  ;;  %3451 = vpow2.f32 %v2034_v1  ;;  %v4856_v52 = vmul.f32 100.0, %v4846_v3  ;;  %vm4878_vm7 = vcmp.lt.f32.partialorder %v2062_v49, 0.0004427343 }
 0x3c8   : > { %v2074_v41 = vadd.f32 1.0, %v4848_v50  ;;  %v1995_v57 = vpop.f32.mrb[38].mxu0  ;;  %v2077_v29 = vmul.f32 -0.5, %v4848_v50  ;;  %v4868_v34 = vmul.f32 100.0, %v4858_v17  ;;  %v2046_v12 = vmul.f32 1.442695, %v2023_v59 }
 0x3c9   : > { %3453 = vpow2.f32 %v2044_v4  ;;  %v1997_v28 = vpop.f32.mrb[39].mxu0  ;;  %v4860_v23 = vadd.f32 %v1995_v57, %v1870_v54  ;;  %v2024_v40 = vmin.f32 %v4856_v52, 20.0  ;;  %v2061_v27 = vmul.f32 %v3440_v63, %v2060_v10 }
 0x3ca   : > { %3455 = vlog2.f32 %v2074_v41  ;;  %v4876_v43 = vadd.f32 %v1997_v28, %v1870_v54  ;;  %v2078_v30 = vadd.f32 1.0, %v2077_v29  ;;  %v2025_v42 = vmin.f32 %v4868_v34, 20.0 }
 0x3cb   : > { %v3444_v2 = vpop.eup %3443  ;;  %3457 = vpow2.f32 %v2038_v19  ;;  %v2048_v56 = vmul.f32 1.442695, %v2024_v40  ;;  %v4871_v58 = vmul.f32 100.0, %v4860_v23  ;;  %v2080_v8 = vand.u32 2147483647, %v4848_v50 }
 0x3cc   : > { %v2092_v14 = vadd.f32 1.0, %v3444_v2  ;;  %v4865_v38 = vpop.eup %3445  ;;  %v2095_v45 = vmul.f32 -0.5, %v3444_v2  ;;  %v2098_v16 = vand.u32 2147483647, %v3444_v2  ;;  %v4894_v41 = vmul.f32 100.0, %v4876_v43 }
 0x3cd   : > { %v2026_v7 = vmin.f32 %v4871_v58, 20.0  ;;  %v2065_v21 = vadd.f32 1.0, %v4865_v38  ;;  %v2079_v57 = vmul.f32 %v4848_v50, %v2078_v30  ;;  %v2050_v40 = vmul.f32 1.442695, %v2025_v42 }
 0x3ce   : > { %3459 = vlog2.f32 %v2092_v14  ;;  %v2096_v4 = vadd.f32 1.0, %v2095_v45  ;;  %vm2081_vm9 = vcmp.lt.f32.partialorder %v2080_v8, 0.0004427343  ;;  %vm4902_vm10 = vcmp.lt.f32.partialorder %v2098_v16, 0.0004427343 }
 0x3cf   : > { %v4873_v62 = vpop.eup %3447  ;;  %3461 = vpow2.f32 %v2048_v56  ;;  %v2052_v63 = vmul.f32 1.442695, %v2026_v7  ;;  %v2027_v59 = vmin.f32 %v4894_v41, 20.0  ;;  %v2068_v7 = vmul.f32 -0.5, %v4865_v38 }
 0x3d0   : > { %v3450_v60 = vpop.eup %3449  ;;  %v2110_v20 = vadd.f32 1.0, %v4873_v62  ;;  %3463 = vpow2.f32 %v2042_v24  ;;  %v2113_v49 = vmul.f32 -0.5, %v4873_v62  ;;  %v2097_v24 = vmul.f32 %v3444_v2, %v2096_v4 }
 0x3d1   : > { %v2058_v18 = vmul.f32 0.6931472, %v3450_v60  ;;  %v4885_v1 = vpop.eup %3451  ;;  %v2116_v45 = vand.u32 2147483647, %v4873_v62  ;;  %vm2204_vm1 = vcmp.gt.f32.partialorder %v4838_v35, 20.0 }
 0x3d2   : > { %3465 = vlog2.f32 %v2110_v20  ;;  %v2083_v60 = vadd.f32 1.0, %v4885_v1  ;;  %v2114_v20 = vadd.f32 1.0, %v2113_v49 }
 0x3d3   : > { %v4889_v26 = vpop.eup %3453  ;;  %v2064_v19 = vsel %vm4878_vm7, %v2061_v27, %v2058_v18  ;;  %3467 = vpow2.f32 %v2046_v12  ;;  %vm4929_vm12 = vcmp.lt.f32.partialorder %v2116_v45, 0.0004427343 }
 0x3d4   : > { %v3456_v5 = vpop.eup %3455  ;;  %v2128_v54 = vadd.f32 1.0, %v4889_v26  ;;  %3469 = vlog2.f32 %v2065_v21  ;;  %v2182_v29 = vmul.f32 0.01, %v2064_v19  ;;  %v2131_v27 = vmul.f32 -0.5, %v4889_v26 }
 0x3d5   : > { %v4899_v33 = vpop.eup %3457  ;;  %v2076_v28 = vmul.f32 0.6931472, %v3456_v5  ;;  %v2054_v19 = vmul.f32 1.442695, %v2027_v59  ;;  %v2115_v4 = vmul.f32 %v4873_v62, %v2114_v20  ;;  %v2134_v14 = vand.u32 2147483647, %v4889_v26 }
 0x3d6   : > { %3471 = vlog2.f32 %v2128_v54  ;;  %v2101_v12 = vadd.f32 1.0, %v4899_v33  ;;  %v4914_v2 = vsel %vm2196_vm5, %v4791_v32, %v2182_v29  ;;  %v2071_v54 = vand.u32 2147483647, %v4865_v38 }
 0x3d7   : > { %v2082_v50 = vsel %vm2081_vm9, %v2079_v57, %v2076_v28  ;;  %3473 = vpow2.f32 %v2052_v63  ;;  %v2086_v28 = vmul.f32 -0.5, %v4885_v1  ;;  %v2132_v29 = vadd.f32 1.0, %v2131_v27 }
 0x3d8   : > { %v3460_v10 = vpop.eup %3459  ;;  %v2184_v56 = vmul.f32 0.01, %v2082_v50  ;;  %3475 = vpow2.f32 %v2050_v40  ;;  %vm4959_vm0 = vcmp.lt.f32.partialorder %v2071_v54, 0.0004427343  ;;  %v2104_v61 = vmul.f32 -0.5, %v4899_v33 }
 0x3d9   : > { %v3462_v9 = vpop.eup %3461  ;;  %v2094_v30 = vmul.f32 0.6931472, %v3460_v10  ;;  %3477 = vlog2.f32 %v2083_v60  ;;  %v2089_v60 = vand.u32 2147483647, %v4885_v1  ;;  %v2087_v27 = vadd.f32 1.0, %v2086_v28 }
 0x3da   : > { %v4919_v18 = vsel %vm2198_vm8, %v4799_v55, %v2184_v56  ;;  %v2146_v42 = vadd.f32 1.0, %v3462_v9  ;;  %v4922_v8 = vpop.eup %3463  ;;  %v2069_v55 = vadd.f32 1.0, %v2068_v7  ;;  %v2149_v63 = vmul.f32 -0.5, %v3462_v9 }
 0x3db   : > { %v3176_v16 = vpack.c.bf16 %v4919_v18, %v4914_v2  ;;  %v2100_v21 = vsel %vm4902_vm10, %v2097_v24, %v2094_v30  ;;  %v2152_v24 = vand.u32 2147483647, %v3462_v9  ;;  %v2119_v30 = vadd.f32 1.0, %v4922_v8 }
 0x3dc   : > { %v3466_v32 = vpop.eup %3465  ;;  %3479 = vlog2.f32 %v2146_v42  ;;  %v2186_v57 = vmul.f32 0.01, %v2100_v21  ;;  %v2070_v10 = vmul.f32 %v4865_v38, %v2069_v55  ;;  %v2150_v7 = vadd.f32 1.0, %v2149_v63 }
 0x3dd   : > { %v2112_v13 = vmul.f32 0.6931472, %v3466_v32  ;;  %3481 = vlog2.f32 %v2101_v12  ;;  %v4934_v5 = vpop.eup %3467  ;;  %vm4972_vm3 = vcmp.lt.f32.partialorder %v2134_v14, 0.0004427343  ;;  %vm4976_vm4 = vcmp.lt.f32.partialorder %v2152_v24, 0.0004427343 }
 0x3de   : > { %v3470_v49 = vpop.eup %3469  ;;  %3483 = vpow2.f32 %v2054_v19  ;;  %v4952_v20 = vsel %vm2200_vm11, %v4810_v0, %v2186_v57  ;;  %v2133_v19 = vmul.f32 %v4889_v26, %v2132_v29  ;;  %v2151_v55 = vmul.f32 %v3462_v9, %v2150_v7 }
 0x3df   : > { %v2118_v40 = vsel %vm4929_vm12, %v2115_v4, %v2112_v13  ;;  %v2067_v59 = vmul.f32 0.6931472, %v3470_v49  ;;  %3485 = vlog2.f32 %v2119_v30  ;;  %vm4983_vm7 = vcmp.lt.f32.partialorder %v2089_v60, 0.0004427343 }
 0x3e0   : > { %v3472_v62 = vpop.eup %3471  ;;  %v2188_v50 = vmul.f32 0.01, %v2118_v40  ;;  %v2137_v4 = vadd.f32 1.0, %v4934_v5  ;;  %v2088_v54 = vmul.f32 %v4885_v1, %v2087_v27  ;;  %v2107_v49 = vand.u32 2147483647, %v4899_v33 }
 0x3e1   : > { %v4943_v56 = vpop.eup %3473  ;;  %v2130_v45 = vmul.f32 0.6931472, %v3472_v62  ;;  %v2073_v0 = vsel %vm4959_vm0, %v2070_v10, %v2067_v59  ;;  %v2105_v14 = vadd.f32 1.0, %v2104_v61  ;;  %v2122_v62 = vmul.f32 -0.5, %v4922_v8 }
 0x3e2   : > { %v4957_v38 = vsel %vm2202_vm13, %v4822_v46, %v2188_v50  ;;  %v4963_v42 = vpop.eup %3475  ;;  %v2164_v32 = vadd.f32 1.0, %v4943_v56  ;;  %v2183_v28 = vmul.f32 0.01, %v2073_v0  ;;  %3487 = vlog2.f32 %v2137_v4 }
 0x3e3   : > { %v3180_v21 = vpack.c.bf16 %v4957_v38, %v4952_v20  ;;  %v3478_v39 = vpop.eup %3477  ;;  %v2136_v26 = vsel %vm4972_vm3, %v2133_v19, %v2130_v45  ;;  %v2140_v24 = vmul.f32 -0.5, %v4934_v5  ;;  %v2155_v7 = vadd.f32 1.0, %v4963_v42 }
 0x3e4   : > { %v2085_v57 = vmul.f32 0.6931472, %v3478_v39  ;;  %v2190_v9 = vmul.f32 0.01, %v2136_v26  ;;  %3489 = vlog2.f32 %v2164_v32  ;;  %vm2206_vm5 = vcmp.gt.f32.partialorder %v4856_v52, 20.0 }
 0x3e5   : > { %v2211_v30 = vsel %vm2197_vm6, %v4796_v31, %v2183_v28  ;;  %vm5003_vm8 = vcmp.lt.f32.partialorder %v2107_v49, 0.0004427343  ;;  %v2106_v19 = vmul.f32 %v4899_v33, %v2105_v14  ;;  %v2123_v0 = vadd.f32 1.0, %v2122_v62 }
 0x3e6   : > { %v3480_v63 = vpop.eup %3479  ;;  %v2091_v50 = vsel %vm4983_vm7, %v2088_v54, %v2085_v57  ;;  %3491 = vlog2.f32 %v2155_v7  ;;  %v5014_v52 = vsel %vm2204_vm1, %v4834_v11, %v2190_v9  ;;  %v2125_v61 = vand.u32 2147483647, %v4922_v8 }
 0x3e7   : > { %v3482_v40 = vpop.eup %3481  ;;  %v2148_v29 = vmul.f32 0.6931472, %v3480_v63  ;;  %v2185_v10 = vmul.f32 0.01, %v2091_v50  ;;  %v2141_v6 = vadd.f32 1.0, %v2140_v24  ;;  %v2158_v11 = vmul.f32 -0.5, %v4963_v42 }
 0x3e8   : > { %v4994_v59 = vpop.eup %3483  ;;  %v2103_v45 = vmul.f32 0.6931472, %v3482_v40  ;;  %v2143_v32 = vand.u32 2147483647, %v4934_v5  ;;  %vm2126_vm9 = vcmp.lt.f32.partialorder %v2125_v61, 0.0004427343 }
 0x3e9   : > { %v2154_v1 = vsel %vm4976_vm4, %v2151_v55, %v2148_v29  ;;  %v2213_v27 = vsel %vm2199_vm15, %v4807_v25, %v2185_v10  ;;  %v2173_v33 = vadd.f32 1.0, %v4994_v59  ;;  %v3486_v48 = vpop.eup %3485  ;;  %v2167_v55 = vmul.f32 -0.5, %v4943_v56 }
 0x3ea   : > { %v2192_v60 = vmul.f32 0.01, %v2154_v1  ;;  %v3174_v31 = vpack.c.bf16 %v2213_v27, %v2211_v30  ;;  %v2109_v25 = vsel %vm5003_vm8, %v2106_v19, %v2103_v45  ;;  %v2121_v35 = vmul.f32 0.6931472, %v3486_v48  ;;  %v2532_v27 = vpop.permute.xlu1 %2531 }
 0x3eb   : > { %3493 = vlog2.f32 %v2173_v33  ;;  %v2187_v39 = vmul.f32 0.01, %v2109_v25  ;;  %v2142_v4 = vmul.f32 %v4934_v5, %v2141_v6  ;;  %v2159_v28 = vadd.f32 1.0, %v2158_v11 }
 0x3ec   : > { %v5017_v15 = vsel %vm2206_vm5, %v4846_v3, %v2192_v60  ;;  %3175 = vmatprep.subr.bf16.mxu1 %v3174_v31  ;;  %v2124_v3 = vmul.f32 %v4922_v8, %v2123_v0  ;;  %v3488_v26 = vpop.eup %3487  ;;  %v2176_v2 = vmul.f32 -0.5, %v4994_v59  ;;  %vm2201_vm10 = vcmp.gt.f32.partialorder %v4825_v47, 20.0  ;;  %v2537_v31 = vpop.permute.xlu0 %2536 }
 0x3ed   : > { %v3184_v46 = vpack.c.bf16 %v5017_v15, %v5014_v52  ;;  %3177 = vmatpush1.bf16.msra.mxu1 %v3176_v16  ;;  %v2139_v54 = vmul.f32 0.6931472, %v3488_v26  ;;  %vm2203_vm11 = vcmp.gt.f32.partialorder %v4841_v37, 20.0  ;;  %vm2144_vm12 = vcmp.lt.f32.partialorder %v2143_v32, 0.0004427343 }
 0x3ee   : > { %v2127_v13 = vsel %vm2126_vm9, %v2124_v3, %v2121_v35  ;;  %v3490_v63 = vpop.eup %3489  ;;  %v2161_v18 = vand.u32 2147483647, %v4963_v42  ;;  %v2215_v8 = vsel %vm2201_vm10, %v4816_v53, %v2187_v39  ;;  %v2168_v5 = vadd.f32 1.0, %v2167_v55  ;;  %v2542_v35 = vpop.permute.xlu1 %2541 }
 0x3ef   : > { %v2189_v57 = vmul.f32 0.01, %v2127_v13  ;;  %v2145_v49 = vsel %vm2144_vm12, %v2142_v4, %v2139_v54  ;;  %v2170_v29 = vand.u32 2147483647, %v4943_v56  ;;  %v2166_v62 = vmul.f32 0.6931472, %v3490_v63 }
 0x3f0   : > { %v3492_v40 = vpop.eup %3491  ;;  %v2160_v50 = vmul.f32 %v4963_v42, %v2159_v28  ;;  %v2177_v47 = vadd.f32 1.0, %v2176_v2  ;;  %vm2162_vm13 = vcmp.lt.f32.partialorder %v2161_v18, 0.0004427343  ;;  %v2191_v37 = vmul.f32 0.01, %v2145_v49  ;;  %v2547_v54 = vpop.permute.xlu0 %2546 }
 0x3f1   : > { %v2217_v16 = vsel %vm2203_vm11, %v4831_v36, %v2189_v57  ;;  %v2157_v9 = vmul.f32 0.6931472, %v3492_v40  ;;  %v2179_v24 = vand.u32 2147483647, %v4994_v59  ;;  %vm2205_vm6 = vcmp.gt.f32.partialorder %v4853_v44, 20.0 }
 0x3f2   : > { %v3178_v14 = vpack.c.bf16 %v2217_v16, %v2215_v8  ;;  %v2169_v1 = vmul.f32 %v4943_v56, %v2168_v5  ;;  %vm2207_vm15 = vcmp.gt.f32.partialorder %v4868_v34, 20.0  ;;  %vm2171_vm0 = vcmp.lt.f32.partialorder %v2170_v29, 0.0004427343  ;;  %v2225_v34 = vld [vmem:[%s5486_s7 + $0x8] sm:$0xff]  ;;  %v2230_v56 = vld [vmem:[%s5486_s7 + $0x30] sm:$0xff] }
 0x3f3   : > { %v2163_v53 = vsel %vm2162_vm13, %v2160_v50, %v2157_v9  ;;  %v2178_v45 = vmul.f32 %v4994_v59, %v2177_v47  ;;  %v2219_v60 = vsel %vm2205_vm6, %v4843_v22, %v2191_v37  ;;  %vm2180_vm1 = vcmp.lt.f32.partialorder %v2179_v24, 0.0004427343  ;;  %v2224_v22 = vld [vmem:[%s5486_s7] sm:$0xff]  ;;  %v2231_v59 = vld [vmem:[%s5486_s7 + $0x38] sm:$0xff] }
 0x3f4   : > { %3179 = vmatprep.subr.bf16.mxu1 %v3178_v14  ;;  %v2193_v10 = vmul.f32 0.01, %v2163_v53  ;;  %v2172_v7 = vsel %vm2171_vm0, %v2169_v1, %v2166_v62  ;;  %vm2209_vm3 = vcmp.gt.f32.partialorder %v4894_v41, 20.0  ;;  %vm2208_vm4 = vcmp.gt.f32.partialorder %v4871_v58, 20.0  ;;  %v2226_v58 = vld [vmem:[%s5486_s7 + $0x10] sm:$0xff]  ;;  %v2229_v41 = vld [vmem:[%s5486_s7 + $0x28] sm:$0xff]  ;;  %v2552_v62 = vpop.permute.xlu1 %2551 }
 0x3f5   : > { %3181 = vmatpush1.bf16.msra.mxu1 %v3180_v21  ;;  %v3494_v36 = vpop.eup %3493  ;;  %v2194_v12 = vmul.f32 0.01, %v2172_v7  ;;  %vm2377_vm7 = vcmask 400384  }
 0x3f6   : > { %v2175_v42 = vmul.f32 0.6931472, %v3494_v36  ;;  %v2221_v30 = vsel %vm2207_vm15, %v4858_v17, %v2193_v10 }
 0x3f7   : > { %v3182_v20 = vpack.c.bf16 %v2221_v30, %v2219_v60  ;;  %v2222_v17 = vsel %vm2208_vm4, %v4860_v23, %v2194_v12  ;;  %v2227_v23 = vld [vmem:[%s5486_s7 + $0x18] sm:$0xff] }
 0x3f8   : > { %v2181_v38 = vsel %vm2180_vm1, %v2178_v45, %v2175_v42 }
 0x3f9   : > { %v2195_v21 = vmul.f32 0.01, %v2181_v38  ;;  %3183 = vmatprep.subr.bf16.mxu1 %v3182_v20  ;;  %v2557_v20 = vpop.permute.xlu0 %2556 }
 0x3fa   : > { %3185 = vmatpush1.bf16.msra.mxu1 %v3184_v46 }
 0x3fb   : > { %v2223_v44 = vsel %vm2209_vm3, %v4876_v43, %v2195_v21  ;;  %v2228_v43 = vld [vmem:[%s5486_s7 + $0x20] sm:$0xff] }
 0x3fc   : > { %3110 = vmatprep.subr.msk.mxu1 %vm909_vm2, %v2223_v44 }
 0x3fe   : > { %3111 = vmatpush1.msk.msra.mxu1 %vm909_vm2, %v2222_v17 }
 0x3ff   : > { %3112 = vmatmul.mubr.msk.f32.vlgmr.msra.gmra.mrb[6].mxu1 %vm2377_vm7, %v2224_v22 }
 0x400   : > { %2478 = vmatprep.mubr.f32.mxu1 %v5553_v51 }
 0x403   : > { %3113 = vmatmul.mubr.msk.f32.gmra.mrb[8].mxu1 %vm2377_vm7, %v2225_v34 }
 0x404   : > { %2484 = vmatprep.mubr.f32.mxu1 %v5553_v51 }
 0x407   : > { %3114 = vmatmul.mubr.msk.f32.gmra.mrb[10].mxu1 %vm2377_vm7, %v2226_v58 }
 0x408   : > { %2490 = vmatprep.mubr.f32.mxu1 %v5553_v51 }
 0x40b   : > { %3115 = vmatmul.mubr.msk.f32.gmra.mrb[12].mxu1 %vm2377_vm7, %v2227_v23 }
 0x40c   : > { %2496 = vmatprep.mubr.f32.mxu1 %v5553_v51 }
 0x40f   : > { %3116 = vmatmul.mubr.msk.f32.gmra.mrb[14].mxu1 %vm2377_vm7, %v2228_v43 }
 0x410   : > { %2502 = vmatprep.mubr.f32.mxu1 %v5553_v51 }
 0x413   : > { %3117 = vmatmul.mubr.msk.f32.gmra.mrb[16].mxu1 %vm2377_vm7, %v2229_v41 }
 0x414   : > { %2508 = vmatprep.mubr.f32.mxu1 %v5553_v51 }
 0x417   : > { %3118 = vmatmul.mubr.msk.f32.gmra.mrb[18].mxu1 %vm2377_vm7, %v2230_v56 }
 0x418   : > { %2514 = vmatprep.mubr.f32.mxu1 %v5553_v51 }
 0x41b   : > { %3119 = vmatmul.mubr.msk.f32.gmra.mrb[20].mxu1 %vm2377_vm7, %v2231_v59  ;;  %v2562_v59 = vpop.permute.xlu1 %2561 }
 0x4d2   : > { %v2474_v19 = vpop.f32.mrb[6].mxu1 }
 0x4d3   : > { %v5096_v0 = vadd.f32 %v2532_v27, %v2474_v19  ;;  %v2476_v52 = vpop.f32.mrb[7].mxu1 }
 0x4d4   : > { %v5104_v48 = vadd.f32 %v2532_v27, %v2476_v52 }
 0x4d5   : > { %v5099_v15 = vmul.f32 100.0, %v5096_v0 }
 0x4d6   : > { %v2480_v61 = vpop.f32.mrb[8].mxu1  ;;  %v5115_v13 = vmul.f32 100.0, %v5104_v48 }
 0x4d7   : > { %v2601_v46 = vmin.f32 %v5099_v15, 20.0  ;;  %v5102_v25 = vadd.f32 %v2537_v31, %v2480_v61  ;;  %v2482_v6 = vpop.f32.mrb[9].mxu1  ;;  %vm2809_vm2 = vcmp.gt.f32.partialorder %v5099_v15, 20.0 }
 0x4d8   : > { %v5109_v3 = vadd.f32 %v2537_v31, %v2482_v6  ;;  %v2602_v40 = vmin.f32 %v5115_v13, 20.0 }
 0x4d9   : > { %v2617_v33 = vmul.f32 1.442695, %v2601_v46  ;;  %v5107_v11 = vmul.f32 100.0, %v5102_v25 }
 0x4da   : > { %v2486_v32 = vpop.f32.mrb[10].mxu1  ;;  %v5123_v28 = vmul.f32 100.0, %v5109_v3  ;;  %v2619_v1 = vmul.f32 1.442695, %v2602_v40 }
 0x4db   : > { %3495 = vpow2.f32 %v2617_v33  ;;  %v2603_v39 = vmin.f32 %v5107_v11, 20.0  ;;  %v5112_v26 = vadd.f32 %v2542_v35, %v2486_v32  ;;  %v2488_v55 = vpop.f32.mrb[11].mxu1  ;;  %vm2811_vm5 = vcmp.gt.f32.partialorder %v5107_v11, 20.0 }
 0x4dc   : > { %v5120_v57 = vadd.f32 %v2542_v35, %v2488_v55  ;;  %v2604_v9 = vmin.f32 %v5123_v28, 20.0 }
 0x4dd   : > { %v2621_v4 = vmul.f32 1.442695, %v2603_v39  ;;  %v5118_v63 = vmul.f32 100.0, %v5112_v26 }
 0x4de   : > { %v2492_v2 = vpop.f32.mrb[12].mxu1  ;;  %v5132_v29 = vmul.f32 100.0, %v5120_v57  ;;  %v2623_v60 = vmul.f32 1.442695, %v2604_v9 }
 0x4df   : > { %3497 = vpow2.f32 %v2621_v4  ;;  %v2605_v18 = vmin.f32 %v5118_v63, 20.0  ;;  %v5126_v8 = vadd.f32 %v2547_v54, %v2492_v2  ;;  %v2494_v16 = vpop.f32.mrb[13].mxu1  ;;  %vm2813_vm11 = vcmp.gt.f32.partialorder %v5118_v63, 20.0 }
 0x4e0   : > { %v5128_v49 = vadd.f32 %v2547_v54, %v2494_v16  ;;  %v2606_v10 = vmin.f32 %v5132_v29, 20.0 }
 0x4e1   : > { %v2625_v5 = vmul.f32 1.442695, %v2605_v18  ;;  %v5135_v14 = vmul.f32 100.0, %v5126_v8 }
 0x4e2   : > { %v2498_v50 = vpop.f32.mrb[14].mxu1  ;;  %v5140_v37 = vmul.f32 100.0, %v5128_v49  ;;  %v2627_v34 = vmul.f32 1.442695, %v2606_v10 }
 0x4e3   : > { %3499 = vpow2.f32 %v2625_v5  ;;  %v2607_v47 = vmin.f32 %v5135_v14, 20.0  ;;  %v5142_v24 = vadd.f32 %v2552_v62, %v2498_v50  ;;  %v2500_v53 = vpop.f32.mrb[15].mxu1  ;;  %vm2815_vm12 = vcmp.gt.f32.partialorder %v5135_v14, 20.0 }
 0x4e4   : > { %v5151_v30 = vadd.f32 %v2552_v62, %v2500_v53  ;;  %v2608_v38 = vmin.f32 %v5140_v37, 20.0 }
 0x4e5   : > { %v5144_v36 = vpop.eup %3495  ;;  %v2629_v42 = vmul.f32 1.442695, %v2607_v47  ;;  %v5148_v45 = vmul.f32 100.0, %v5142_v24 }
 0x4e6   : > { %v2649_v7 = vadd.f32 1.0, %v5144_v36  ;;  %v2504_v12 = vpop.f32.mrb[16].mxu1  ;;  %v2652_v23 = vmul.f32 -0.5, %v5144_v36  ;;  %v5159_v41 = vmul.f32 100.0, %v5151_v30  ;;  %v2631_v27 = vmul.f32 1.442695, %v2608_v38 }
 0x4e7   : > { %3501 = vpow2.f32 %v2629_v42  ;;  %v2609_v21 = vmin.f32 %v5148_v45, 20.0  ;;  %v5155_v44 = vadd.f32 %v2557_v20, %v2504_v12  ;;  %v2506_v22 = vpop.f32.mrb[17].mxu1  ;;  %v2655_v16 = vand.u32 2147483647, %v5144_v36 }
 0x4e8   : > { %3503 = vlog2.f32 %v2649_v7  ;;  %v5164_v52 = vadd.f32 %v2557_v20, %v2506_v22  ;;  %v2653_v33 = vadd.f32 1.0, %v2652_v23  ;;  %v2610_v39 = vmin.f32 %v5159_v41, 20.0  ;;  %v2567_v7 = vpop.permute.xlu0 %2566 }
 0x4e9   : > { %v3498_v17 = vpop.eup %3497  ;;  %3505 = vpow2.f32 %v2619_v1  ;;  %v2633_v58 = vmul.f32 1.442695, %v2609_v21  ;;  %v5162_v19 = vmul.f32 100.0, %v5155_v44  ;;  %vm5195_vm8 = vcmp.lt.f32.partialorder %v2655_v16, 0.0004427343 }
 0x4ea   : > { %v2667_v43 = vadd.f32 1.0, %v3498_v17  ;;  %3507 = vpow2.f32 %v2623_v60  ;;  %v2510_v56 = vpop.f32.mrb[18].mxu1  ;;  %v2670_v35 = vmul.f32 -0.5, %v3498_v17  ;;  %v5174_v54 = vmul.f32 100.0, %v5164_v52 }
 0x4eb   : > { %3509 = vpow2.f32 %v2633_v58  ;;  %v2512_v31 = vpop.f32.mrb[19].mxu1  ;;  %v5166_v61 = vadd.f32 %v2562_v59, %v2510_v56  ;;  %v2611_v6 = vmin.f32 %v5162_v19, 20.0  ;;  %v2673_v62 = vand.u32 2147483647, %v3498_v17 }
 0x4ec   : > { %3511 = vlog2.f32 %v2667_v43  ;;  %v5180_v40 = vadd.f32 %v2562_v59, %v2512_v31  ;;  %v2654_v47 = vmul.f32 %v5144_v36, %v2653_v33  ;;  %v2671_v53 = vadd.f32 1.0, %v2670_v35 }
 0x4ed   : > { %v5168_v46 = vpop.eup %3499  ;;  %3513 = vpow2.f32 %v2627_v34  ;;  %v2637_v4 = vmul.f32 1.442695, %v2611_v6  ;;  %v5177_v2 = vmul.f32 100.0, %v5166_v61  ;;  %v2635_v10 = vmul.f32 1.442695, %v2610_v39 }
 0x4ee   : > { %v2685_v32 = vadd.f32 1.0, %v5168_v46  ;;  %v2516_v55 = vpop.f32.mrb[20].mxu1  ;;  %3515 = vpow2.f32 %v2631_v27  ;;  %v2688_v20 = vmul.f32 -0.5, %v5168_v46  ;;  %v2612_v38 = vmin.f32 %v5174_v54, 20.0 }
 0x4ef   : > { %v2518_v18 = vpop.f32.mrb[21].mxu1  ;;  %v2613_v9 = vmin.f32 %v5177_v2, 20.0  ;;  %v5200_v22 = vmul.f32 100.0, %v5180_v40  ;;  %v5202_v34 = vadd.f32 %v2567_v7, %v2516_v55  ;;  %vm5206_vm9 = vcmp.lt.f32.partialorder %v2673_v62, 0.0004427343 }
 0x4f0   : > { %3517 = vlog2.f32 %v2685_v32  ;;  %v2691_v56 = vand.u32 2147483647, %v5168_v46  ;;  %v2672_v27 = vmul.f32 %v3498_v17, %v2671_v53  ;;  %v2689_v32 = vadd.f32 1.0, %v2688_v20 }
 0x4f1   : > { %v5182_v5 = vpop.eup %3501  ;;  %3519 = vpow2.f32 %v2637_v4  ;;  %v2641_v21 = vmul.f32 1.442695, %v2613_v9  ;;  %v2639_v39 = vmul.f32 1.442695, %v2612_v38  ;;  %v5214_v55 = vadd.f32 %v2567_v7, %v2518_v18 }
 0x4f2   : > { %v3504_v50 = vpop.eup %3503  ;;  %v2703_v1 = vadd.f32 1.0, %v5182_v5  ;;  %v2706_v31 = vmul.f32 -0.5, %v5182_v5  ;;  %v2614_v16 = vmin.f32 %v5200_v22, 20.0  ;;  %v5218_v62 = vmul.f32 100.0, %v5202_v34 }
 0x4f3   : > { %v5187_v42 = vpop.eup %3505  ;;  %v2651_v60 = vmul.f32 0.6931472, %v3504_v50  ;;  %vm5224_vm10 = vcmp.lt.f32.partialorder %v2691_v56, 0.0004427343  ;;  %vm2817_vm15 = vcmp.gt.f32.partialorder %v5148_v45, 20.0  ;;  %vm2819_vm0 = vcmp.gt.f32.partialorder %v5162_v19, 20.0 }
 0x4f4   : > { %v5193_v12 = vpop.eup %3507  ;;  %3521 = vlog2.f32 %v2703_v1  ;;  %v2615_v7 = vmin.f32 %v5218_v62, 20.0 }
 0x4f5   : > { %v3510_v58 = vpop.eup %3509  ;;  %v2657_v23 = vsel %vm5195_vm8, %v2654_v47, %v2651_v60  ;;  %3523 = vpow2.f32 %v2641_v21  ;;  %v2709_v47 = vand.u32 2147483647, %v5182_v5  ;;  %v5231_v60 = vmul.f32 100.0, %v5214_v55 }
 0x4f6   : > { %v3512_v59 = vpop.eup %3511  ;;  %v2721_v6 = vadd.f32 1.0, %v3510_v58  ;;  %3525 = vpow2.f32 %v2635_v10  ;;  %v2793_v4 = vmul.f32 0.01, %v2657_v23  ;;  %v2724_v18 = vmul.f32 -0.5, %v3510_v58 }
 0x4f7   : > { %v5212_v33 = vpop.eup %3513  ;;  %v2669_v35 = vmul.f32 0.6931472, %v3512_v59  ;;  %v2707_v10 = vadd.f32 1.0, %v2706_v31  ;;  %v2690_v21 = vmul.f32 %v5168_v46, %v2689_v32  ;;  %v2727_v36 = vand.u32 2147483647, %v3510_v58 }
 0x4f8   : > { %3527 = vlog2.f32 %v2721_v6  ;;  %v5220_v9 = vpop.eup %3515  ;;  %v5239_v23 = vsel %vm2809_vm2, %v5096_v0, %v2793_v4  ;;  %v2643_v59 = vmul.f32 1.442695, %v2614_v16  ;;  %v2725_v31 = vadd.f32 1.0, %v2724_v18 }
 0x4f9   : > { %v2675_v17 = vsel %vm5206_vm9, %v2672_v27, %v2669_v35  ;;  %3529 = vpow2.f32 %v2639_v39  ;;  %v2645_v6 = vmul.f32 1.442695, %v2615_v7  ;;  %v2708_v15 = vmul.f32 %v5182_v5, %v2707_v10 }
 0x4fa   : > { %v3518_v53 = vpop.eup %3517  ;;  %v2795_v1 = vmul.f32 0.01, %v2675_v17  ;;  %vm5251_vm13 = vcmp.lt.f32.partialorder %v2709_v47, 0.0004427343  ;;  %v2658_v4 = vadd.f32 1.0, %v5187_v42  ;;  %v2661_v47 = vmul.f32 -0.5, %v5187_v42 }
 0x4fb   : > { %v3520_v20 = vpop.eup %3519  ;;  %v2687_v38 = vmul.f32 0.6931472, %v3518_v53  ;;  %vm5259_vm6 = vcmp.lt.f32.partialorder %v2727_v36, 0.0004427343  ;;  %v2726_v53 = vmul.f32 %v3510_v58, %v2725_v31  ;;  %v2664_v36 = vand.u32 2147483647, %v5187_v42 }
 0x4fc   : > { %v5244_v43 = vsel %vm2811_vm5, %v5102_v25, %v2795_v1  ;;  %v2739_v56 = vadd.f32 1.0, %v3520_v20  ;;  %v2616_v25 = vmin.f32 %v5231_v60, 20.0  ;;  %v2742_v39 = vmul.f32 -0.5, %v3520_v20 }
 0x4fd   : > { %v3188_v46 = vpack.c.bf16 %v5244_v43, %v5239_v23  ;;  %v2693_v27 = vsel %vm5224_vm10, %v2690_v21, %v2687_v38  ;;  %v2745_v1 = vand.u32 2147483647, %v3520_v20  ;;  %v2676_v31 = vadd.f32 1.0, %v5193_v12 }
 0x4fe   : > { %v3522_v35 = vpop.eup %3521  ;;  %3531 = vlog2.f32 %v2739_v56  ;;  %v2797_v17 = vmul.f32 0.01, %v2693_v27  ;;  %v2647_v21 = vmul.f32 1.442695, %v2616_v25  ;;  %v2743_v27 = vadd.f32 1.0, %v2742_v39 }
 0x4ff   : > { %v3524_v11 = vpop.eup %3523  ;;  %v2705_v32 = vmul.f32 0.6931472, %v3522_v35  ;;  %3533 = vpow2.f32 %v2645_v6  ;;  %v2694_v0 = vadd.f32 1.0, %v5212_v33  ;;  %v2682_v25 = vand.u32 2147483647, %v5193_v12 }
 0x500   : > { %v5257_v16 = vpop.eup %3525  ;;  %v2757_v5 = vadd.f32 1.0, %v3524_v11  ;;  %3535 = vpow2.f32 %v2643_v59  ;;  %v2760_v38 = vmul.f32 -0.5, %v3524_v11  ;;  %v5270_v6 = vsel %vm2813_vm11, %v5112_v26, %v2797_v17 }
 0x501   : > { %v2711_v18 = vsel %vm5251_vm13, %v2708_v15, %v2705_v32  ;;  %v2662_v59 = vadd.f32 1.0, %v2661_v47  ;;  %v2763_v63 = vand.u32 2147483647, %v3524_v11  ;;  %v2679_v26 = vmul.f32 -0.5, %v5193_v12 }
 0x502   : > { %v3528_v10 = vpop.eup %3527  ;;  %v2799_v7 = vmul.f32 0.01, %v2711_v18  ;;  %3537 = vlog2.f32 %v2757_v5  ;;  %v2761_v14 = vadd.f32 1.0, %v2760_v38  ;;  %v2744_v32 = vmul.f32 %v3520_v20, %v2743_v27 }
 0x503   : > { %v2723_v56 = vmul.f32 0.6931472, %v3528_v10  ;;  %3539 = vlog2.f32 %v2658_v4  ;;  %v5279_v35 = vpop.eup %3529  ;;  %vm5289_vm1 = vcmp.lt.f32.partialorder %v2745_v1, 0.0004427343  ;;  %v2712_v4 = vadd.f32 1.0, %v5220_v9 }
 0x504   : > { %v5275_v58 = vsel %vm2815_vm12, %v5126_v8, %v2799_v7  ;;  %3541 = vlog2.f32 %v2676_v31  ;;  %v2663_v5 = vmul.f32 %v5187_v42, %v2662_v59  ;;  %vm5295_vm3 = vcmp.lt.f32.partialorder %v2664_v36, 0.0004427343 }
 0x505   : > { %v3192_v15 = vpack.c.bf16 %v5275_v58, %v5270_v6  ;;  %v2729_v8 = vsel %vm5259_vm6, %v2726_v53, %v2723_v56  ;;  %3543 = vlog2.f32 %v2694_v0  ;;  %v2697_v50 = vmul.f32 -0.5, %v5212_v33 }
 0x506   : > { %3545 = vpow2.f32 %v2647_v21  ;;  %v2801_v53 = vmul.f32 0.01, %v2729_v8  ;;  %vm5300_vm4 = vcmp.lt.f32.partialorder %v2763_v63, 0.0004427343  ;;  %v2680_v10 = vadd.f32 1.0, %v2679_v26 }
 0x507   : > { %3547 = vlog2.f32 %v2712_v4  ;;  %v2762_v7 = vmul.f32 %v3524_v11, %v2761_v14  ;;  %vm5304_vm7 = vcmp.lt.f32.partialorder %v2682_v25, 0.0004427343  ;;  %v2715_v42 = vmul.f32 -0.5, %v5220_v9 }
 0x508   : > { %v3532_v17 = vpop.eup %3531  ;;  %v2700_v59 = vand.u32 2147483647, %v5212_v33  ;;  %v2730_v31 = vadd.f32 1.0, %v5257_v16  ;;  %v2698_v11 = vadd.f32 1.0, %v2697_v50  ;;  %v2718_v0 = vand.u32 2147483647, %v5220_v9 }
 0x509   : > { %v3534_v18 = vpop.eup %3533  ;;  %v2741_v20 = vmul.f32 0.6931472, %v3532_v17  ;;  %vm2810_vm2 = vcmp.gt.f32.partialorder %v5115_v13, 20.0  ;;  %vm2812_vm5 = vcmp.gt.f32.partialorder %v5123_v28, 20.0  ;;  %v5321_v14 = vsel %vm2817_vm15, %v5142_v24, %v2801_v53 }
 0x50a   : > { %v2775_v38 = vadd.f32 1.0, %v3534_v18  ;;  %v5309_v56 = vpop.eup %3535  ;;  %v2778_v36 = vmul.f32 -0.5, %v3534_v18  ;;  %v2781_v25 = vand.u32 2147483647, %v3534_v18  ;;  %v2716_v50 = vadd.f32 1.0, %v2715_v42 }
 0x50b   : > { %v2747_v27 = vsel %vm5289_vm1, %v2744_v32, %v2741_v20  ;;  %v2681_v32 = vmul.f32 %v5193_v12, %v2680_v10  ;;  %v2733_v45 = vmul.f32 -0.5, %v5257_v16  ;;  %v2748_v24 = vadd.f32 1.0, %v5279_v35 }
 0x50c   : > { %v3538_v63 = vpop.eup %3537  ;;  %v2803_v26 = vmul.f32 0.01, %v2747_v27  ;;  %3549 = vlog2.f32 %v2775_v38  ;;  %v2779_v38 = vadd.f32 1.0, %v2778_v36  ;;  %vm2814_vm8 = vcmp.gt.f32.partialorder %v5132_v29, 20.0 }
 0x50d   : > { %v3540_v8 = vpop.eup %3539  ;;  %3551 = vlog2.f32 %v2730_v31  ;;  %v2759_v4 = vmul.f32 0.6931472, %v3538_v63  ;;  %vm2816_vm9 = vcmp.gt.f32.partialorder %v5140_v37, 20.0  ;;  %v2699_v19 = vmul.f32 %v5212_v33, %v2698_v11 }
 0x50e   : > { %v5327_v39 = vsel %vm2819_vm0, %v5155_v44, %v2803_v26  ;;  %v2660_v17 = vmul.f32 0.6931472, %v3540_v8  ;;  %v3542_v53 = vpop.eup %3541  ;;  %vm5338_vm10 = vcmp.lt.f32.partialorder %v2700_v59, 0.0004427343  ;;  %vm5342_vm11 = vcmp.lt.f32.partialorder %v2718_v0, 0.0004427343 }
 0x50f   : > { %v3196_v20 = vpack.c.bf16 %v5327_v39, %v5321_v14  ;;  %v3544_v42 = vpop.eup %3543  ;;  %vm5346_vm12 = vcmp.lt.f32.partialorder %v2781_v25, 0.0004427343  ;;  %v2678_v36 = vmul.f32 0.6931472, %v3542_v53  ;;  %v2736_v31 = vand.u32 2147483647, %v5257_v16 }
 0x510   : > { %v2666_v44 = vsel %vm5295_vm3, %v2663_v5, %v2660_v17  ;;  %3553 = vlog2.f32 %v2748_v24  ;;  %v5351_v5 = vpop.eup %3545  ;;  %v2765_v33 = vsel %vm5300_vm4, %v2762_v7, %v2759_v4  ;;  %v2696_v59 = vmul.f32 0.6931472, %v3544_v42  ;;  %v2841_v14 = vld [vmem:[%s5489_s10] sm:$0xff] }
 0x511   : > { %v2794_v47 = vmul.f32 0.01, %v2666_v44  ;;  %v2717_v63 = vmul.f32 %v5220_v9, %v2716_v50  ;;  %v3548_v26 = vpop.eup %3547  ;;  %v2780_v11 = vmul.f32 %v3534_v18, %v2779_v38  ;;  %v2684_v0 = vsel %vm5304_vm7, %v2681_v32, %v2678_v36 }
 0x512   : > { %v2734_v8 = vadd.f32 1.0, %v2733_v45  ;;  %v2766_v25 = vadd.f32 1.0, %v5309_v56  ;;  %v2796_v17 = vmul.f32 0.01, %v2684_v0  ;;  %v2702_v24 = vsel %vm5338_vm10, %v2699_v19, %v2696_v59 }
 0x513   : > { %v2714_v53 = vmul.f32 0.6931472, %v3548_v26  ;;  %v2751_v1 = vmul.f32 -0.5, %v5279_v35  ;;  %v2805_v7 = vmul.f32 0.01, %v2765_v33  ;;  %v2826_v18 = vsel %vm2810_vm2, %v5104_v48, %v2794_v47 }
 0x514   : > { %v2798_v4 = vmul.f32 0.01, %v2702_v24  ;;  %vm5362_vm13 = vcmp.lt.f32.partialorder %v2736_v31, 0.0004427343  ;;  %3555 = vlog2.f32 %v2766_v25  ;;  %v2828_v21 = vsel %vm2812_vm5, %v5109_v3, %v2796_v17 }
 0x515   : > { %v2720_v32 = vsel %vm5342_vm11, %v2717_v63, %v2714_v53  ;;  %v2784_v50 = vadd.f32 1.0, %v5351_v5  ;;  %v3186_v19 = vpack.c.bf16 %v2828_v21, %v2826_v18  ;;  %v2735_v42 = vmul.f32 %v5257_v16, %v2734_v8 }
 0x516   : > { %v3550_v9 = vpop.eup %3549  ;;  %v2800_v12 = vmul.f32 0.01, %v2720_v32  ;;  %v2752_v31 = vadd.f32 1.0, %v2751_v1  ;;  %v2769_v13 = vmul.f32 -0.5, %v5309_v56  ;;  %v2830_v3 = vsel %vm2814_vm8, %v5120_v57, %v2798_v4 }
 0x517   : > { %v3552_v38 = vpop.eup %3551  ;;  %v2777_v45 = vmul.f32 0.6931472, %v3550_v9  ;;  %3557 = vlog2.f32 %v2784_v50  ;;  %3187 = vmatprep.subr.bf16.mxu0 %v3186_v19  ;;  %v2754_v10 = vand.u32 2147483647, %v5279_v35  ;;  %vm2821_vm6 = vcmp.gt.f32.partialorder %v5177_v2, 20.0 }
 0x518   : > { %v2732_v36 = vmul.f32 0.6931472, %v3552_v38  ;;  %v2832_v28 = vsel %vm2816_vm9, %v5128_v49, %v2800_v12  ;;  %3189 = vmatpush1.bf16.msra.mxu0 %v3188_v46  ;;  %v2837_v57 = vsel %vm2821_vm6, %v5166_v61, %v2805_v7  ;;  %vm2823_vm15 = vcmp.gt.f32.partialorder %v5218_v62, 20.0 }
 0x519   : > { %v2783_v48 = vsel %vm5346_vm12, %v2780_v11, %v2777_v45  ;;  %v3190_v27 = vpack.c.bf16 %v2832_v28, %v2830_v3  ;;  %v2787_v49 = vmul.f32 -0.5, %v5351_v5  ;;  %v2753_v2 = vmul.f32 %v5279_v35, %v2752_v31 }
 0x51a   : > { %v2807_v16 = vmul.f32 0.01, %v2783_v48  ;;  %v2738_v33 = vsel %vm5362_vm13, %v2735_v42, %v2732_v36  ;;  %v3554_v47 = vpop.eup %3553  ;;  %v2770_v59 = vadd.f32 1.0, %v2769_v13  ;;  %vm2755_vm0 = vcmp.lt.f32.partialorder %v2754_v10, 0.0004427343 }
 0x51b   : > { %3191 = vmatprep.subr.bf16.mxu0 %v3190_v27  ;;  %v2750_v37 = vmul.f32 0.6931472, %v3554_v47  ;;  %v2802_v43 = vmul.f32 0.01, %v2738_v33  ;;  %v2772_v46 = vand.u32 2147483647, %v5309_v56 }
 0x51c   : > { %v2839_v29 = vsel %vm2823_vm15, %v5202_v34, %v2807_v16  ;;  %3193 = vmatpush1.bf16.msra.mxu0 %v3192_v15  ;;  %vm2818_vm1 = vcmp.gt.f32.partialorder %v5159_v41, 20.0  ;;  %v2788_v34 = vadd.f32 1.0, %v2787_v49  ;;  %vm2820_vm3 = vcmp.gt.f32.partialorder %v5174_v54, 20.0 }
 0x51d   : > { %v3200_v23 = vpack.c.bf16 %v2839_v29, %v2837_v57  ;;  %v2756_v61 = vsel %vm2755_vm0, %v2753_v2, %v2750_v37  ;;  %v2771_v35 = vmul.f32 %v5309_v56, %v2770_v59  ;;  %v2790_v11 = vand.u32 2147483647, %v5351_v5 }
 0x51e   : > { %v3556_v62 = vpop.eup %3555  ;;  %v2804_v63 = vmul.f32 0.01, %v2756_v61  ;;  %v2834_v0 = vsel %vm2818_vm1, %v5151_v30, %v2802_v43  ;;  %vm2773_vm4 = vcmp.lt.f32.partialorder %v2772_v46, 0.0004427343  ;;  %v2789_v41 = vmul.f32 %v5351_v5, %v2788_v34  ;;  %v2853_v5 = vpop.permute.xlu0 %2852 }
 0x51f   : > { %v2768_v26 = vmul.f32 0.6931472, %v3556_v62  ;;  %vm2791_vm7 = vcmp.lt.f32.partialorder %v2790_v11, 0.0004427343  ;;  %vm2822_vm2 = vcmp.gt.f32.partialorder %v5200_v22, 20.0  ;;  %vm2824_vm5 = vcmp.gt.f32.partialorder %v5231_v60, 20.0 }
 0x520   : > { %v2836_v8 = vsel %vm2820_vm3, %v5164_v52, %v2804_v63  ;;  %v2842_v22 = vld [vmem:[%s5489_s10 + $0x8] sm:$0xff] }
 0x521   : > { %v3558_v6 = vpop.eup %3557  ;;  %v3194_v58 = vpack.c.bf16 %v2836_v8, %v2834_v0  ;;  %v2774_v15 = vsel %vm2773_vm4, %v2771_v35, %v2768_v26 }
 0x522   : > { %v2786_v25 = vmul.f32 0.6931472, %v3558_v6  ;;  %v2806_v17 = vmul.f32 0.01, %v2774_v15 }
 0x523   : > { %3195 = vmatprep.subr.bf16.mxu0 %v3194_v58 }
 0x524   : > { %3197 = vmatpush1.bf16.msra.mxu0 %v3196_v20  ;;  %v2792_v54 = vsel %vm2791_vm7, %v2789_v41, %v2786_v25  ;;  %v2838_v30 = vsel %vm2822_vm2, %v5180_v40, %v2806_v17  ;;  %v2848_v40 = vpop.permute.xlu1 %2847 }
 0x525   : > { %v2808_v56 = vmul.f32 0.01, %v2792_v54 }
 0x527   : > { %v2840_v52 = vsel %vm2824_vm5, %v5214_v55, %v2808_v56 }
 0x528   : > { %v3198_v24 = vpack.c.bf16 %v2840_v52, %v2838_v30 }
 0x52a   : > { %3199 = vmatprep.subr.bf16.mxu0 %v3198_v24 }
 0x52b   : > { %3201 = vmatpush1.bf16.msra.mxu0 %v3200_v23 }
 0x52e   : > { %3120 = vmatmul.mubr.msk.f32.vlgmr.msra.gmra.mrb[40].mxu0 %vm1429_vm14, %v2841_v14 }
 0x52f   : > { %2931 = vmatprep.mubr.f32.mxu0 %v5553_v51 }
 0x532   : > { %3121 = vmatmul.mubr.msk.f32.gmra.mrb[42].mxu0 %vm1429_vm14, %v2842_v22 }
 0x601   : > { %v2927_v55 = vpop.f32.mrb[40].mxu0 }
 0x602   : > { %v2928_v60 = vadd.f32 %v2927_v55, %v2848_v40  ;;  %v2929_v39 = vpop.f32.mrb[41].mxu0 }
 0x603   : > { %v2930_v20 = vadd.f32 %v2929_v39, %v2848_v40 }
 0x604   : > { %2938 = vst [vmem:[%s446_s14] sm:$0xff] %v2928_v60 }
 0x605   : > { %2939 = vst [vmem:[%s446_s14 + $0x8] sm:$0xff] %v2930_v20  ;;  %v2933_v51 = vpop.f32.mrb[42].mxu0 }
 0x606   : > { %v2934_v53 = vadd.f32 %v2933_v51, %v2853_v5  ;;  %v2935_v1 = vpop.f32.mrb[43].mxu0 }
 0x607   : > { %v2936_v7 = vadd.f32 %v2935_v1, %v2853_v5 }
 0x608   : > { %2940 = vst [vmem:[%s446_s14 + $0x10] sm:$0xff] %v2934_v53 }
 0x609   : > { %2941 = vst [vmem:[%s446_s14 + $0x18] sm:$0xff] %v2936_v7 }
 0x60a   : > { %3572 = shalt.err (!%p3569_p5)
}
 0x60b   : > { %s3573_s28 = scalar_lea.hbm %s5431_s20, 512  ;;  %s3577_s29 = scalar_lea.hbm %s5491_s12, 1024 }
 0x60c   : > { %p3574_p6 = scmp.ne.s32.totalorder %s5431_s20, %s3573_s28  ;;  %p3578_p10 = scmp.lt.u32.totalorder %s5431_s20, %s5491_s12 }
 0x60d   : > { %p3579_p11 = scmp.lt.u32.totalorder %s3577_s29, %s3573_s28  ;;  %p3581_p13 = scmp.lt.u32.totalorder %s3573_s28, %s5431_s20 }
 0x60e   : > { %p3575_p7 = pnand %p3574_p6, %p3756_p4 }
 0x60f   : > { %p3580_p12 = por %p3579_p11, %p3578_p10 }
 0x610   : > { %p3576_p9 = pneg %p3575_p7 }
 0x611   : > { %p3582_p0 = por %p3581_p13, %p3580_p12 }
 0x613   : > { %p3583_p1 = pnand %p3582_p0, %p3576_p9 }
 0x615   : > { %3586 = shalt.err (!%p3583_p1)
}
 0x616   : > { %s3649_s1 = smov 256   ;;  %s3650_s24 = smov 16  }
 0x617   : > { %3234 = dma.vmem_to_hbm [thread:$0]  (%p3756_p4), %s5426_s17, 512, %s5431_s20, %s5433_s27, %s3649_s1, %s3649_s1, %s3650_s24  }
 0x618 PF: > { %p3240_p2 = scmp.ge.s32.totalorder %s3637_s26, 2  ;;  %s2973_s30 = sand.u32 1, %s3617_s21  }
 0x619   : > { %s2974_s28 = scalar_lea.sflag [#allocation3], %s2973_s30 }
 0x61a   : > { %p3237_p3 = pnand %p3240_p2, %p3763_p8 }
 0x61c   : > { %3612 = dma.done.wait (!%p3237_p3), %s2974_s28, 512  }
 0x61d   : > { %3614 = vsyncadd (!%p3237_p3), %s2974_s28, 4294966784  ;;  %s25_s26 = sadd.s32 1, %s3637_s26   ;;  %s5596_s13 = sld [smem:[#allocation5_spill]] }
 0x61e   : > { %p22_p5 = scmp.ge.s32.totalorder %s25_s26, 4   ;;  %s5597_s21 = smov %s3621_s22 }
 0x61f   : > { %s5598_s22 = smov %s3625_s23  ;;  %s5599_s23 = smov %s3769_s16 }
 0x620   : > { %s5600_s24 = smov %s3633_s25  ;;  %24 = sbr.rel (!%p22_p5) target bundleno = 7 (0x7), region = 106 }
 0x623   : > { %s5601_s25 = smov %s5596_s13 }
 0x627   :  { %2979 = vsyncpa [#allocation3], 1 }
 0x628   :  { %2981 = vsyncpa [#allocation3 + $0x1], 1 }

</bundles_post_ra>
